<compile_context>
chip_gen: v7x
topology: tpu7x:2x2x1
jax: 0.10.0
libtpu: 0.0.40
codegen_flags: <defaults>
</compile_context>

<pallas_src>
import functools

import jax
import jax.numpy as jnp
from jax import lax
from jax.experimental import pallas as pl
from jax.experimental.pallas import tpu as pltpu

H = 8        # hidden channels of the concrete flow model
L = 128      # number of spatial cells (lane axis -> lane-dense)
B_TILE = 8   # rollouts per grid step (fills the 8 sublanes of a vreg)


def _rollout_kernel(x_ref, p_ref, o_ref, *, dt_over_dx, m):
    """Fused m-step, B_TILE-wide rollout: q <- q + (dt/dx)*Conv1d(tanh(Conv1d(q))).

    x_ref : (B_TILE, L) f32     initial densities (one rollout per sublane)
    p_ref : (8, 8)      f32     packed params: [:, :3]=w1, [:, 3:4]=b1,
                                [:, 4:7]=w2, [0, 7]=b2
    o_ref : (m, B_TILE, L) f32  one (B_TILE, L) slab per timestep (lane-dense)
    """
    p = p_ref[...]                                   # one tiny DMA, sliced below

    # ---- loop-invariant constants, hoisted once ---------------------------
    lane = lax.broadcasted_iota(jnp.int32, (1, H, L), 2)
    mL = (lane != 0).astype(jnp.float32)             # kills wrapped x[L-1] at i=0
    mR = (lane != L - 1).astype(jnp.float32)         # kills wrapped x[0]   at i=L-1

    w1 = p[:, 0:3]                                   # Conv1d(1,H,3).weight[:,0,:]
    b1 = p[:, 3:4]                                   # Conv1d(1,H,3).bias
    w2 = p[:, 4:7] * dt_over_dx                      # Conv1d(H,1,3).weight, dt/dx folded
    # padding masks folded into the tap-weight vregs (no per-step mask muls)
    w1m = jnp.reshape(w1[:, 0:1], (1, H, 1)) * mL
    w1c = jnp.broadcast_to(jnp.reshape(w1[:, 1:2], (1, H, 1)), (1, H, L))
    w1p = jnp.reshape(w1[:, 2:3], (1, H, 1)) * mR
    b1b = jnp.broadcast_to(jnp.reshape(b1, (1, H, 1)), (1, H, L))
    w2m = jnp.reshape(w2[:, 0:1], (1, H, 1)) * mL
    w2c = jnp.broadcast_to(jnp.reshape(w2[:, 1:2], (1, H, 1)), (1, H, L))
    w2p = jnp.reshape(w2[:, 2:3], (1, H, 1)) * mR
    b2b = jnp.broadcast_to(p[0:1, 7:8] * dt_over_dx, (B_TILE, L))   # dt/dx folded

    # ---- fused time loop (m small -> fully unrolled) ----------------------
    q = x_ref[...]                                   # (B_TILE, L)
    rows = []
    for _ in range(m):   # TODO(synk): cap unroll + group stores in 8s if m >> 16
        # zero-padded neighbor shifts: XLU lane rotations (masks live in weights)
        qm1 = pltpu.roll(q, shift=1, axis=1)[:, None, :]      # q[i-1] -> (B,1,L)
        qp1 = pltpu.roll(q, shift=L - 1, axis=1)[:, None, :]  # q[i+1] -> (B,1,L)
        qc = q[:, None, :]

        # Conv1d(1 -> H, k=3, padding=1) + tanh (EUP)
        h = jnp.tanh(w1m * qm1 + w1c * qc + w1p * qp1 + b1b)  # (B_TILE, H, L)

        h2 = jnp.reshape(h, (B_TILE * H, L))                  # layout no-op
        hm1 = jnp.reshape(pltpu.roll(h2, shift=1, axis=1), (B_TILE, H, L))
        hp1 = jnp.reshape(pltpu.roll(h2, shift=L - 1, axis=1), (B_TILE, H, L))

        # Conv1d(H -> 1, k=3, padding=1); dt/dx already folded into w2*/b2b
        f = jnp.sum(w2m * hm1 + w2c * h + w2p * hp1, axis=1)  # (B_TILE, L)

        q = q + f + b2b                                        # residual update
        rows.append(q)

    # one full-tile, unmasked store for the whole rollout
    o_ref[...] = jnp.stack(rows, axis=0)                       # (m, B_TILE, L)


def make_rollout_fn(dt: float, dx: float, m: int, batch: int):
    """Fused m-step rollout over `batch` initial conditions (one pallas_call)."""
    if batch % B_TILE != 0:
        raise ValueError(f"batch must be a multiple of {B_TILE}")
    kernel = functools.partial(_rollout_kernel,
                               dt_over_dx=float(dt / dx), m=int(m))
    return pl.pallas_call(
        kernel,
        out_shape=jax.ShapeDtypeStruct((m, batch, L), jnp.float32),
        grid=(batch // B_TILE,),
        in_specs=[pl.BlockSpec((B_TILE, L), lambda i: (i, 0)),
                  pl.BlockSpec((8, 8), lambda i: (0, 0))],   # constant -> fetched once
        out_specs=pl.BlockSpec((m, B_TILE, L), lambda i: (0, i, 0)),
        compiler_params=pltpu.CompilerParams(
            dimension_semantics=("parallel",)),              # shards across TCs on v7x
    )


def init_params(key):
    """Deterministic small-scale init for the concrete flow model."""
    k1, k2, k3, k4 = jax.random.split(key, 4)
    w1 = 0.1 * jax.random.normal(k1, (H, 3), jnp.float32)   # Conv1d(1,H,3).weight[:,0,:]
    b1 = 0.1 * jax.random.normal(k2, (H, 1), jnp.float32)   # Conv1d(1,H,3).bias
    w2 = 0.1 * jax.random.normal(k3, (H, 3), jnp.float32)   # Conv1d(H,1,3).weight[0,:,:]
    b2 = 0.1 * jax.random.normal(k4, (1, 1), jnp.float32)   # Conv1d(H,1,3).bias
    return w1, b1, w2, b2


def pack_params(w1, b1, w2, b2):
    """Pack all parameters into one (8, 8) f32 array -> a single kernel DMA."""
    p = jnp.zeros((8, 8), jnp.float32)
    p = p.at[:, 0:3].set(w1)
    p = p.at[:, 3:4].set(b1)
    p = p.at[:, 4:7].set(w2)
    p = p.at[0, 7].set(b2[0, 0])
    return p


def make_model(dt: float, dx: float, m: int, batch: int):
    """Jitted wrapper: (packed_params, q0 (batch, L)) -> (batch, L, m).

    Replicates torchModel.__call__ (free-flow BC, qr=ql=None) per batch row;
    the (L, m) PyTorch layout transpose is fused with the consumer under jit.
    """
    rollout_fn = make_rollout_fn(dt, dx, m, batch)

    @jax.jit
    def run(packed_params, q0_batch):
        out_mbl = rollout_fn(q0_batch.astype(jnp.float32), packed_params)  # (m, B, L)
        return jnp.transpose(out_mbl, (1, 2, 0))                           # (B, L, m)

    return run


def _reference_rollout(params, qx0, m, dt_over_dx):
    """Pure-JAX reference (same math, no Pallas) for a correctness check."""
    w1, b1, w2, b2 = params
    q = qx0.astype(jnp.float32).reshape(1, L)
    cols = []
    for _ in range(m):
        qm1 = jnp.concatenate([jnp.zeros((1, 1), jnp.float32), q[:, :-1]], axis=1)
        qp1 = jnp.concatenate([q[:, 1:], jnp.zeros((1, 1), jnp.float32)], axis=1)
        h = jnp.tanh(w1[:, 0:1] * qm1 + w1[:, 1:2] * q + w1[:, 2:3] * qp1 + b1)
        hm1 = jnp.concatenate([jnp.zeros((H, 1), jnp.float32), h[:, :-1]], axis=1)
        hp1 = jnp.concatenate([h[:, 1:], jnp.zeros((H, 1), jnp.float32)], axis=1)
        f = jnp.sum(w2[:, 0:1] * hm1 + w2[:, 1:2] * h + w2[:, 2:3] * hp1,
                    axis=0, keepdims=True) + b2
        q = q + dt_over_dx * f
        cols.append(q.reshape(-1))
    return jnp.stack(cols, axis=1)               # (L, m)


if __name__ == "__main__":
    dx, dt = 0.1, 0.01
    m = 8
    B = 16   # two grid tiles of 8 rollouts -> exercises the parallel grid axis

    key = jax.random.PRNGKey(0)
    kp, kx = jax.random.split(key)
    params = init_params(kp)
    packed = pack_params(*params)
    q0 = jax.random.uniform(kx, (B, L), jnp.float32)   # initial densities in [0, 1)

    run = make_model(dt, dx, m, B)
    Qtot = jax.block_until_ready(run(packed, q0))      # (B, L, m)

    assert Qtot.shape == (B, L, m)
    assert bool(jnp.all(jnp.isfinite(Qtot)))

    for b in range(B):
        Qref = _reference_rollout(params, q0[b], m, dt / dx)   # (L, m)
        assert bool(jnp.allclose(Qtot[b], Qref, atol=1e-3, rtol=1e-3)), \
            f"mismatch vs reference at batch {b}"

    print("KERNEL_OK")
</pallas_src>

<mosaic_0001>
module attributes {stable_mosaic.version = 11 : i64} {
  func.func @_rollout_kernel(%arg0: i32, %arg1: memref<8x128xf32, #tpu.memory_space<vmem>>, %arg2: memref<8x8xf32, #tpu.memory_space<vmem>>, %arg3: memref<8x8x128xf32, #tpu.memory_space<vmem>>) attributes {dimension_semantics = [#tpu.dimension_semantics<parallel>], iteration_bounds = array<i64: 2>, scalar_prefetch = 0 : i64, scratch_operands = 0 : i64, tpu.core_type = #tpu.core_type<tc>, window_params = [{transform_indices = @transform_0, window_bounds = array<i64: 8, 128>}, {pipeline_mode = #tpu.pipeline_mode<synchronous>, transform_indices = @transform_1, window_bounds = array<i64: 8, 8>}, {transform_indices = @transform_2, window_bounds = array<i64: 8, 8, 128>}]} {
    %c0 = arith.constant 0 : index
    %c0_0 = arith.constant 0 : index
    %0 = vector.load %arg2[%c0, %c0_0] : memref<8x8xf32, #tpu.memory_space<vmem>>, vector<8x8xf32>
    %1 = tpu.iota {dimensions = array<i32: 2>} : vector<1x8x128xi32>
    %c0_i32 = arith.constant 0 : i32
    %2 = vector.broadcast %c0_i32 : i32 to vector<1x8x128xi32>
    %3 = arith.cmpi ne, %1, %2 : vector<1x8x128xi32>
    %4 = arith.extui %3 : vector<1x8x128xi1> to vector<1x8x128xi32>
    %5 = arith.sitofp %4 : vector<1x8x128xi32> to vector<1x8x128xf32>
    %c127_i32 = arith.constant 127 : i32
    %6 = vector.broadcast %c127_i32 : i32 to vector<1x8x128xi32>
    %7 = arith.cmpi ne, %1, %6 : vector<1x8x128xi32>
    %8 = arith.extui %7 : vector<1x8x128xi1> to vector<1x8x128xi32>
    %9 = arith.sitofp %8 : vector<1x8x128xi32> to vector<1x8x128xf32>
    %10 = vector.extract_strided_slice %0 {offsets = [0, 0], sizes = [8, 3], strides = [1, 1]} : vector<8x8xf32> to vector<8x3xf32>
    %11 = vector.extract_strided_slice %0 {offsets = [0, 3], sizes = [8, 1], strides = [1, 1]} : vector<8x8xf32> to vector<8x1xf32>
    %12 = vector.extract_strided_slice %0 {offsets = [0, 4], sizes = [8, 3], strides = [1, 1]} : vector<8x8xf32> to vector<8x3xf32>
    %cst = arith.constant 1.000000e-01 : f32
    %13 = vector.broadcast %cst : f32 to vector<8x3xf32>
    %14 = arith.mulf %12, %13 : vector<8x3xf32>
    %15 = vector.extract_strided_slice %10 {offsets = [0, 0], sizes = [8, 1], strides = [1, 1]} : vector<8x3xf32> to vector<8x1xf32>
    %16 = vector.shape_cast %15 : vector<8x1xf32> to vector<1x8x1xf32>
    %17 = vector.broadcast %16 : vector<1x8x1xf32> to vector<1x8x128xf32>
    %18 = arith.mulf %17, %5 : vector<1x8x128xf32>
    %19 = vector.extract_strided_slice %10 {offsets = [0, 1], sizes = [8, 1], strides = [1, 1]} : vector<8x3xf32> to vector<8x1xf32>
    %20 = vector.shape_cast %19 : vector<8x1xf32> to vector<1x8x1xf32>
    %21 = vector.shape_cast %20 : vector<1x8x1xf32> to vector<1x8x1xf32>
    %22 = vector.broadcast %21 : vector<1x8x1xf32> to vector<1x8x128xf32>
    %23 = vector.extract_strided_slice %10 {offsets = [0, 2], sizes = [8, 1], strides = [1, 1]} : vector<8x3xf32> to vector<8x1xf32>
    %24 = vector.shape_cast %23 : vector<8x1xf32> to vector<1x8x1xf32>
    %25 = vector.broadcast %24 : vector<1x8x1xf32> to vector<1x8x128xf32>
    %26 = arith.mulf %25, %9 : vector<1x8x128xf32>
    %27 = vector.shape_cast %11 : vector<8x1xf32> to vector<1x8x1xf32>
    %28 = vector.shape_cast %27 : vector<1x8x1xf32> to vector<1x8x1xf32>
    %29 = vector.broadcast %28 : vector<1x8x1xf32> to vector<1x8x128xf32>
    %30 = vector.extract_strided_slice %14 {offsets = [0, 0], sizes = [8, 1], strides = [1, 1]} : vector<8x3xf32> to vector<8x1xf32>
    %31 = vector.shape_cast %30 : vector<8x1xf32> to vector<1x8x1xf32>
    %32 = vector.broadcast %31 : vector<1x8x1xf32> to vector<1x8x128xf32>
    %33 = arith.mulf %32, %5 : vector<1x8x128xf32>
    %34 = vector.extract_strided_slice %14 {offsets = [0, 1], sizes = [8, 1], strides = [1, 1]} : vector<8x3xf32> to vector<8x1xf32>
    %35 = vector.shape_cast %34 : vector<8x1xf32> to vector<1x8x1xf32>
    %36 = vector.shape_cast %35 : vector<1x8x1xf32> to vector<1x8x1xf32>
    %37 = vector.broadcast %36 : vector<1x8x1xf32> to vector<1x8x128xf32>
    %38 = vector.extract_strided_slice %14 {offsets = [0, 2], sizes = [8, 1], strides = [1, 1]} : vector<8x3xf32> to vector<8x1xf32>
    %39 = vector.shape_cast %38 : vector<8x1xf32> to vector<1x8x1xf32>
    %40 = vector.broadcast %39 : vector<1x8x1xf32> to vector<1x8x128xf32>
    %41 = arith.mulf %40, %9 : vector<1x8x128xf32>
    %42 = vector.extract_strided_slice %0 {offsets = [0, 7], sizes = [1, 1], strides = [1, 1]} : vector<8x8xf32> to vector<1x1xf32>
    %cst_1 = arith.constant 1.000000e-01 : f32
    %43 = vector.broadcast %cst_1 : f32 to vector<1x1xf32>
    %44 = arith.mulf %42, %43 : vector<1x1xf32>
    %45 = vector.shape_cast %44 : vector<1x1xf32> to vector<1x1xf32>
    %46 = vector.broadcast %45 : vector<1x1xf32> to vector<8x128xf32>
    %c0_2 = arith.constant 0 : index
    %c0_3 = arith.constant 0 : index
    %47 = vector.load %arg1[%c0_2, %c0_3] : memref<8x128xf32, #tpu.memory_space<vmem>>, vector<8x128xf32>
    %c1_i32 = arith.constant 1 : i32
    %48 = tpu.dynamic_rotate %47 by %c1_i32 dim 1 : vector<8x128xf32>, i32 -> vector<8x128xf32>
    %49 = vector.shape_cast %48 : vector<8x128xf32> to vector<8x1x128xf32>
    %c127_i32_4 = arith.constant 127 : i32
    %50 = tpu.dynamic_rotate %47 by %c127_i32_4 dim 1 : vector<8x128xf32>, i32 -> vector<8x128xf32>
    %51 = vector.shape_cast %50 : vector<8x128xf32> to vector<8x1x128xf32>
    %52 = vector.shape_cast %47 : vector<8x128xf32> to vector<8x1x128xf32>
    %53 = vector.broadcast %18 : vector<1x8x128xf32> to vector<8x8x128xf32>
    %54 = vector.broadcast %49 : vector<8x1x128xf32> to vector<8x8x128xf32>
    %55 = arith.mulf %53, %54 : vector<8x8x128xf32>
    %56 = vector.broadcast %22 : vector<1x8x128xf32> to vector<8x8x128xf32>
    %57 = vector.broadcast %52 : vector<8x1x128xf32> to vector<8x8x128xf32>
    %58 = arith.mulf %56, %57 : vector<8x8x128xf32>
    %59 = arith.addf %55, %58 : vector<8x8x128xf32>
    %60 = vector.broadcast %26 : vector<1x8x128xf32> to vector<8x8x128xf32>
    %61 = vector.broadcast %51 : vector<8x1x128xf32> to vector<8x8x128xf32>
    %62 = arith.mulf %60, %61 : vector<8x8x128xf32>
    %63 = arith.addf %59, %62 : vector<8x8x128xf32>
    %64 = vector.broadcast %29 : vector<1x8x128xf32> to vector<8x8x128xf32>
    %65 = arith.addf %63, %64 : vector<8x8x128xf32>
    %66 = math.tanh %65 : vector<8x8x128xf32>
    %67 = vector.shape_cast %66 : vector<8x8x128xf32> to vector<64x128xf32>
    %c1_i32_5 = arith.constant 1 : i32
    %68 = tpu.dynamic_rotate %67 by %c1_i32_5 dim 1 : vector<64x128xf32>, i32 -> vector<64x128xf32>
    %69 = vector.shape_cast %68 : vector<64x128xf32> to vector<8x8x128xf32>
    %c127_i32_6 = arith.constant 127 : i32
    %70 = tpu.dynamic_rotate %67 by %c127_i32_6 dim 1 : vector<64x128xf32>, i32 -> vector<64x128xf32>
    %71 = vector.shape_cast %70 : vector<64x128xf32> to vector<8x8x128xf32>
    %72 = vector.broadcast %33 : vector<1x8x128xf32> to vector<8x8x128xf32>
    %73 = arith.mulf %72, %69 : vector<8x8x128xf32>
    %74 = vector.broadcast %37 : vector<1x8x128xf32> to vector<8x8x128xf32>
    %75 = arith.mulf %74, %66 : vector<8x8x128xf32>
    %76 = arith.addf %73, %75 : vector<8x8x128xf32>
    %77 = vector.broadcast %41 : vector<1x8x128xf32> to vector<8x8x128xf32>
    %78 = arith.mulf %77, %71 : vector<8x8x128xf32>
    %79 = arith.addf %76, %78 : vector<8x8x128xf32>
    %cst_7 = arith.constant dense<0.000000e+00> : vector<8x128xf32>
    %80 = vector.multi_reduction <add>, %79, %cst_7 [1] : vector<8x8x128xf32> to vector<8x128xf32>
    %81 = arith.addf %47, %80 : vector<8x128xf32>
    %82 = arith.addf %81, %46 : vector<8x128xf32>
    %c1_i32_8 = arith.constant 1 : i32
    %83 = tpu.dynamic_rotate %82 by %c1_i32_8 dim 1 : vector<8x128xf32>, i32 -> vector<8x128xf32>
    %84 = vector.shape_cast %83 : vector<8x128xf32> to vector<8x1x128xf32>
    %c127_i32_9 = arith.constant 127 : i32
    %85 = tpu.dynamic_rotate %82 by %c127_i32_9 dim 1 : vector<8x128xf32>, i32 -> vector<8x128xf32>
    %86 = vector.shape_cast %85 : vector<8x128xf32> to vector<8x1x128xf32>
    %87 = vector.shape_cast %82 : vector<8x128xf32> to vector<8x1x128xf32>
    %88 = vector.broadcast %18 : vector<1x8x128xf32> to vector<8x8x128xf32>
    %89 = vector.broadcast %84 : vector<8x1x128xf32> to vector<8x8x128xf32>
    %90 = arith.mulf %88, %89 : vector<8x8x128xf32>
    %91 = vector.broadcast %22 : vector<1x8x128xf32> to vector<8x8x128xf32>
    %92 = vector.broadcast %87 : vector<8x1x128xf32> to vector<8x8x128xf32>
    %93 = arith.mulf %91, %92 : vector<8x8x128xf32>
    %94 = arith.addf %90, %93 : vector<8x8x128xf32>
    %95 = vector.broadcast %26 : vector<1x8x128xf32> to vector<8x8x128xf32>
    %96 = vector.broadcast %86 : vector<8x1x128xf32> to vector<8x8x128xf32>
    %97 = arith.mulf %95, %96 : vector<8x8x128xf32>
    %98 = arith.addf %94, %97 : vector<8x8x128xf32>
    %99 = vector.broadcast %29 : vector<1x8x128xf32> to vector<8x8x128xf32>
    %100 = arith.addf %98, %99 : vector<8x8x128xf32>
    %101 = math.tanh %100 : vector<8x8x128xf32>
    %102 = vector.shape_cast %101 : vector<8x8x128xf32> to vector<64x128xf32>
    %c1_i32_10 = arith.constant 1 : i32
    %103 = tpu.dynamic_rotate %102 by %c1_i32_10 dim 1 : vector<64x128xf32>, i32 -> vector<64x128xf32>
    %104 = vector.shape_cast %103 : vector<64x128xf32> to vector<8x8x128xf32>
    %c127_i32_11 = arith.constant 127 : i32
    %105 = tpu.dynamic_rotate %102 by %c127_i32_11 dim 1 : vector<64x128xf32>, i32 -> vector<64x128xf32>
    %106 = vector.shape_cast %105 : vector<64x128xf32> to vector<8x8x128xf32>
    %107 = vector.broadcast %33 : vector<1x8x128xf32> to vector<8x8x128xf32>
    %108 = arith.mulf %107, %104 : vector<8x8x128xf32>
    %109 = vector.broadcast %37 : vector<1x8x128xf32> to vector<8x8x128xf32>
    %110 = arith.mulf %109, %101 : vector<8x8x128xf32>
    %111 = arith.addf %108, %110 : vector<8x8x128xf32>
    %112 = vector.broadcast %41 : vector<1x8x128xf32> to vector<8x8x128xf32>
    %113 = arith.mulf %112, %106 : vector<8x8x128xf32>
    %114 = arith.addf %111, %113 : vector<8x8x128xf32>
    %cst_12 = arith.constant dense<0.000000e+00> : vector<8x128xf32>
    %115 = vector.multi_reduction <add>, %114, %cst_12 [1] : vector<8x8x128xf32> to vector<8x128xf32>
    %116 = arith.addf %82, %115 : vector<8x128xf32>
    %117 = arith.addf %116, %46 : vector<8x128xf32>
    %c1_i32_13 = arith.constant 1 : i32
    %118 = tpu.dynamic_rotate %117 by %c1_i32_13 dim 1 : vector<8x128xf32>, i32 -> vector<8x128xf32>
    %119 = vector.shape_cast %118 : vector<8x128xf32> to vector<8x1x128xf32>
    %c127_i32_14 = arith.constant 127 : i32
    %120 = tpu.dynamic_rotate %117 by %c127_i32_14 dim 1 : vector<8x128xf32>, i32 -> vector<8x128xf32>
    %121 = vector.shape_cast %120 : vector<8x128xf32> to vector<8x1x128xf32>
    %122 = vector.shape_cast %117 : vector<8x128xf32> to vector<8x1x128xf32>
    %123 = vector.broadcast %18 : vector<1x8x128xf32> to vector<8x8x128xf32>
    %124 = vector.broadcast %119 : vector<8x1x128xf32> to vector<8x8x128xf32>
    %125 = arith.mulf %123, %124 : vector<8x8x128xf32>
    %126 = vector.broadcast %22 : vector<1x8x128xf32> to vector<8x8x128xf32>
    %127 = vector.broadcast %122 : vector<8x1x128xf32> to vector<8x8x128xf32>
    %128 = arith.mulf %126, %127 : vector<8x8x128xf32>
    %129 = arith.addf %125, %128 : vector<8x8x128xf32>
    %130 = vector.broadcast %26 : vector<1x8x128xf32> to vector<8x8x128xf32>
    %131 = vector.broadcast %121 : vector<8x1x128xf32> to vector<8x8x128xf32>
    %132 = arith.mulf %130, %131 : vector<8x8x128xf32>
    %133 = arith.addf %129, %132 : vector<8x8x128xf32>
    %134 = vector.broadcast %29 : vector<1x8x128xf32> to vector<8x8x128xf32>
    %135 = arith.addf %133, %134 : vector<8x8x128xf32>
    %136 = math.tanh %135 : vector<8x8x128xf32>
    %137 = vector.shape_cast %136 : vector<8x8x128xf32> to vector<64x128xf32>
    %c1_i32_15 = arith.constant 1 : i32
    %138 = tpu.dynamic_rotate %137 by %c1_i32_15 dim 1 : vector<64x128xf32>, i32 -> vector<64x128xf32>
    %139 = vector.shape_cast %138 : vector<64x128xf32> to vector<8x8x128xf32>
    %c127_i32_16 = arith.constant 127 : i32
    %140 = tpu.dynamic_rotate %137 by %c127_i32_16 dim 1 : vector<64x128xf32>, i32 -> vector<64x128xf32>
    %141 = vector.shape_cast %140 : vector<64x128xf32> to vector<8x8x128xf32>
    %142 = vector.broadcast %33 : vector<1x8x128xf32> to vector<8x8x128xf32>
    %143 = arith.mulf %142, %139 : vector<8x8x128xf32>
    %144 = vector.broadcast %37 : vector<1x8x128xf32> to vector<8x8x128xf32>
    %145 = arith.mulf %144, %136 : vector<8x8x128xf32>
    %146 = arith.addf %143, %145 : vector<8x8x128xf32>
    %147 = vector.broadcast %41 : vector<1x8x128xf32> to vector<8x8x128xf32>
    %148 = arith.mulf %147, %141 : vector<8x8x128xf32>
    %149 = arith.addf %146, %148 : vector<8x8x128xf32>
    %cst_17 = arith.constant dense<0.000000e+00> : vector<8x128xf32>
    %150 = vector.multi_reduction <add>, %149, %cst_17 [1] : vector<8x8x128xf32> to vector<8x128xf32>
    %151 = arith.addf %117, %150 : vector<8x128xf32>
    %152 = arith.addf %151, %46 : vector<8x128xf32>
    %c1_i32_18 = arith.constant 1 : i32
    %153 = tpu.dynamic_rotate %152 by %c1_i32_18 dim 1 : vector<8x128xf32>, i32 -> vector<8x128xf32>
    %154 = vector.shape_cast %153 : vector<8x128xf32> to vector<8x1x128xf32>
    %c127_i32_19 = arith.constant 127 : i32
    %155 = tpu.dynamic_rotate %152 by %c127_i32_19 dim 1 : vector<8x128xf32>, i32 -> vector<8x128xf32>
    %156 = vector.shape_cast %155 : vector<8x128xf32> to vector<8x1x128xf32>
    %157 = vector.shape_cast %152 : vector<8x128xf32> to vector<8x1x128xf32>
    %158 = vector.broadcast %18 : vector<1x8x128xf32> to vector<8x8x128xf32>
    %159 = vector.broadcast %154 : vector<8x1x128xf32> to vector<8x8x128xf32>
    %160 = arith.mulf %158, %159 : vector<8x8x128xf32>
    %161 = vector.broadcast %22 : vector<1x8x128xf32> to vector<8x8x128xf32>
    %162 = vector.broadcast %157 : vector<8x1x128xf32> to vector<8x8x128xf32>
    %163 = arith.mulf %161, %162 : vector<8x8x128xf32>
    %164 = arith.addf %160, %163 : vector<8x8x128xf32>
    %165 = vector.broadcast %26 : vector<1x8x128xf32> to vector<8x8x128xf32>
    %166 = vector.broadcast %156 : vector<8x1x128xf32> to vector<8x8x128xf32>
    %167 = arith.mulf %165, %166 : vector<8x8x128xf32>
    %168 = arith.addf %164, %167 : vector<8x8x128xf32>
    %169 = vector.broadcast %29 : vector<1x8x128xf32> to vector<8x8x128xf32>
    %170 = arith.addf %168, %169 : vector<8x8x128xf32>
    %171 = math.tanh %170 : vector<8x8x128xf32>
    %172 = vector.shape_cast %171 : vector<8x8x128xf32> to vector<64x128xf32>
    %c1_i32_20 = arith.constant 1 : i32
    %173 = tpu.dynamic_rotate %172 by %c1_i32_20 dim 1 : vector<64x128xf32>, i32 -> vector<64x128xf32>
    %174 = vector.shape_cast %173 : vector<64x128xf32> to vector<8x8x128xf32>
    %c127_i32_21 = arith.constant 127 : i32
    %175 = tpu.dynamic_rotate %172 by %c127_i32_21 dim 1 : vector<64x128xf32>, i32 -> vector<64x128xf32>
    %176 = vector.shape_cast %175 : vector<64x128xf32> to vector<8x8x128xf32>
    %177 = vector.broadcast %33 : vector<1x8x128xf32> to vector<8x8x128xf32>
    %178 = arith.mulf %177, %174 : vector<8x8x128xf32>
    %179 = vector.broadcast %37 : vector<1x8x128xf32> to vector<8x8x128xf32>
    %180 = arith.mulf %179, %171 : vector<8x8x128xf32>
    %181 = arith.addf %178, %180 : vector<8x8x128xf32>
    %182 = vector.broadcast %41 : vector<1x8x128xf32> to vector<8x8x128xf32>
    %183 = arith.mulf %182, %176 : vector<8x8x128xf32>
    %184 = arith.addf %181, %183 : vector<8x8x128xf32>
    %cst_22 = arith.constant dense<0.000000e+00> : vector<8x128xf32>
    %185 = vector.multi_reduction <add>, %184, %cst_22 [1] : vector<8x8x128xf32> to vector<8x128xf32>
    %186 = arith.addf %152, %185 : vector<8x128xf32>
    %187 = arith.addf %186, %46 : vector<8x128xf32>
    %c1_i32_23 = arith.constant 1 : i32
    %188 = tpu.dynamic_rotate %187 by %c1_i32_23 dim 1 : vector<8x128xf32>, i32 -> vector<8x128xf32>
    %189 = vector.shape_cast %188 : vector<8x128xf32> to vector<8x1x128xf32>
    %c127_i32_24 = arith.constant 127 : i32
    %190 = tpu.dynamic_rotate %187 by %c127_i32_24 dim 1 : vector<8x128xf32>, i32 -> vector<8x128xf32>
    %191 = vector.shape_cast %190 : vector<8x128xf32> to vector<8x1x128xf32>
    %192 = vector.shape_cast %187 : vector<8x128xf32> to vector<8x1x128xf32>
    %193 = vector.broadcast %18 : vector<1x8x128xf32> to vector<8x8x128xf32>
    %194 = vector.broadcast %189 : vector<8x1x128xf32> to vector<8x8x128xf32>
    %195 = arith.mulf %193, %194 : vector<8x8x128xf32>
    %196 = vector.broadcast %22 : vector<1x8x128xf32> to vector<8x8x128xf32>
    %197 = vector.broadcast %192 : vector<8x1x128xf32> to vector<8x8x128xf32>
    %198 = arith.mulf %196, %197 : vector<8x8x128xf32>
    %199 = arith.addf %195, %198 : vector<8x8x128xf32>
    %200 = vector.broadcast %26 : vector<1x8x128xf32> to vector<8x8x128xf32>
    %201 = vector.broadcast %191 : vector<8x1x128xf32> to vector<8x8x128xf32>
    %202 = arith.mulf %200, %201 : vector<8x8x128xf32>
    %203 = arith.addf %199, %202 : vector<8x8x128xf32>
    %204 = vector.broadcast %29 : vector<1x8x128xf32> to vector<8x8x128xf32>
    %205 = arith.addf %203, %204 : vector<8x8x128xf32>
    %206 = math.tanh %205 : vector<8x8x128xf32>
    %207 = vector.shape_cast %206 : vector<8x8x128xf32> to vector<64x128xf32>
    %c1_i32_25 = arith.constant 1 : i32
    %208 = tpu.dynamic_rotate %207 by %c1_i32_25 dim 1 : vector<64x128xf32>, i32 -> vector<64x128xf32>
    %209 = vector.shape_cast %208 : vector<64x128xf32> to vector<8x8x128xf32>
    %c127_i32_26 = arith.constant 127 : i32
    %210 = tpu.dynamic_rotate %207 by %c127_i32_26 dim 1 : vector<64x128xf32>, i32 -> vector<64x128xf32>
    %211 = vector.shape_cast %210 : vector<64x128xf32> to vector<8x8x128xf32>
    %212 = vector.broadcast %33 : vector<1x8x128xf32> to vector<8x8x128xf32>
    %213 = arith.mulf %212, %209 : vector<8x8x128xf32>
    %214 = vector.broadcast %37 : vector<1x8x128xf32> to vector<8x8x128xf32>
    %215 = arith.mulf %214, %206 : vector<8x8x128xf32>
    %216 = arith.addf %213, %215 : vector<8x8x128xf32>
    %217 = vector.broadcast %41 : vector<1x8x128xf32> to vector<8x8x128xf32>
    %218 = arith.mulf %217, %211 : vector<8x8x128xf32>
    %219 = arith.addf %216, %218 : vector<8x8x128xf32>
    %cst_27 = arith.constant dense<0.000000e+00> : vector<8x128xf32>
    %220 = vector.multi_reduction <add>, %219, %cst_27 [1] : vector<8x8x128xf32> to vector<8x128xf32>
    %221 = arith.addf %187, %220 : vector<8x128xf32>
    %222 = arith.addf %221, %46 : vector<8x128xf32>
    %c1_i32_28 = arith.constant 1 : i32
    %223 = tpu.dynamic_rotate %222 by %c1_i32_28 dim 1 : vector<8x128xf32>, i32 -> vector<8x128xf32>
    %224 = vector.shape_cast %223 : vector<8x128xf32> to vector<8x1x128xf32>
    %c127_i32_29 = arith.constant 127 : i32
    %225 = tpu.dynamic_rotate %222 by %c127_i32_29 dim 1 : vector<8x128xf32>, i32 -> vector<8x128xf32>
    %226 = vector.shape_cast %225 : vector<8x128xf32> to vector<8x1x128xf32>
    %227 = vector.shape_cast %222 : vector<8x128xf32> to vector<8x1x128xf32>
    %228 = vector.broadcast %18 : vector<1x8x128xf32> to vector<8x8x128xf32>
    %229 = vector.broadcast %224 : vector<8x1x128xf32> to vector<8x8x128xf32>
    %230 = arith.mulf %228, %229 : vector<8x8x128xf32>
    %231 = vector.broadcast %22 : vector<1x8x128xf32> to vector<8x8x128xf32>
    %232 = vector.broadcast %227 : vector<8x1x128xf32> to vector<8x8x128xf32>
    %233 = arith.mulf %231, %232 : vector<8x8x128xf32>
    %234 = arith.addf %230, %233 : vector<8x8x128xf32>
    %235 = vector.broadcast %26 : vector<1x8x128xf32> to vector<8x8x128xf32>
    %236 = vector.broadcast %226 : vector<8x1x128xf32> to vector<8x8x128xf32>
    %237 = arith.mulf %235, %236 : vector<8x8x128xf32>
    %238 = arith.addf %234, %237 : vector<8x8x128xf32>
    %239 = vector.broadcast %29 : vector<1x8x128xf32> to vector<8x8x128xf32>
    %240 = arith.addf %238, %239 : vector<8x8x128xf32>
    %241 = math.tanh %240 : vector<8x8x128xf32>
    %242 = vector.shape_cast %241 : vector<8x8x128xf32> to vector<64x128xf32>
    %c1_i32_30 = arith.constant 1 : i32
    %243 = tpu.dynamic_rotate %242 by %c1_i32_30 dim 1 : vector<64x128xf32>, i32 -> vector<64x128xf32>
    %244 = vector.shape_cast %243 : vector<64x128xf32> to vector<8x8x128xf32>
    %c127_i32_31 = arith.constant 127 : i32
    %245 = tpu.dynamic_rotate %242 by %c127_i32_31 dim 1 : vector<64x128xf32>, i32 -> vector<64x128xf32>
    %246 = vector.shape_cast %245 : vector<64x128xf32> to vector<8x8x128xf32>
    %247 = vector.broadcast %33 : vector<1x8x128xf32> to vector<8x8x128xf32>
    %248 = arith.mulf %247, %244 : vector<8x8x128xf32>
    %249 = vector.broadcast %37 : vector<1x8x128xf32> to vector<8x8x128xf32>
    %250 = arith.mulf %249, %241 : vector<8x8x128xf32>
    %251 = arith.addf %248, %250 : vector<8x8x128xf32>
    %252 = vector.broadcast %41 : vector<1x8x128xf32> to vector<8x8x128xf32>
    %253 = arith.mulf %252, %246 : vector<8x8x128xf32>
    %254 = arith.addf %251, %253 : vector<8x8x128xf32>
    %cst_32 = arith.constant dense<0.000000e+00> : vector<8x128xf32>
    %255 = vector.multi_reduction <add>, %254, %cst_32 [1] : vector<8x8x128xf32> to vector<8x128xf32>
    %256 = arith.addf %222, %255 : vector<8x128xf32>
    %257 = arith.addf %256, %46 : vector<8x128xf32>
    %c1_i32_33 = arith.constant 1 : i32
    %258 = tpu.dynamic_rotate %257 by %c1_i32_33 dim 1 : vector<8x128xf32>, i32 -> vector<8x128xf32>
    %259 = vector.shape_cast %258 : vector<8x128xf32> to vector<8x1x128xf32>
    %c127_i32_34 = arith.constant 127 : i32
    %260 = tpu.dynamic_rotate %257 by %c127_i32_34 dim 1 : vector<8x128xf32>, i32 -> vector<8x128xf32>
    %261 = vector.shape_cast %260 : vector<8x128xf32> to vector<8x1x128xf32>
    %262 = vector.shape_cast %257 : vector<8x128xf32> to vector<8x1x128xf32>
    %263 = vector.broadcast %18 : vector<1x8x128xf32> to vector<8x8x128xf32>
    %264 = vector.broadcast %259 : vector<8x1x128xf32> to vector<8x8x128xf32>
    %265 = arith.mulf %263, %264 : vector<8x8x128xf32>
    %266 = vector.broadcast %22 : vector<1x8x128xf32> to vector<8x8x128xf32>
    %267 = vector.broadcast %262 : vector<8x1x128xf32> to vector<8x8x128xf32>
    %268 = arith.mulf %266, %267 : vector<8x8x128xf32>
    %269 = arith.addf %265, %268 : vector<8x8x128xf32>
    %270 = vector.broadcast %26 : vector<1x8x128xf32> to vector<8x8x128xf32>
    %271 = vector.broadcast %261 : vector<8x1x128xf32> to vector<8x8x128xf32>
    %272 = arith.mulf %270, %271 : vector<8x8x128xf32>
    %273 = arith.addf %269, %272 : vector<8x8x128xf32>
    %274 = vector.broadcast %29 : vector<1x8x128xf32> to vector<8x8x128xf32>
    %275 = arith.addf %273, %274 : vector<8x8x128xf32>
    %276 = math.tanh %275 : vector<8x8x128xf32>
    %277 = vector.shape_cast %276 : vector<8x8x128xf32> to vector<64x128xf32>
    %c1_i32_35 = arith.constant 1 : i32
    %278 = tpu.dynamic_rotate %277 by %c1_i32_35 dim 1 : vector<64x128xf32>, i32 -> vector<64x128xf32>
    %279 = vector.shape_cast %278 : vector<64x128xf32> to vector<8x8x128xf32>
    %c127_i32_36 = arith.constant 127 : i32
    %280 = tpu.dynamic_rotate %277 by %c127_i32_36 dim 1 : vector<64x128xf32>, i32 -> vector<64x128xf32>
    %281 = vector.shape_cast %280 : vector<64x128xf32> to vector<8x8x128xf32>
    %282 = vector.broadcast %33 : vector<1x8x128xf32> to vector<8x8x128xf32>
    %283 = arith.mulf %282, %279 : vector<8x8x128xf32>
    %284 = vector.broadcast %37 : vector<1x8x128xf32> to vector<8x8x128xf32>
    %285 = arith.mulf %284, %276 : vector<8x8x128xf32>
    %286 = arith.addf %283, %285 : vector<8x8x128xf32>
    %287 = vector.broadcast %41 : vector<1x8x128xf32> to vector<8x8x128xf32>
    %288 = arith.mulf %287, %281 : vector<8x8x128xf32>
    %289 = arith.addf %286, %288 : vector<8x8x128xf32>
    %cst_37 = arith.constant dense<0.000000e+00> : vector<8x128xf32>
    %290 = vector.multi_reduction <add>, %289, %cst_37 [1] : vector<8x8x128xf32> to vector<8x128xf32>
    %291 = arith.addf %257, %290 : vector<8x128xf32>
    %292 = arith.addf %291, %46 : vector<8x128xf32>
    %c1_i32_38 = arith.constant 1 : i32
    %293 = tpu.dynamic_rotate %292 by %c1_i32_38 dim 1 : vector<8x128xf32>, i32 -> vector<8x128xf32>
    %294 = vector.shape_cast %293 : vector<8x128xf32> to vector<8x1x128xf32>
    %c127_i32_39 = arith.constant 127 : i32
    %295 = tpu.dynamic_rotate %292 by %c127_i32_39 dim 1 : vector<8x128xf32>, i32 -> vector<8x128xf32>
    %296 = vector.shape_cast %295 : vector<8x128xf32> to vector<8x1x128xf32>
    %297 = vector.shape_cast %292 : vector<8x128xf32> to vector<8x1x128xf32>
    %298 = vector.broadcast %18 : vector<1x8x128xf32> to vector<8x8x128xf32>
    %299 = vector.broadcast %294 : vector<8x1x128xf32> to vector<8x8x128xf32>
    %300 = arith.mulf %298, %299 : vector<8x8x128xf32>
    %301 = vector.broadcast %22 : vector<1x8x128xf32> to vector<8x8x128xf32>
    %302 = vector.broadcast %297 : vector<8x1x128xf32> to vector<8x8x128xf32>
    %303 = arith.mulf %301, %302 : vector<8x8x128xf32>
    %304 = arith.addf %300, %303 : vector<8x8x128xf32>
    %305 = vector.broadcast %26 : vector<1x8x128xf32> to vector<8x8x128xf32>
    %306 = vector.broadcast %296 : vector<8x1x128xf32> to vector<8x8x128xf32>
    %307 = arith.mulf %305, %306 : vector<8x8x128xf32>
    %308 = arith.addf %304, %307 : vector<8x8x128xf32>
    %309 = vector.broadcast %29 : vector<1x8x128xf32> to vector<8x8x128xf32>
    %310 = arith.addf %308, %309 : vector<8x8x128xf32>
    %311 = math.tanh %310 : vector<8x8x128xf32>
    %312 = vector.shape_cast %311 : vector<8x8x128xf32> to vector<64x128xf32>
    %c1_i32_40 = arith.constant 1 : i32
    %313 = tpu.dynamic_rotate %312 by %c1_i32_40 dim 1 : vector<64x128xf32>, i32 -> vector<64x128xf32>
    %314 = vector.shape_cast %313 : vector<64x128xf32> to vector<8x8x128xf32>
    %c127_i32_41 = arith.constant 127 : i32
    %315 = tpu.dynamic_rotate %312 by %c127_i32_41 dim 1 : vector<64x128xf32>, i32 -> vector<64x128xf32>
    %316 = vector.shape_cast %315 : vector<64x128xf32> to vector<8x8x128xf32>
    %317 = vector.broadcast %33 : vector<1x8x128xf32> to vector<8x8x128xf32>
    %318 = arith.mulf %317, %314 : vector<8x8x128xf32>
    %319 = vector.broadcast %37 : vector<1x8x128xf32> to vector<8x8x128xf32>
    %320 = arith.mulf %319, %311 : vector<8x8x128xf32>
    %321 = arith.addf %318, %320 : vector<8x8x128xf32>
    %322 = vector.broadcast %41 : vector<1x8x128xf32> to vector<8x8x128xf32>
    %323 = arith.mulf %322, %316 : vector<8x8x128xf32>
    %324 = arith.addf %321, %323 : vector<8x8x128xf32>
    %cst_42 = arith.constant dense<0.000000e+00> : vector<8x128xf32>
    %325 = vector.multi_reduction <add>, %324, %cst_42 [1] : vector<8x8x128xf32> to vector<8x128xf32>
    %326 = arith.addf %292, %325 : vector<8x128xf32>
    %327 = arith.addf %326, %46 : vector<8x128xf32>
    %328 = vector.shape_cast %82 : vector<8x128xf32> to vector<1x8x128xf32>
    %329 = vector.shape_cast %117 : vector<8x128xf32> to vector<1x8x128xf32>
    %330 = vector.shape_cast %152 : vector<8x128xf32> to vector<1x8x128xf32>
    %331 = vector.shape_cast %187 : vector<8x128xf32> to vector<1x8x128xf32>
    %332 = vector.shape_cast %222 : vector<8x128xf32> to vector<1x8x128xf32>
    %333 = vector.shape_cast %257 : vector<8x128xf32> to vector<1x8x128xf32>
    %334 = vector.shape_cast %292 : vector<8x128xf32> to vector<1x8x128xf32>
    %335 = vector.shape_cast %327 : vector<8x128xf32> to vector<1x8x128xf32>
    %336 = tpu.concatenate %328, %329, %330, %331, %332, %333, %334, %335 in 0 : vector<1x8x128xf32>, vector<1x8x128xf32>, vector<1x8x128xf32>, vector<1x8x128xf32>, vector<1x8x128xf32>, vector<1x8x128xf32>, vector<1x8x128xf32>, vector<1x8x128xf32> -> vector<8x8x128xf32>
    %c0_43 = arith.constant 0 : index
    %c0_44 = arith.constant 0 : index
    %c0_45 = arith.constant 0 : index
    %337 = vector.load %arg3[%c0_43, %c0_44, %c0_45] : memref<8x8x128xf32, #tpu.memory_space<vmem>>, vector<8x8x128xf32>
    tpu.vector_store %arg3[%c0_43, %c0_44, %c0_45], %336 {strides = array<i32>} : memref<8x8x128xf32, #tpu.memory_space<vmem>>, vector<8x8x128xf32>,
    return
  }
  func.func @transform_0(%arg0: i32) -> (i32, i32) {
    %c0_i32 = arith.constant 0 : i32
    %c0_i32_0 = arith.constant 0 : i32
    return %arg0, %c0_i32 : i32, i32
  }
  func.func @transform_1(%arg0: i32) -> (i32, i32) {
    %c0_i32 = arith.constant 0 : i32
    %c0_i32_0 = arith.constant 0 : i32
    %c0_i32_1 = arith.constant 0 : i32
    return %c0_i32, %c0_i32_0 : i32, i32
  }
  func.func @transform_2(%arg0: i32) -> (i32, i32, i32) {
    %c0_i32 = arith.constant 0 : i32
    %c0_i32_0 = arith.constant 0 : i32
    %c0_i32_1 = arith.constant 0 : i32
    return %c0_i32, %arg0, %c0_i32_0 : i32, i32, i32
  }
}

</mosaic_0001>

<bundles_post_ra>
// kernel: run.1
= control target key start
LH: loop header
LB: loop body
LE: loop exit
PB: predicated region body
PF: predicated region fallthrough
CT: control target
= control target key end

     0   :  { %7 = vsyncpa [#allocation3], 0  ;;  %s5932_s0 = inlined_call_operand.hbm [shape: f32[16,128], index: 0, kind: input, shape index: {}]   ;;  %s5933_s1 = inlined_call_operand.hbm [shape: f32[8,8], index: 1, kind: input, shape index: {}]   ;;  %s5934_s2 = inlined_call_operand.vmem [shape: f32[8,16,128], index: 2, kind: output, shape index: {}]  }
   0x1   :  { %9 = vsyncpa [#allocation3 + $0x1], 0 }
   0x2   :  { %10 = vsyncpa [#allocation5], 0  ;;  %s4462_s9 = smov 0   ;;  %s4464_s10 = smov 0  }
   0x3   :  { %s4466_s11 = smov 0   ;;  %s4468_s12 = smov 0  }
   0x4 LB: > { %s4481_s13 = sadd.s32 4294967295, %s4431_s12   ;;  %p36_p0 = scmp.ne.s32.totalorder %s4423_s10, %s4419_s9  ;;  %s4431_s12 = sphi %s4468_s12, %s5953_s12   ;;  %s4427_s11 = sphi %s4466_s11, %s5952_s11   ;;  %s4423_s10 = sphi %s4464_s10, %s5951_s10   ;;  %s4419_s9 = sphi %s4462_s9, %s5950_s9  }
   0x5   : > { %p5935_p1 = scmp.eq.s32.totalorder %s4481_s13, 0  ;;  %p4119_p3 = scmp.ge.s32.totalorder %s4431_s12, 1 }
   0x6   : > { %p94_p4 = scmp.lt.s32.totalorder %s4431_s12, 3  ;;  %s4433_s16 = smov [#allocation4]  }
   0x7   : > { %p4490_p5 = por %p5935_p1, %p36_p0  ;;  %s107_s17 = sshll.u32 %s4433_s16, 4  ;;  %s108_s17 = int_to_ptr.vmem [resolvable:$true] %s107_s17 }
   0x8   : > { %p4494_p6 = pnand %p4119_p3, %p94_p4  ;;  %s4501_s18 = sadd.s32 1, %s4431_s12  }
   0x9   : > { %s5938_s14 = scalar_select %p4490_p5, 1, 0 }
   0xa   : > { %s5939_s15 = scalar_select %p4494_p6, 1, 0 }
   0xb   : > { %p4142_p7 = pneg %p4494_p6  ;;  %s20_s20 = ssub.s32 %s4431_s12, %s4501_s18 }
   0xc   : > { %s23_s21 = sadd.s32 1, %s4427_s11  ;;  %p4512_p9 = scmp.eq.s32.totalorder %s20_s20, 0 }
   0xd   : > { %p4505_p8 = pnand %p4142_p7, %p5935_p1  ;;  %s4335_s25 = scalar_lea.hbm %s5933_s1, 128 }
   0xe   : > { %s5941_s22 = scalar_select %p4512_p9, 1, 0 }
   0xf   : > { %p4336_p10 = scmp.ne.s32.totalorder %s5933_s1, %s4335_s25  ;;  %p4337_p11 = pneg %p4505_p8 }
  0x10   : > { %p4342_p0 = scmp.lt.u32.totalorder %s4335_s25, %s5933_s1 }
  0x11   : > { %p4338_p12 = pnand %p4337_p11, %p4336_p10 }
  0x13   : > { %p4339_p13 = pneg %p4338_p12 }
  0x15   : > { %p4344_p3 = pnand %p4342_p0, %p4339_p13 }
  0x17   : > { %4347 = shalt.err (!%p4344_p3)
}
  0x18   : > { %s4348_s30 = scalar_lea.vmem %s108_s17, 128  ;;  %p4356_p2 = scmp.lt.s32.totalorder %s108_s17, %s108_s17 }
  0x19   : > { %p4349_p4 = scmp.ne.s32.totalorder %s108_s17, %s4348_s30  ;;  %p4357_p5 = scmp.lt.s32.totalorder %s4348_s30, %s4348_s30 }
  0x1b   : > { %p4351_p7 = pnand %p4349_p4, %p4337_p11  ;;  %p4358_p6 = por %p4357_p5, %p4356_p2 }
  0x1d   : > { %p4352_p1 = pneg %p4351_p7 }
  0x1f   : > { %p4359_p9 = pnand %p4358_p6, %p4352_p1 }
  0x21   : > { %4362 = shalt.err (!%p4359_p9)
}
  0x22   : > { %4145 = dma.hbm_to_vmem [thread:$0]  (!%p4505_p8), %s5933_s1, 128, %s108_s17, [#allocation5]  }
  0x23   : > { %p5942_p10 = scmp.ne.s32.totalorder %s5941_s22, 0  ;;  %p30_p1 = scmp.ne.s32.totalorder %s4427_s11, %s4423_s10 }
  0x24   : > { %p31_p2 = scmp.eq.s32.totalorder %s4431_s12, 0  ;;  %p4151_p5 = scmp.lt.s32.totalorder %s4431_s12, 2 }
  0x25   : > { %s4535_s5 = scalar_select %p5942_p10, %s4427_s11, %s23_s21  }
  0x26   : > { %s118_s6 = sand.u32 1, %s4427_s11   ;;  %p32_p6 = por %p31_p2, %p30_p1 }
  0x27   : > { %p5943_p9 = scmp.eq.s32.totalorder %s4481_s13, 1  ;;  %s4122_s8 = sshll.u32 %s118_s6, 3 }
  0x28   : > { %s4123_s9 = sshll.u32 %s4431_s12, 7  ;;  %s122_s17 = scalar_lea.vmem [#allocation2], %s4122_s8 }
  0x29   : > { %p4544_p11 = por %p5943_p9, %p30_p1  ;;  %s4552_s20 = scalar_lea.hbm %s5932_s0, %s4123_s9 }
  0x2a   : > { %s129_s21 = sshll.u32 %s122_s17, 4  ;;  %p4556_p8 = pnand %p4151_p5, %p32_p6  ;;  %s4554_s21 = int_to_ptr.vmem [resolvable:$true] %s129_s21 }
  0x2b   : > { %s119_s12 = scalar_lea.sflag [#allocation3], %s118_s6  ;;  %s4363_s23 = scalar_lea.hbm %s4552_s20, 128 }
  0x2c   : > { %p4364_p12 = scmp.ne.s32.totalorder %s4552_s20, %s4363_s23  ;;  %p4365_p13 = pneg %p4556_p8 }
  0x2d   : > { %s4368_s26 = scalar_lea.hbm %s5932_s0, 256  ;;  %p4369_p4 = scmp.lt.u32.totalorder %s4552_s20, %s5932_s0 }
  0x2e   : > { %p4366_p0 = pnand %p4365_p13, %p4364_p12  ;;  %p4370_p7 = scmp.lt.u32.totalorder %s4368_s26, %s4363_s23 }
  0x2f   : > { %p4372_p1 = scmp.lt.u32.totalorder %s4363_s23, %s4552_s20 }
  0x30   : > { %p4367_p3 = pneg %p4366_p0  ;;  %p4371_p10 = por %p4370_p7, %p4369_p4 }
  0x32   : > { %p4373_p2 = por %p4372_p1, %p4371_p10 }
  0x34   : > { %p4374_p5 = pnand %p4373_p2, %p4367_p3 }
  0x36   : > { %4377 = shalt.err (!%p4374_p5)
}
  0x37   : > { %s4378_s29 = scalar_lea.vmem %s4554_s21, 128  ;;  %s4434_s30 = smov [#allocation2]  }
  0x38   : > { %p4379_p6 = scmp.ne.s32.totalorder %s4554_s21, %s4378_s29  ;;  %s4383_s3 = sshll.u32 %s4434_s30, 4  ;;  %s4384_s3 = int_to_ptr.vmem [resolvable:$false] %s4383_s3 }
  0x39   : > { %s4385_s4 = scalar_lea.vmem %s4384_s3, 256  ;;  %p4386_p0 = scmp.lt.s32.totalorder %s4554_s21, %s4384_s3 }
  0x3a   : > { %p4381_p9 = pnand %p4379_p6, %p4365_p13  ;;  %p4387_p4 = scmp.lt.s32.totalorder %s4385_s4, %s4378_s29 }
  0x3c   : > { %p4382_p12 = pneg %p4381_p9  ;;  %p4388_p7 = por %p4387_p4, %p4386_p0 }
  0x3e   : > { %p4389_p10 = pnand %p4388_p7, %p4382_p12 }
  0x40   : > { %4392 = shalt.err (!%p4389_p10)
}
  0x41   : > { %4149 = dma.hbm_to_vmem [thread:$0]  (!%p4556_p8), %s4552_s20, 128, %s4554_s21, %s119_s12  }
  0x42   : > { %p5946_p3 = scmp.ne.s32.totalorder %s5939_s15, 0 }
  0x43   : > { %s4588_s6 = sand.u32 (!%p5946_p3), 1, %s4423_s10   ;;  %p5947_p13 = scmp.ne.s32.totalorder (!%p5946_p3), %s5938_s14, 0 }
  0x44   : > { %138 = sbr.rel (%p5946_p3) target bundleno = 2558 (0x9fe), region = 28  ;;  %s4125_s8 = sshll.u32 (!%p5946_p3), %s4588_s6, 3 }
  0x45   : > { %s141_s9 = scalar_lea.sflag (!%p5946_p3), [#allocation3], %s4588_s6  ;;  %s144_s16 = scalar_lea.vmem (!%p5946_p3), [#allocation2], %s4125_s8 }
  0x4b   : > { %4410 = dma.done.wait (%p5947_p13), %s141_s9, 128  }
  0x4c   : > { %4412 = vsyncadd (%p5947_p13), %s141_s9, 4294967168  ;;  %p5948_p1 = scmp.eq.s32.totalorder %s4481_s13, 0 }
  0x4e   : > { %4414 = dma.done.wait (%p5948_p1), [#allocation5], 128   ;;  %p5949_p8 = pmov %p5948_p1 }
  0x4f   : > { %v4435_v0 = vmov 0   ;;  %v4436_v1 = vmov 2   ;;  %v168_v2 = vld [vmem:[#allocation4] sm:$0xff]  ;;  %v4600_v3 = vld [vmem:[%s144_s16] sm:$0xff]  ;;  %v4437_v4 = vmov 1   ;;  %s4438_s14 = smov 1   ;;  %v169_v12 = vlaneseq }
  0x50   : > { %4416 = vsyncadd (%p5949_p8), [#allocation5], 4294967168  ;;  %4198 = vset.pattern.permute.xlu0 %v4435_v0  ;;  %4199 = vset.pattern.permute.xlu1 %v4436_v1  ;;  %v4439_v5 = vmov 3   ;;  %s4440_s15 = smov 127   ;;  %v177_v6 = vmul.f32 0.1, %v168_v2  ;;  %v311_v17 = vcombine.high %v4600_v3, %v4600_v3 }
  0x51   : > { %180 = vperm.xlu0 %4198, %v168_v2   ;;  %185 = vperm.xlu1 %4199, %v168_v2   ;;  %v4441_v7 = vmov 4   ;;  %s4442_s19 = smov 121   ;;  %v4443_v8 = vmov 5   ;;  %v4444_v9 = vmov 6   ;;  %v4445_v10 = vmov 1966171168  }
  0x52   : > { %v211_v11 = vunpack.c.l.s4 %v4445_v10  ;;  %v214_v14 = vshrl.u32 %v169_v12, 7  ;;  %v170_v20 = vand.u32 127, %v169_v12  ;;  %v4446_v36 = vmov 0.0   ;;  %s4127_s20 = sshll.u32 %s4588_s6, 6  ;;  %s4131_s22 = sshll.u32 (%p4544_p11), %s4481_s13, 3 }
  0x53   : > { %vm676_vm2 = vcmask 1041409   ;;  %vm678_vm3 = vcmask 1042434   ;;  %vm680_vm4 = vcmask 1043459   ;;  %vm682_vm5 = vcmask 1044484   ;;  %s4791_s21 = scalar_lea.vmem [#allocation6], %s4127_s20  ;;  %s3985_s24 = scalar_lea.vmem (%p4544_p11), %s5934_s2, %s4131_s22 }
  0x54   : > { %v212_v13 = vunpack.c.0.s8 %v211_v11  ;;  %v4616_v26 = vsub.s32 0, %v214_v14  ;;  %vm171_vm0 = vcmp.ne.s32.totalorder %v170_v20, 0  ;;  %vm174_vm1 = vcmp.ne.s32.totalorder %v170_v20, 127 }
  0x55   : > { %4200 = vset.pattern.permute.xlu1 %v4437_v4  ;;  %206 = vrot.lane.b32.xlu0 %v4600_v3, %s4438_s14  ;;  %v4622_v37 = vsel %vm171_vm0, 1.0, %v4446_v36  ;;  %v4637_v50 = vsel %vm174_vm1, 1.0, %v4446_v36  ;;  %vm684_vm6 = vcmask 1045509   ;;  %vm686_vm7 = vcmask 1046534  }
  0x56   : > { %409 = vperm.xlu1 %4200, %v168_v2   ;;  %4203 = vset.pattern.permute.xlu0 %v4444_v9  ;;  %v4606_v15 = vsub.s32 %v212_v13, %v214_v14  ;;  %vm688_vm8 = vcmask 1047559  }
  0x58   : > { %v318_v16 = vrot.slane %v4600_v3, %v4606_v15  ;;  %v325_v21 = vrot.slane %v311_v17, %v4606_v15 }
  0x59   : > { %258 = vrot.lane.b32.xlu0 %v4600_v3, %s4440_s15 }
  0x5a   : > { %4201 = vset.pattern.permute.xlu1 %v4439_v5  ;;  %v326_v19 = vcombine.high %v318_v16, %v318_v16  ;;  %v334_v22 = vrot.slane %v318_v16, %v4606_v15  ;;  %v327_v28 = vcombine.high %v325_v21, %v325_v21  ;;  %v4619_v29 = vrot.slane %v325_v21, %v4606_v15 }
  0x5b   : > { %525 = vperm.xlu1 %4201, %v168_v2  }
  0x5c   : > { %v348_v24 = vrot.slane %v326_v19, %v4606_v15  ;;  %v356_v32 = vcombine.high %v334_v22, %v334_v22  ;;  %v415_v39 = vrot.slane %v334_v22, %v4616_v26  ;;  %v4628_v43 = vrot.slane %v327_v28, %v4606_v15 }
  0x5d   : > { %200 = vrot.lane.b32.xlu0 %v177_v6, %s4442_s19  ;;  %v357_v44 = vcombine.high %v4619_v29, %v4619_v29  ;;  %v431_v48 = vrot.slane %v4619_v29, %v4616_v26 }
  0x5e   : > { %v358_v35 = vcombine.high %v348_v24, %v348_v24  ;;  %v419_v45 = vrot.slane %v348_v24, %v4616_v26  ;;  %v423_v47 = vrot.slane %v356_v32, %v4616_v26  ;;  %v435_v54 = vrot.slane %v4628_v43, %v4616_v26 }
  0x5f   : > { %4202 = vset.pattern.permute.xlu1 %v4441_v7 }
  0x60   : > { %191 = vperm.xlu1 %4202, %v177_v6   ;;  %v427_v53 = vrot.slane %v358_v35, %v4616_v26 }
  0x61   : > { %196 = vperm.xlu0 %4203, %v177_v6  }
  0x64   : > { %4204 = vset.pattern.permute.xlu1 %v4443_v8 }
  0x65   : > { %585 = vperm.xlu1 %4204, %v177_v6   ;;  %4205 = vset.pattern.permute.xlu0 %v4443_v8 }
  0xd0   : > { %v181_v18 = vpop.permute.xlu0 %180  ;;  %v186_v27 = vpop.permute.xlu1 %185 }
  0xd1   : > { %v4647_v57 = vmul.f32 %v4622_v37, %v181_v18  ;;  %v4653_v62 = vmul.f32 %v4637_v50, %v186_v27 }
  0xd4   : > { %v207_v23 = vpop.permute.xlu0 %206 }
  0xd5   : > { %v216_v25 = vrot.slane %v207_v23, %v4606_v15  ;;  %v209_v33 = vcombine.high %v207_v23, %v207_v23  ;;  %v4639_v51 = vpop.permute.xlu1 %409 }
  0xd6   : > { %v452_v63 = vmul.f32 %v415_v39, %v4639_v51  ;;  %v453_v0 = vmul.f32 %v419_v45, %v4639_v51  ;;  %v454_v8 = vmul.f32 %v423_v47, %v4639_v51  ;;  %v455_v9 = vmul.f32 %v427_v53, %v4639_v51 }
  0xd7   : > { %v224_v30 = vcombine.high %v216_v25, %v216_v25  ;;  %v232_v31 = vrot.slane %v216_v25, %v4606_v15  ;;  %v223_v49 = vrot.slane %v209_v33, %v4606_v15 }
  0xd8   : > { %v259_v34 = vpop.permute.xlu0 %258 }
  0xd9   : > { %v246_v38 = vrot.slane %v224_v30, %v4606_v15  ;;  %v254_v40 = vcombine.high %v232_v31, %v232_v31  ;;  %v261_v41 = vcombine.high %v259_v34, %v259_v34  ;;  %v268_v42 = vrot.slane %v259_v34, %v4606_v15 }
  0xda   : > { %v363_v55 = vrot.slane %v232_v31, %v4616_v26  ;;  %v225_v1 = vcombine.high %v223_v49, %v223_v49  ;;  %v239_v2 = vrot.slane %v223_v49, %v4606_v15  ;;  %v4678_v32 = vpop.permute.xlu1 %525 }
  0xdb   : > { %v256_v46 = vcombine.high %v246_v38, %v246_v38  ;;  %v367_v56 = vrot.slane %v246_v38, %v4616_v26  ;;  %v371_v58 = vrot.slane %v254_v40, %v4616_v26  ;;  %v275_v59 = vrot.slane %v261_v41, %v4606_v15 }
  0xdc   : > { %v201_v52 = vpop.permute.xlu0 %200  ;;  %v276_v60 = vcombine.high %v268_v42, %v268_v42  ;;  %v284_v4 = vrot.slane %v268_v42, %v4606_v15  ;;  %v400_v6 = vmul.f32 %v363_v55, %v4647_v57  ;;  %v253_v19 = vrot.slane %v225_v1, %v4606_v15 }
  0xdd   : > { %4134 = vpush %v201_v52  ;;  %v375_v61 = vrot.slane %v256_v46, %v4616_v26  ;;  %v401_v7 = vmul.f32 %v367_v56, %v4647_v57  ;;  %v402_v10 = vmul.f32 %v371_v58, %v4647_v57  ;;  %v277_v11 = vcombine.high %v275_v59, %v275_v59 }
  0xde   : > { %v298_v5 = vrot.slane %v276_v60, %v4606_v15  ;;  %v306_v12 = vcombine.high %v284_v4, %v284_v4  ;;  %v291_v16 = vrot.slane %v275_v59, %v4606_v15  ;;  %v471_v17 = vrot.slane %v284_v4, %v4616_v26 }
  0xdf   : > { %v403_v14 = vmul.f32 %v375_v61, %v4647_v57  ;;  %v379_v20 = vrot.slane %v239_v2, %v4616_v26  ;;  %v460_v25 = vadd.f32 %v452_v63, %v400_v6  ;;  %v461_v27 = vadd.f32 %v453_v0, %v401_v7 }
  0xe0   : > { %v308_v13 = vcombine.high %v298_v5, %v298_v5  ;;  %v475_v18 = vrot.slane %v298_v5, %v4616_v26  ;;  %v479_v21 = vrot.slane %v306_v12, %v4616_v26  ;;  %v508_v23 = vmul.f32 %v471_v17, %v4653_v62 }
  0xe1   : > { %v305_v28 = vrot.slane %v277_v11, %v4606_v15  ;;  %v462_v33 = vadd.f32 %v454_v8, %v402_v10  ;;  %v487_v34 = vrot.slane %v291_v16, %v4616_v26  ;;  %v463_v38 = vadd.f32 %v455_v9, %v403_v14 }
  0xe2   : > { %v483_v22 = vrot.slane %v308_v13, %v4616_v26  ;;  %v509_v24 = vmul.f32 %v475_v18, %v4653_v62  ;;  %v510_v30 = vmul.f32 %v479_v21, %v4653_v62  ;;  %v516_v35 = vadd.f32 %v508_v23, %v460_v25 }
  0xe3   : > { %v255_v39 = vcombine.high %v239_v2, %v239_v2  ;;  %v383_v40 = vrot.slane %v253_v19, %v4616_v26  ;;  %v456_v42 = vmul.f32 %v431_v48, %v4639_v51  ;;  %v404_v45 = vmul.f32 %v379_v20, %v4647_v57 }
  0xe4   : > { %v511_v31 = vmul.f32 %v483_v22, %v4653_v62  ;;  %v517_v36 = vadd.f32 %v509_v24, %v461_v27  ;;  %v518_v41 = vadd.f32 %v510_v30, %v462_v33  ;;  %v528_v46 = vadd.f32 %v4678_v32, %v516_v35  ;;  %v197_v35 = vpop.permute.xlu0 %196 }
  0xe5   : > { %v307_v52 = vcombine.high %v291_v16, %v291_v16  ;;  %v491_v53 = vrot.slane %v305_v28, %v4616_v26  ;;  %v512_v55 = vmul.f32 %v487_v34, %v4653_v62  ;;  %v439_v48 = vrot.slane %v357_v44, %v4616_v26  ;;  %v192_v34 = vpop.permute.xlu1 %191 }
  0xe6   : > { %v529_v47 = vadd.f32 %v4678_v32, %v517_v36  ;;  %v519_v49 = vadd.f32 %v511_v31, %v463_v38  ;;  %4207 = vtanh.f32 %v528_v46  ;;  %v530_v56 = vadd.f32 %v4678_v32, %v518_v41 }
  0xe7   : > { %v457_v59 = vmul.f32 %v435_v54, %v4639_v51  ;;  %v257_v60 = vcombine.high %v253_v19, %v253_v19  ;;  %v387_v61 = vrot.slane %v255_v39, %v4616_v26  ;;  %v405_v63 = vmul.f32 %v383_v40, %v4647_v57 }
  0xe8   : > { %4209 = vtanh.f32 %v529_v47  ;;  %v531_v58 = vadd.f32 %v4678_v32, %v519_v49  ;;  %v464_v0 = vadd.f32 %v456_v42, %v404_v45  ;;  %v359_v1 = vcombine.high %v4628_v43, %v4628_v43 }
  0xe9   : > { %v309_v2 = vcombine.high %v305_v28, %v305_v28  ;;  %v495_v4 = vrot.slane %v307_v52, %v4616_v26  ;;  %v513_v29 = vmul.f32 %v491_v53, %v4653_v62  ;;  %4211 = vtanh.f32 %v530_v56  ;;  %v4742_v36 = vpop.permute.xlu1 %585 }
  0xea   : > { %v520_v44 = vadd.f32 %v512_v55, %v464_v0  ;;  %4213 = vtanh.f32 %v531_v58  ;;  %v391_v5 = vrot.slane %v257_v60, %v4616_v26  ;;  %v406_v54 = vmul.f32 %v387_v61, %v4647_v57 }
  0xeb   : > { %v465_v6 = vadd.f32 %v457_v59, %v405_v63  ;;  %v458_v7 = vmul.f32 %v439_v48, %v4639_v51  ;;  %v443_v8 = vrot.slane %v359_v1, %v4616_v26  ;;  %v499_v9 = vrot.slane %v309_v2, %v4616_v26 }
  0xec   : > { %v514_v43 = vmul.f32 %v495_v4, %v4653_v62  ;;  %v532_v10 = vadd.f32 %v4678_v32, %v520_v44  ;;  %v407_v13 = vmul.f32 %v391_v5, %v4647_v57  ;;  %v4745_v40 = vmul.f32 %v4622_v37, %v192_v34 }
  0xed   : > { %v521_v11 = vadd.f32 %v513_v29, %v465_v6  ;;  %v466_v14 = vadd.f32 %v458_v7, %v406_v54  ;;  %v459_v17 = vmul.f32 %v443_v8, %v4639_v51  ;;  %v515_v18 = vmul.f32 %v499_v9, %v4653_v62 }
  0xee   : > { %4215 = vtanh.f32 %v532_v10  ;;  %v4750_v47 = vmul.f32 %v4637_v50, %v197_v35 }
  0xef   : > { %v533_v19 = vadd.f32 %v4678_v32, %v521_v11  ;;  %v522_v20 = vadd.f32 %v514_v43, %v466_v14  ;;  %v467_v22 = vadd.f32 %v459_v17, %v407_v13 }
  0xf0   : > { %v4208_v12 = vpop.eup %4207 }
  0xf1   : > { %544 = vrot.lane.b32.xlu1 %v4208_v12, %s4438_s14  ;;  %4217 = vtanh.f32 %v533_v19  ;;  %v534_v24 = vadd.f32 %v4678_v32, %v522_v20  ;;  %v523_v25 = vadd.f32 %v515_v18, %v467_v22  ;;  %v588_v49 = vmul.f32 %v4208_v12, %v4742_v36 }
  0xf2   : > { %v4210_v16 = vpop.eup %4209 }
  0xf3   : > { %546 = vrot.lane.b32.xlu0 %v4210_v16, %s4438_s14  ;;  %v4212_v21 = vpop.eup %4211  ;;  %4219 = vtanh.f32 %v534_v24  ;;  %v535_v27 = vadd.f32 %v4678_v32, %v523_v25  ;;  %v589_v52 = vmul.f32 %v4210_v16, %v4742_v36 }
  0xf4   : > { %v4214_v23 = vpop.eup %4213  ;;  %v590_v61 = vmul.f32 %v4212_v21, %v4742_v36 }
  0xf5   : > { %548 = vrot.lane.b32.xlu1 %v4212_v21, %s4438_s14  ;;  %4221 = vtanh.f32 %v535_v27  ;;  %v591_v54 = vmul.f32 %v4214_v23, %v4742_v36 }
  0xf7   : > { %550 = vrot.lane.b32.xlu0 %v4214_v23, %s4438_s14 }
  0xf8   : > { %v4216_v28 = vpop.eup %4215 }
  0xf9   : > { %560 = vrot.lane.b32.xlu1 %v4208_v12, %s4440_s15  ;;  %v592_v17 = vmul.f32 %v4216_v28, %v4742_v36 }
  0xfb   : > { %562 = vrot.lane.b32.xlu0 %v4210_v16, %s4440_s15  ;;  %v4722_v30 = vpop.eup %4217 }
  0xfd   : > { %552 = vrot.lane.b32.xlu1 %v4216_v28, %s4438_s14  ;;  %v4727_v31 = vpop.eup %4219 }
  0xff   : > { %564 = vrot.lane.b32.xlu0 %v4212_v21, %s4440_s15  ;;  %v4732_v33 = vpop.eup %4221 }
 0x101   : > { %554 = vrot.lane.b32.xlu1 %v4722_v30, %s4438_s14 }
 0x103   : > { %566 = vrot.lane.b32.xlu0 %v4214_v23, %s4440_s15 }
 0x105   : > { %556 = vrot.lane.b32.xlu1 %v4727_v31, %s4438_s14 }
 0x107   : > { %568 = vrot.lane.b32.xlu0 %v4216_v28, %s4440_s15 }
 0x109   : > { %558 = vrot.lane.b32.xlu1 %v4732_v33, %s4438_s14 }
 0x10b   : > { %570 = vrot.lane.b32.xlu0 %v4722_v30, %s4440_s15 }
 0x10d   : > { %572 = vrot.lane.b32.xlu1 %v4727_v31, %s4440_s15 }
 0x10e   : > { %s4135_s17 = spop %4134 }
 0x10f   : > { %574 = vrot.lane.b32.xlu0 %v4732_v33, %s4440_s15 }
 0x163   : > { %v545_v38 = vpop.permute.xlu1 %544 }
 0x164   : > { %v576_v42 = vmul.f32 %v545_v38, %v4745_v40 }
 0x165   : > { %v547_v39 = vpop.permute.xlu0 %546 }
 0x166   : > { %v577_v46 = vmul.f32 %v547_v39, %v4745_v40  ;;  %v596_v55 = vadd.f32 %v588_v49, %v576_v42  ;;  %v593_v49 = vmul.f32 %v4722_v30, %v4742_v36 }
 0x167   : > { %v549_v41 = vpop.permute.xlu1 %548 }
 0x168   : > { %v597_v37 = vadd.f32 %v589_v52, %v577_v46  ;;  %v578_v58 = vmul.f32 %v549_v41, %v4745_v40  ;;  %v594_v52 = vmul.f32 %v4727_v31, %v4742_v36 }
 0x169   : > { %v551_v45 = vpop.permute.xlu0 %550 }
 0x16a   : > { %v598_v2 = vadd.f32 %v590_v61, %v578_v58  ;;  %v579_v4 = vmul.f32 %v551_v45, %v4745_v40  ;;  %v595_v61 = vmul.f32 %v4732_v33, %v4742_v36 }
 0x16b   : > { %v561_v53 = vpop.permute.xlu1 %560 }
 0x16c   : > { %v604_v56 = vmul.f32 %v561_v53, %v4750_v47  ;;  %v599_v11 = vadd.f32 %v591_v54, %v579_v4 }
 0x16d   : > { %v563_v48 = vpop.permute.xlu0 %562 }
 0x16e   : > { %v605_v59 = vmul.f32 %v563_v48, %v4750_v47  ;;  %v612_v60 = vadd.f32 %v604_v56, %v596_v55 }
 0x16f   : > { %v553_v50 = vpop.permute.xlu1 %552 }
 0x170   : > { %v613_v63 = vadd.f32 %v605_v59, %v597_v37  ;;  %v620_v0 = vrot.slane %v612_v60, 4  ;;  %v580_v43 = vmul.f32 %v553_v50, %v4745_v40 }
 0x171   : > { %v565_v1 = vpop.permute.xlu0 %564 }
 0x172   : > { %v626_v29 = vrot.slane %v613_v63, 4  ;;  %v606_v44 = vmul.f32 %v565_v1, %v4750_v47  ;;  %v621_v5 = vadd.f32 %v620_v0, %v612_v60  ;;  %v600_v23 = vadd.f32 %v592_v17, %v580_v43 }
 0x173   : > { %v555_v8 = vpop.permute.xlu1 %554 }
 0x174   : > { %v627_v6 = vadd.f32 %v626_v29, %v613_v63  ;;  %v614_v7 = vadd.f32 %v606_v44, %v598_v2  ;;  %v622_v9 = vrot.slane %v621_v5, 2  ;;  %v581_v39 = vmul.f32 %v555_v8, %v4745_v40 }
 0x175   : > { %v567_v10 = vpop.permute.xlu0 %566 }
 0x176   : > { %v628_v12 = vrot.slane %v627_v6, 2  ;;  %v632_v13 = vrot.slane %v614_v7, 4  ;;  %v607_v14 = vmul.f32 %v567_v10, %v4750_v47  ;;  %v623_v16 = vadd.f32 %v622_v9, %v621_v5 }
 0x177   : > { %v557_v21 = vpop.permute.xlu1 %556  ;;  %v601_v60 = vadd.f32 %v593_v49, %v581_v39 }
 0x178   : > { %v629_v18 = vadd.f32 %v628_v12, %v627_v6  ;;  %v633_v19 = vadd.f32 %v632_v13, %v614_v7  ;;  %v615_v20 = vadd.f32 %v607_v14, %v599_v11  ;;  %v624_v22 = vrot.slane %v623_v16, 1 }
 0x179   : > { %v569_v24 = vpop.permute.xlu0 %568  ;;  %v582_v53 = vmul.f32 %v557_v21, %v4745_v40 }
 0x17a   : > { %v630_v25 = vrot.slane %v629_v18, 1  ;;  %v634_v27 = vrot.slane %v633_v19, 2  ;;  %v638_v34 = vrot.slane %v615_v20, 4  ;;  %v608_v35 = vmul.f32 %v569_v24, %v4750_v47 }
 0x17b   : > { %v625_v38 = vadd.f32 %v624_v22, %v623_v16  ;;  %v559_v46 = vpop.permute.xlu1 %558  ;;  %v602_v1 = vadd.f32 %v594_v52, %v582_v53  ;;  %v4786_v52 = vstv %s4135_s17 }
 0x17c   : > { %v631_v41 = vadd.f32 %v630_v25, %v629_v18  ;;  %v635_v42 = vadd.f32 %v634_v27, %v633_v19  ;;  %v639_v45 = vadd.f32 %v638_v34, %v615_v20  ;;  %v616_v28 = vadd.f32 %v608_v35, %v600_v23 }
 0x17d   : > { %v583_v55 = vmul.f32 %v559_v46, %v4745_v40  ;;  %v571_v56 = vpop.permute.xlu0 %570 }
 0x17e   : > { %v677_v48 = vsel %vm676_vm2, %v631_v41, %v625_v38  ;;  %v636_v37 = vrot.slane %v635_v42, 1  ;;  %v640_v58 = vrot.slane %v639_v45, 2  ;;  %v644_v59 = vrot.slane %v616_v28, 4 }
 0x17f   : > { %v609_v30 = vmul.f32 %v571_v56, %v4750_v47  ;;  %v573_v0 = vpop.permute.xlu1 %572  ;;  %v603_v2 = vadd.f32 %v595_v61, %v583_v55 }
 0x180   : > { %v637_v63 = vadd.f32 %v636_v37, %v635_v42  ;;  %v641_v50 = vadd.f32 %v640_v58, %v639_v45  ;;  %v645_v31 = vadd.f32 %v644_v59, %v616_v28  ;;  %v610_v29 = vmul.f32 %v573_v0, %v4750_v47 }
 0x181   : > { %v617_v4 = vadd.f32 %v609_v30, %v601_v60  ;;  %v575_v44 = vpop.permute.xlu0 %574 }
 0x182   : > { %v679_v5 = vsel %vm678_vm3, %v637_v63, %v677_v48  ;;  %v642_v54 = vrot.slane %v641_v50, 1  ;;  %v646_v6 = vrot.slane %v645_v31, 2  ;;  %v611_v7 = vmul.f32 %v575_v44, %v4750_v47 }
 0x183   : > { %v650_v33 = vrot.slane %v617_v4, 4  ;;  %v618_v8 = vadd.f32 %v610_v29, %v602_v1 }
 0x184   : > { %v643_v9 = vadd.f32 %v642_v54, %v641_v50  ;;  %v647_v43 = vadd.f32 %v646_v6, %v645_v31  ;;  %v619_v10 = vadd.f32 %v611_v7, %v603_v2 }
 0x185   : > { %v651_v11 = vadd.f32 %v650_v33, %v617_v4  ;;  %v656_v12 = vrot.slane %v618_v8, 4 }
 0x186   : > { %v681_v13 = vsel %vm680_vm4, %v643_v9, %v679_v5  ;;  %v648_v14 = vrot.slane %v647_v43, 1  ;;  %v662_v16 = vrot.slane %v619_v10, 4 }
 0x187   : > { %v652_v17 = vrot.slane %v651_v11, 2  ;;  %v657_v18 = vadd.f32 %v656_v12, %v618_v8 }
 0x188   : > { %v649_v19 = vadd.f32 %v648_v14, %v647_v43  ;;  %v663_v20 = vadd.f32 %v662_v16, %v619_v10 }
 0x189   : > { %v653_v21 = vadd.f32 %v652_v17, %v651_v11  ;;  %v658_v22 = vrot.slane %v657_v18, 2 }
 0x18a   : > { %v683_v23 = vsel %vm682_vm5, %v649_v19, %v681_v13  ;;  %v664_v24 = vrot.slane %v663_v20, 2 }
 0x18b   : > { %v654_v25 = vrot.slane %v653_v21, 1  ;;  %v659_v27 = vadd.f32 %v658_v22, %v657_v18 }
 0x18c   : > { %v665_v34 = vadd.f32 %v664_v24, %v663_v20 }
 0x18d   : > { %v655_v35 = vadd.f32 %v654_v25, %v653_v21  ;;  %v660_v38 = vrot.slane %v659_v27, 1 }
 0x18e   : > { %v666_v39 = vrot.slane %v665_v34, 1 }
 0x18f   : > { %v685_v41 = vsel %vm684_vm6, %v655_v35, %v683_v23  ;;  %v661_v42 = vadd.f32 %v660_v38, %v659_v27 }
 0x190   : > { %v667_v45 = vadd.f32 %v666_v39, %v665_v34 }
 0x191   : > { %v687_v28 = vsel %vm686_vm7, %v661_v42, %v685_v41 }
 0x192   : > { %v689_v46 = vsel %vm688_vm8, %v667_v45, %v687_v28 }
 0x193   : > { %v691_v49 = vadd.f32 %v689_v46, %v4600_v3 }
 0x195   : > { %v4789_v53 = vadd.f32 %v691_v49, %v4786_v52 }
 0x197   : > { %3969 = vst [vmem:[%s4791_s21] sm:$0xff] %v4789_v53  ;;  %745 = vrot.lane.b32.xlu0 %v4789_v53, %s4440_s15  ;;  %693 = vrot.lane.b32.xlu1 %v4789_v53, %s4438_s14  ;;  %v805_v55 = vrot.slane %v4789_v53, %v4606_v15  ;;  %v798_v3 = vcombine.high %v4789_v53, %v4789_v53 }
 0x199   : > { %v813_v60 = vcombine.high %v805_v55, %v805_v55  ;;  %v821_v61 = vrot.slane %v805_v55, %v4606_v15  ;;  %v812_v30 = vrot.slane %v798_v3, %v4606_v15 }
 0x19b   : > { %v835_v1 = vrot.slane %v813_v60, %v4606_v15  ;;  %v843_v2 = vcombine.high %v821_v61, %v821_v61  ;;  %v814_v4 = vcombine.high %v812_v30, %v812_v30  ;;  %v828_v5 = vrot.slane %v812_v30, %v4606_v15 }
 0x19c   : > { %v898_v7 = vrot.slane %v821_v61, %v4616_v26 }
 0x19d   : > { %v902_v9 = vrot.slane %v835_v1, %v4616_v26  ;;  %v906_v43 = vrot.slane %v843_v2, %v4616_v26  ;;  %v4821_v11 = vrot.slane %v814_v4, %v4606_v15  ;;  %v914_v16 = vrot.slane %v828_v5, %v4616_v26 }
 0x19e   : > { %v935_v22 = vmul.f32 %v898_v7, %v4639_v51  ;;  %v844_v3 = vcombine.high %v828_v5, %v828_v5 }
 0x19f   : > { %v936_v23 = vmul.f32 %v902_v9, %v4639_v51  ;;  %v937_v24 = vmul.f32 %v906_v43, %v4639_v51 }
 0x1a0   : > { %v922_v43 = vrot.slane %v844_v3, %v4616_v26 }
 0x209   : > { %v746_v56 = vpop.permute.xlu0 %745  ;;  %v694_v48 = vpop.permute.xlu1 %693 }
 0x20a   : > { %v755_v37 = vrot.slane %v746_v56, %v4606_v15  ;;  %v703_v58 = vrot.slane %v694_v48, %v4606_v15  ;;  %v696_v59 = vcombine.high %v694_v48, %v694_v48  ;;  %v748_v29 = vcombine.high %v746_v56, %v746_v56 }
 0x20b   : > { %v845_v56 = vcombine.high %v835_v1, %v835_v1 }
 0x20c   : > { %v763_v63 = vcombine.high %v755_v37, %v755_v37  ;;  %v711_v50 = vcombine.high %v703_v58, %v703_v58  ;;  %v710_v31 = vrot.slane %v696_v59, %v4606_v15  ;;  %v719_v0 = vrot.slane %v703_v58, %v4606_v15 }
 0x20d   : > { %v771_v44 = vrot.slane %v755_v37, %v4606_v15  ;;  %v762_v12 = vrot.slane %v748_v29, %v4606_v15  ;;  %v910_v5 = vrot.slane %v845_v56, %v4616_v26 }
 0x20e   : > { %v4813_v54 = vrot.slane %v763_v63, %v4606_v15  ;;  %v733_v6 = vrot.slane %v711_v50, %v4606_v15  ;;  %v712_v33 = vcombine.high %v710_v31, %v710_v31  ;;  %v741_v8 = vcombine.high %v719_v0, %v719_v0 }
 0x20f   : > { %v726_v10 = vrot.slane %v710_v31, %v4606_v15  ;;  %v793_v13 = vcombine.high %v771_v44, %v771_v44  ;;  %v850_v14 = vrot.slane %v719_v0, %v4616_v26  ;;  %v954_v17 = vrot.slane %v771_v44, %v4616_v26 }
 0x210   : > { %v958_v18 = vrot.slane %v4813_v54, %v4616_v26  ;;  %v854_v19 = vrot.slane %v733_v6, %v4616_v26  ;;  %v858_v20 = vrot.slane %v741_v8, %v4616_v26  ;;  %v740_v21 = vrot.slane %v712_v33, %v4606_v15 }
 0x211   : > { %v866_v25 = vrot.slane %v726_v10, %v4616_v26  ;;  %v887_v27 = vmul.f32 %v850_v14, %v4647_v57  ;;  %v764_v38 = vcombine.high %v762_v12, %v762_v12  ;;  %v778_v39 = vrot.slane %v762_v12, %v4606_v15 }
 0x212   : > { %v888_v34 = vmul.f32 %v854_v19, %v4647_v57  ;;  %v889_v35 = vmul.f32 %v858_v20, %v4647_v57  ;;  %v962_v41 = vrot.slane %v793_v13, %v4616_v26  ;;  %v743_v42 = vcombine.high %v733_v6, %v733_v6 }
 0x213   : > { %v991_v45 = vmul.f32 %v954_v17, %v4653_v62  ;;  %v992_v28 = vmul.f32 %v958_v18, %v4653_v62  ;;  %v943_v46 = vadd.f32 %v935_v22, %v887_v27  ;;  %v742_v55 = vcombine.high %v726_v10, %v726_v10 }
 0x214   : > { %v944_v49 = vadd.f32 %v936_v23, %v888_v34  ;;  %v870_v48 = vrot.slane %v740_v21, %v4616_v26  ;;  %v891_v37 = vmul.f32 %v866_v25, %v4647_v57  ;;  %v945_v58 = vadd.f32 %v937_v24, %v889_v35 }
 0x215   : > { %v999_v59 = vadd.f32 %v991_v45, %v943_v46  ;;  %v792_v61 = vrot.slane %v764_v38, %v4606_v15  ;;  %v862_v30 = vrot.slane %v743_v42, %v4616_v26  ;;  %v918_v63 = vrot.slane %v4821_v11, %v4616_v26 }
 0x216   : > { %v1000_v60 = vadd.f32 %v992_v28, %v944_v49  ;;  %v939_v50 = vmul.f32 %v914_v16, %v4639_v51  ;;  %v970_v31 = vrot.slane %v778_v39, %v4616_v26  ;;  %v993_v0 = vmul.f32 %v962_v41, %v4653_v62 }
 0x217   : > { %v1007_v1 = vadd.f32 %v999_v59, %v4678_v32  ;;  %v795_v4 = vcombine.high %v4813_v54, %v4813_v54  ;;  %v744_v29 = vcombine.high %v740_v21, %v740_v21  ;;  %v874_v44 = vrot.slane %v742_v55, %v4616_v26 }
 0x218   : > { %v1008_v2 = vadd.f32 %v1000_v60, %v4678_v32  ;;  %v892_v6 = vmul.f32 %v870_v48, %v4647_v57  ;;  %v947_v7 = vadd.f32 %v939_v50, %v891_v37  ;;  %v1001_v33 = vadd.f32 %v993_v0, %v945_v58 }
 0x219   : > { %4223 = vtanh.f32 %v1007_v1  ;;  %v846_v8 = vcombine.high %v4821_v11, %v4821_v11  ;;  %v890_v9 = vmul.f32 %v862_v30, %v4647_v57  ;;  %v794_v10 = vcombine.high %v778_v39, %v778_v39 }
 0x21a   : > { %4225 = vtanh.f32 %v1008_v2  ;;  %v974_v54 = vrot.slane %v792_v61, %v4616_v26  ;;  %v995_v12 = vmul.f32 %v970_v31, %v4653_v62  ;;  %v940_v13 = vmul.f32 %v918_v63, %v4639_v51 }
 0x21b   : > { %v966_v14 = vrot.slane %v795_v4, %v4616_v26  ;;  %v878_v16 = vrot.slane %v744_v29, %v4616_v26  ;;  %v938_v17 = vmul.f32 %v910_v5, %v4639_v51  ;;  %v893_v11 = vmul.f32 %v874_v44, %v4647_v57 }
 0x21c   : > { %v948_v18 = vadd.f32 %v940_v13, %v892_v6  ;;  %v1003_v19 = vadd.f32 %v995_v12, %v947_v7  ;;  %v1009_v20 = vadd.f32 %v1001_v33, %v4678_v32  ;;  %v926_v21 = vrot.slane %v846_v8, %v4616_v26 }
 0x21d   : > { %v946_v22 = vadd.f32 %v938_v17, %v890_v9  ;;  %v796_v23 = vcombine.high %v792_v61, %v792_v61  ;;  %v978_v24 = vrot.slane %v794_v10, %v4616_v26  ;;  %v996_v25 = vmul.f32 %v974_v54, %v4653_v62 }
 0x21e   : > { %v941_v27 = vmul.f32 %v922_v43, %v4639_v51  ;;  %v994_v34 = vmul.f32 %v966_v14, %v4653_v62  ;;  %v894_v35 = vmul.f32 %v878_v16, %v4647_v57  ;;  %v1011_v41 = vadd.f32 %v1003_v19, %v4678_v32 }
 0x21f   : > { %v1004_v39 = vadd.f32 %v996_v25, %v948_v18  ;;  %4227 = vtanh.f32 %v1009_v20  ;;  %v982_v28 = vrot.slane %v796_v23, %v4616_v26  ;;  %v997_v46 = vmul.f32 %v978_v24, %v4653_v62 }
 0x220   : > { %v949_v38 = vadd.f32 %v941_v27, %v893_v11  ;;  %v1002_v42 = vadd.f32 %v994_v34, %v946_v22  ;;  %v942_v49 = vmul.f32 %v926_v21, %v4639_v51  ;;  %4229 = vtanh.f32 %v1011_v41 }
 0x221   : > { %v1012_v48 = vadd.f32 %v1004_v39, %v4678_v32  ;;  %v998_v58 = vmul.f32 %v982_v28, %v4653_v62 }
 0x222   : > { %v950_v3 = vadd.f32 %v942_v49, %v894_v35  ;;  %v1005_v56 = vadd.f32 %v997_v46, %v949_v38  ;;  %v1010_v37 = vadd.f32 %v1002_v42, %v4678_v32 }
 0x223   : > { %v4224_v45 = vpop.eup %4223  ;;  %4231 = vtanh.f32 %v1012_v48 }
 0x224   : > { %v4226_v55 = vpop.eup %4225  ;;  %1023 = vrot.lane.b32.xlu1 %v4224_v45, %s4438_s14  ;;  %v1006_v59 = vadd.f32 %v998_v58, %v950_v3  ;;  %v1013_v60 = vadd.f32 %v1005_v56, %v4678_v32  ;;  %4233 = vtanh.f32 %v1010_v37  ;;  %v1063_v5 = vmul.f32 %v4224_v45, %v4742_v36 }
 0x225   : > { %1025 = vrot.lane.b32.xlu0 %v4226_v55, %s4438_s14  ;;  %v1064_v6 = vmul.f32 %v4226_v55, %v4742_v36 }
 0x226   : > { %v1014_v30 = vadd.f32 %v1006_v59, %v4678_v32  ;;  %4235 = vtanh.f32 %v1013_v60 }
 0x228   : > { %1039 = vrot.lane.b32.xlu1 %v4224_v45, %s4440_s15  ;;  %4237 = vtanh.f32 %v1014_v30 }
 0x229   : > { %1041 = vrot.lane.b32.xlu0 %v4226_v55, %s4440_s15  ;;  %v4228_v61 = vpop.eup %4227 }
 0x22a   : > { %v4230_v63 = vpop.eup %4229  ;;  %v1065_v17 = vmul.f32 %v4228_v61, %v4742_v36 }
 0x22b   : > { %v1067_v34 = vmul.f32 %v4230_v63, %v4742_v36 }
 0x22c   : > { %1027 = vrot.lane.b32.xlu1 %v4228_v61, %s4438_s14 }
 0x22d   : > { %1043 = vrot.lane.b32.xlu0 %v4228_v61, %s4440_s15  ;;  %v4894_v50 = vpop.eup %4231 }
 0x22e   : > { %v4234_v31 = vpop.eup %4233 }
 0x22f   : > { %v1066_v30 = vmul.f32 %v4234_v31, %v4742_v36 }
 0x230   : > { %1031 = vrot.lane.b32.xlu1 %v4230_v63, %s4438_s14  ;;  %v4899_v0 = vpop.eup %4235 }
 0x231   : > { %1047 = vrot.lane.b32.xlu0 %v4230_v63, %s4440_s15 }
 0x232   : > { %v4904_v1 = vpop.eup %4237 }
 0x234   : > { %1033 = vrot.lane.b32.xlu1 %v4894_v50, %s4438_s14 }
 0x235   : > { %1029 = vrot.lane.b32.xlu0 %v4234_v31, %s4438_s14 }
 0x238   : > { %1035 = vrot.lane.b32.xlu1 %v4899_v0, %s4438_s14 }
 0x239   : > { %1045 = vrot.lane.b32.xlu0 %v4234_v31, %s4440_s15 }
 0x23c   : > { %1037 = vrot.lane.b32.xlu1 %v4904_v1, %s4438_s14 }
 0x23d   : > { %1049 = vrot.lane.b32.xlu0 %v4894_v50, %s4440_s15 }
 0x240   : > { %1051 = vrot.lane.b32.xlu1 %v4899_v0, %s4440_s15 }
 0x241   : > { %1053 = vrot.lane.b32.xlu0 %v4904_v1, %s4440_s15 }
 0x296   : > { %v1024_v2 = vpop.permute.xlu1 %1023 }
 0x297   : > { %v1055_v4 = vmul.f32 %v1024_v2, %v4745_v40  ;;  %v1026_v29 = vpop.permute.xlu0 %1025 }
 0x298   : > { %v1056_v44 = vmul.f32 %v1026_v29, %v4745_v40 }
 0x299   : > { %v1071_v33 = vadd.f32 %v1063_v5, %v1055_v4 }
 0x29a   : > { %v1040_v7 = vpop.permute.xlu1 %1039  ;;  %v1072_v43 = vadd.f32 %v1064_v6, %v1056_v44 }
 0x29b   : > { %v1079_v8 = vmul.f32 %v1040_v7, %v4750_v47  ;;  %v1042_v9 = vpop.permute.xlu0 %1041 }
 0x29c   : > { %v1080_v10 = vmul.f32 %v1042_v9, %v4750_v47 }
 0x29d   : > { %v1087_v54 = vadd.f32 %v1079_v8, %v1071_v33  ;;  %v1068_v8 = vmul.f32 %v4894_v50, %v4742_v36  ;;  %v1070_v50 = vmul.f32 %v4904_v1, %v4742_v36 }
 0x29e   : > { %v1088_v12 = vadd.f32 %v1080_v10, %v1072_v43  ;;  %v1028_v13 = vpop.permute.xlu1 %1027 }
 0x29f   : > { %v1095_v14 = vrot.slane %v1087_v54, 4  ;;  %v1057_v16 = vmul.f32 %v1028_v13, %v4745_v40  ;;  %v1044_v11 = vpop.permute.xlu0 %1043 }
 0x2a0   : > { %v1101_v18 = vrot.slane %v1088_v12, 4  ;;  %v1081_v19 = vmul.f32 %v1044_v11, %v4750_v47 }
 0x2a1   : > { %v1096_v20 = vadd.f32 %v1095_v14, %v1087_v54  ;;  %v1073_v21 = vadd.f32 %v1065_v17, %v1057_v16 }
 0x2a2   : > { %v1102_v22 = vadd.f32 %v1101_v18, %v1088_v12  ;;  %v1032_v23 = vpop.permute.xlu1 %1031  ;;  %v1069_v18 = vmul.f32 %v4899_v0, %v4742_v36 }
 0x2a3   : > { %v1097_v24 = vrot.slane %v1096_v20, 2  ;;  %v1089_v25 = vadd.f32 %v1081_v19, %v1073_v21  ;;  %v1059_v27 = vmul.f32 %v1032_v23, %v4745_v40  ;;  %v1048_v35 = vpop.permute.xlu0 %1047 }
 0x2a4   : > { %v1103_v38 = vrot.slane %v1102_v22, 2  ;;  %v1083_v39 = vmul.f32 %v1048_v35, %v4750_v47 }
 0x2a5   : > { %v1098_v41 = vadd.f32 %v1097_v24, %v1096_v20  ;;  %v1107_v42 = vrot.slane %v1089_v25, 4  ;;  %v1075_v45 = vadd.f32 %v1067_v34, %v1059_v27 }
 0x2a6   : > { %v1104_v28 = vadd.f32 %v1103_v38, %v1102_v22  ;;  %v1034_v46 = vpop.permute.xlu1 %1033 }
 0x2a7   : > { %v1099_v49 = vrot.slane %v1098_v41, 1  ;;  %v1108_v55 = vadd.f32 %v1107_v42, %v1089_v25  ;;  %v1091_v3 = vadd.f32 %v1083_v39, %v1075_v45  ;;  %v1030_v56 = vpop.permute.xlu0 %1029  ;;  %v1060_v5 = vmul.f32 %v1034_v46, %v4745_v40 }
 0x2a8   : > { %v1105_v48 = vrot.slane %v1104_v28, 1  ;;  %v1058_v37 = vmul.f32 %v1030_v56, %v4745_v40 }
 0x2a9   : > { %v1109_v58 = vrot.slane %v1108_v55, 2  ;;  %v1119_v59 = vrot.slane %v1091_v3, 4  ;;  %v1100_v60 = vadd.f32 %v1099_v49, %v1098_v41  ;;  %v1076_v13 = vadd.f32 %v1068_v8, %v1060_v5 }
 0x2aa   : > { %v1106_v61 = vadd.f32 %v1105_v48, %v1104_v28  ;;  %v1036_v63 = vpop.permute.xlu1 %1035  ;;  %v1074_v6 = vadd.f32 %v1066_v30, %v1058_v37 }
 0x2ab   : > { %v1110_v2 = vadd.f32 %v1109_v58, %v1108_v55  ;;  %v1120_v4 = vadd.f32 %v1119_v59, %v1091_v3  ;;  %v1046_v29 = vpop.permute.xlu0 %1045  ;;  %v1061_v31 = vmul.f32 %v1036_v63, %v4745_v40 }
 0x2ac   : > { %v1151_v44 = vsel %vm676_vm2, %v1106_v61, %v1100_v60  ;;  %v1082_v7 = vmul.f32 %v1046_v29, %v4750_v47 }
 0x2ad   : > { %v1111_v33 = vrot.slane %v1110_v2, 1  ;;  %v1121_v54 = vrot.slane %v1120_v4, 2  ;;  %v1077_v23 = vadd.f32 %v1069_v18, %v1061_v31 }
 0x2ae   : > { %v1090_v9 = vadd.f32 %v1082_v7, %v1074_v6  ;;  %v1038_v43 = vpop.permute.xlu1 %1037 }
 0x2af   : > { %v1112_v10 = vadd.f32 %v1111_v33, %v1110_v2  ;;  %v1050_v12 = vpop.permute.xlu0 %1049  ;;  %v1062_v16 = vmul.f32 %v1038_v43, %v4745_v40  ;;  %v1122_v22 = vadd.f32 %v1121_v54, %v1120_v4 }
 0x2b0   : > { %v1113_v14 = vrot.slane %v1090_v9, 4  ;;  %v1084_v17 = vmul.f32 %v1050_v12, %v4750_v47 }
 0x2b1   : > { %v1152_v11 = vsel %vm678_vm3, %v1112_v10, %v1151_v44  ;;  %v1078_v34 = vadd.f32 %v1070_v50, %v1062_v16  ;;  %v1123_v45 = vrot.slane %v1122_v22, 1 }
 0x2b2   : > { %v1114_v19 = vadd.f32 %v1113_v14, %v1090_v9  ;;  %v1092_v20 = vadd.f32 %v1084_v17, %v1076_v13  ;;  %v1052_v21 = vpop.permute.xlu1 %1051 }
 0x2b3   : > { %v1085_v24 = vmul.f32 %v1052_v21, %v4750_v47  ;;  %v1054_v25 = vpop.permute.xlu0 %1053  ;;  %v1124_v37 = vadd.f32 %v1123_v45, %v1122_v22 }
 0x2b4   : > { %v1115_v27 = vrot.slane %v1114_v19, 2  ;;  %v1125_v35 = vrot.slane %v1092_v20, 4  ;;  %v1086_v38 = vmul.f32 %v1054_v25, %v4750_v47 }
 0x2b5   : > { %v1093_v39 = vadd.f32 %v1085_v24, %v1077_v23 }
 0x2b6   : > { %v1116_v41 = vadd.f32 %v1115_v27, %v1114_v19  ;;  %v1126_v42 = vadd.f32 %v1125_v35, %v1092_v20  ;;  %v1094_v0 = vadd.f32 %v1086_v38, %v1078_v34 }
 0x2b7   : > { %v1131_v28 = vrot.slane %v1093_v39, 4 }
 0x2b8   : > { %v1117_v46 = vrot.slane %v1116_v41, 1  ;;  %v1127_v1 = vrot.slane %v1126_v42, 2  ;;  %v1137_v49 = vrot.slane %v1094_v0, 4 }
 0x2b9   : > { %v1132_v55 = vadd.f32 %v1131_v28, %v1093_v39 }
 0x2ba   : > { %v1118_v3 = vadd.f32 %v1117_v46, %v1116_v41  ;;  %v1128_v56 = vadd.f32 %v1127_v1, %v1126_v42  ;;  %v1138_v48 = vadd.f32 %v1137_v49, %v1094_v0 }
 0x2bb   : > { %v1133_v58 = vrot.slane %v1132_v55, 2 }
 0x2bc   : > { %v1153_v59 = vsel %vm680_vm4, %v1118_v3, %v1152_v11  ;;  %v1129_v60 = vrot.slane %v1128_v56, 1  ;;  %v1139_v61 = vrot.slane %v1138_v48, 2 }
 0x2bd   : > { %v1154_v30 = vsel %vm682_vm5, %v1124_v37, %v1153_v59  ;;  %v1134_v63 = vadd.f32 %v1133_v58, %v1132_v55 }
 0x2be   : > { %v1130_v2 = vadd.f32 %v1129_v60, %v1128_v56  ;;  %v1140_v4 = vadd.f32 %v1139_v61, %v1138_v48 }
 0x2bf   : > { %v1135_v29 = vrot.slane %v1134_v63, 1 }
 0x2c0   : > { %v1155_v44 = vsel %vm684_vm6, %v1130_v2, %v1154_v30  ;;  %v1141_v5 = vrot.slane %v1140_v4, 1 }
 0x2c1   : > { %v1136_v6 = vadd.f32 %v1135_v29, %v1134_v63 }
 0x2c2   : > { %v1142_v7 = vadd.f32 %v1141_v5, %v1140_v4 }
 0x2c3   : > { %v1156_v33 = vsel %vm686_vm7, %v1136_v6, %v1155_v44 }
 0x2c4   : > { %v1157_v8 = vsel %vm688_vm8, %v1142_v7, %v1156_v33 }
 0x2c5   : > { %v1159_v9 = vadd.f32 %v1157_v8, %v4789_v53 }
 0x2c7   : > { %v4950_v43 = vadd.f32 %v1159_v9, %v4786_v52 }
 0x2c9   : > { %3970 = vst [vmem:[%s4791_s21 + $0x8] sm:$0xff] %v4950_v43  ;;  %1213 = vrot.lane.b32.xlu0 %v4950_v43, %s4440_s15  ;;  %1161 = vrot.lane.b32.xlu1 %v4950_v43, %s4438_s14  ;;  %v1273_v10 = vrot.slane %v4950_v43, %v4606_v15  ;;  %v1266_v54 = vcombine.high %v4950_v43, %v4950_v43 }
 0x2cb   : > { %v1281_v16 = vcombine.high %v1273_v10, %v1273_v10  ;;  %v1289_v17 = vrot.slane %v1273_v10, %v4606_v15  ;;  %v1280_v11 = vrot.slane %v1266_v54, %v4606_v15 }
 0x2cd   : > { %v1303_v21 = vrot.slane %v1281_v16, %v4606_v15  ;;  %v1311_v22 = vcombine.high %v1289_v17, %v1289_v17  ;;  %v1282_v23 = vcombine.high %v1280_v11, %v1280_v11  ;;  %v1296_v27 = vrot.slane %v1280_v11, %v4606_v15 }
 0x2ce   : > { %v1366_v38 = vrot.slane %v1289_v17, %v4616_v26 }
 0x2cf   : > { %v1370_v42 = vrot.slane %v1303_v21, %v4616_v26  ;;  %v1374_v0 = vrot.slane %v1311_v22, %v4616_v26  ;;  %v4980_v28 = vrot.slane %v1282_v23, %v4606_v15  ;;  %v1382_v55 = vrot.slane %v1296_v27, %v4616_v26 }
 0x2d0   : > { %v1403_v59 = vmul.f32 %v1366_v38, %v4639_v51  ;;  %v1312_v54 = vcombine.high %v1296_v27, %v1296_v27 }
 0x2d1   : > { %v1404_v60 = vmul.f32 %v1370_v42, %v4639_v51  ;;  %v1405_v61 = vmul.f32 %v1374_v0, %v4639_v51 }
 0x2d2   : > { %v1390_v0 = vrot.slane %v1312_v54, %v4616_v26 }
 0x33b   : > { %v1214_v31 = vpop.permute.xlu0 %1213  ;;  %v1162_v12 = vpop.permute.xlu1 %1161 }
 0x33c   : > { %v1223_v53 = vrot.slane %v1214_v31, %v4606_v15  ;;  %v1171_v13 = vrot.slane %v1162_v12, %v4606_v15  ;;  %v1164_v14 = vcombine.high %v1162_v12, %v1162_v12  ;;  %v1216_v24 = vcombine.high %v1214_v31, %v1214_v31 }
 0x33d   : > { %v1313_v31 = vcombine.high %v1303_v21, %v1303_v21 }
 0x33e   : > { %v1231_v18 = vcombine.high %v1223_v53, %v1223_v53  ;;  %v1179_v19 = vcombine.high %v1171_v13, %v1171_v13  ;;  %v1178_v50 = vrot.slane %v1164_v14, %v4606_v15  ;;  %v1187_v20 = vrot.slane %v1171_v13, %v4606_v15 }
 0x33f   : > { %v1239_v25 = vrot.slane %v1223_v53, %v4606_v15  ;;  %v1230_v46 = vrot.slane %v1216_v24, %v4606_v15  ;;  %v1378_v27 = vrot.slane %v1313_v31, %v4616_v26 }
 0x340   : > { %v4972_v34 = vrot.slane %v1231_v18, %v4606_v15  ;;  %v1201_v35 = vrot.slane %v1179_v19, %v4606_v15  ;;  %v1180_v39 = vcombine.high %v1178_v50, %v1178_v50  ;;  %v1209_v41 = vcombine.high %v1187_v20, %v1187_v20 }
 0x341   : > { %v1194_v45 = vrot.slane %v1178_v50, %v4606_v15  ;;  %v1261_v1 = vcombine.high %v1239_v25, %v1239_v25  ;;  %v1318_v49 = vrot.slane %v1187_v20, %v4616_v26  ;;  %v1422_v3 = vrot.slane %v1239_v25, %v4616_v26 }
 0x342   : > { %v1426_v56 = vrot.slane %v4972_v34, %v4616_v26  ;;  %v1322_v48 = vrot.slane %v1201_v35, %v4616_v26  ;;  %v1326_v37 = vrot.slane %v1209_v41, %v4616_v26  ;;  %v1208_v58 = vrot.slane %v1180_v39, %v4606_v15 }
 0x343   : > { %v1334_v30 = vrot.slane %v1194_v45, %v4616_v26  ;;  %v1355_v63 = vmul.f32 %v1318_v49, %v4647_v57  ;;  %v1232_v29 = vcombine.high %v1230_v46, %v1230_v46  ;;  %v1246_v44 = vrot.slane %v1230_v46, %v4606_v15 }
 0x344   : > { %v1356_v2 = vmul.f32 %v1322_v48, %v4647_v57  ;;  %v1357_v4 = vmul.f32 %v1326_v37, %v4647_v57  ;;  %v1430_v5 = vrot.slane %v1261_v1, %v4616_v26  ;;  %v1211_v6 = vcombine.high %v1201_v35, %v1201_v35 }
 0x345   : > { %v1459_v7 = vmul.f32 %v1422_v3, %v4653_v62  ;;  %v1460_v33 = vmul.f32 %v1426_v56, %v4653_v62  ;;  %v1411_v8 = vadd.f32 %v1403_v59, %v1355_v63  ;;  %v1210_v10 = vcombine.high %v1194_v45, %v1194_v45 }
 0x346   : > { %v1412_v9 = vadd.f32 %v1404_v60, %v1356_v2  ;;  %v1338_v12 = vrot.slane %v1208_v58, %v4616_v26  ;;  %v1359_v53 = vmul.f32 %v1334_v30, %v4647_v57  ;;  %v1413_v13 = vadd.f32 %v1405_v61, %v1357_v4 }
 0x347   : > { %v1467_v14 = vadd.f32 %v1459_v7, %v1411_v8  ;;  %v1260_v17 = vrot.slane %v1232_v29, %v4606_v15  ;;  %v1330_v11 = vrot.slane %v1211_v6, %v4616_v26  ;;  %v1386_v18 = vrot.slane %v4980_v28, %v4616_v26 }
 0x348   : > { %v1468_v16 = vadd.f32 %v1460_v33, %v1412_v9  ;;  %v1407_v19 = vmul.f32 %v1382_v55, %v4639_v51  ;;  %v1438_v50 = vrot.slane %v1246_v44, %v4616_v26  ;;  %v1461_v20 = vmul.f32 %v1430_v5, %v4653_v62 }
 0x349   : > { %v1475_v21 = vadd.f32 %v1467_v14, %v4678_v32  ;;  %v1263_v23 = vcombine.high %v4972_v34, %v4972_v34  ;;  %v1212_v24 = vcombine.high %v1208_v58, %v1208_v58  ;;  %v1342_v25 = vrot.slane %v1210_v10, %v4616_v26 }
 0x34a   : > { %v1476_v22 = vadd.f32 %v1468_v16, %v4678_v32  ;;  %v1360_v35 = vmul.f32 %v1338_v12, %v4647_v57  ;;  %v1415_v38 = vadd.f32 %v1407_v19, %v1359_v53  ;;  %v1469_v39 = vadd.f32 %v1461_v20, %v1413_v13 }
 0x34b   : > { %4239 = vtanh.f32 %v1475_v21  ;;  %v1314_v41 = vcombine.high %v4980_v28, %v4980_v28  ;;  %v1358_v42 = vmul.f32 %v1330_v11, %v4647_v57  ;;  %v1262_v45 = vcombine.high %v1246_v44, %v1246_v44 }
 0x34c   : > { %4241 = vtanh.f32 %v1476_v22  ;;  %v1442_v34 = vrot.slane %v1260_v17, %v4616_v26  ;;  %v1463_v46 = vmul.f32 %v1438_v50, %v4653_v62  ;;  %v1408_v1 = vmul.f32 %v1386_v18, %v4639_v51 }
 0x34d   : > { %v1434_v49 = vrot.slane %v1263_v23, %v4616_v26  ;;  %v1346_v55 = vrot.slane %v1212_v24, %v4616_v26  ;;  %v1406_v3 = vmul.f32 %v1378_v27, %v4639_v51  ;;  %v1361_v28 = vmul.f32 %v1342_v25, %v4647_v57 }
 0x34e   : > { %v1416_v56 = vadd.f32 %v1408_v1, %v1360_v35  ;;  %v1471_v48 = vadd.f32 %v1463_v46, %v1415_v38  ;;  %v1477_v37 = vadd.f32 %v1469_v39, %v4678_v32  ;;  %v1394_v58 = vrot.slane %v1314_v41, %v4616_v26 }
 0x34f   : > { %v1414_v59 = vadd.f32 %v1406_v3, %v1358_v42  ;;  %v1264_v60 = vcombine.high %v1260_v17, %v1260_v17  ;;  %v1446_v61 = vrot.slane %v1262_v45, %v4616_v26  ;;  %v1464_v30 = vmul.f32 %v1442_v34, %v4653_v62 }
 0x350   : > { %v1409_v63 = vmul.f32 %v1390_v0, %v4639_v51  ;;  %v1462_v2 = vmul.f32 %v1434_v49, %v4653_v62  ;;  %v1362_v4 = vmul.f32 %v1346_v55, %v4647_v57  ;;  %v1479_v5 = vadd.f32 %v1471_v48, %v4678_v32 }
 0x351   : > { %v1472_v44 = vadd.f32 %v1464_v30, %v1416_v56  ;;  %4243 = vtanh.f32 %v1477_v37  ;;  %v1450_v33 = vrot.slane %v1264_v60, %v4616_v26  ;;  %v1465_v8 = vmul.f32 %v1446_v61, %v4653_v62 }
 0x352   : > { %v1417_v29 = vadd.f32 %v1409_v63, %v1361_v28  ;;  %v1470_v6 = vadd.f32 %v1462_v2, %v1414_v59  ;;  %v1410_v9 = vmul.f32 %v1394_v58, %v4639_v51  ;;  %4245 = vtanh.f32 %v1479_v5 }
 0x353   : > { %v1480_v12 = vadd.f32 %v1472_v44, %v4678_v32  ;;  %v1466_v13 = vmul.f32 %v1450_v33, %v4653_v62 }
 0x354   : > { %v1418_v54 = vadd.f32 %v1410_v9, %v1362_v4  ;;  %v1473_v31 = vadd.f32 %v1465_v8, %v1417_v29  ;;  %v1478_v53 = vadd.f32 %v1470_v6, %v4678_v32 }
 0x355   : > { %v4240_v7 = vpop.eup %4239  ;;  %4247 = vtanh.f32 %v1480_v12 }
 0x356   : > { %v4242_v10 = vpop.eup %4241  ;;  %1491 = vrot.lane.b32.xlu1 %v4240_v7, %s4438_s14  ;;  %v1474_v14 = vadd.f32 %v1466_v13, %v1418_v54  ;;  %v1481_v16 = vadd.f32 %v1473_v31, %v4678_v32  ;;  %4249 = vtanh.f32 %v1478_v53  ;;  %v1531_v27 = vmul.f32 %v4240_v7, %v4742_v36 }
 0x357   : > { %1493 = vrot.lane.b32.xlu0 %v4242_v10, %s4438_s14  ;;  %v1532_v35 = vmul.f32 %v4242_v10, %v4742_v36 }
 0x358   : > { %v1482_v11 = vadd.f32 %v1474_v14, %v4678_v32  ;;  %4251 = vtanh.f32 %v1481_v16 }
 0x35a   : > { %1507 = vrot.lane.b32.xlu1 %v4240_v7, %s4440_s15  ;;  %4253 = vtanh.f32 %v1482_v11 }
 0x35b   : > { %1509 = vrot.lane.b32.xlu0 %v4242_v10, %s4440_s15  ;;  %v4244_v17 = vpop.eup %4243 }
 0x35c   : > { %v4246_v18 = vpop.eup %4245  ;;  %v1533_v3 = vmul.f32 %v4244_v17, %v4742_v36 }
 0x35d   : > { %v1535_v2 = vmul.f32 %v4246_v18, %v4742_v36 }
 0x35e   : > { %1495 = vrot.lane.b32.xlu1 %v4244_v17, %s4438_s14 }
 0x35f   : > { %1511 = vrot.lane.b32.xlu0 %v4244_v17, %s4440_s15  ;;  %v5053_v19 = vpop.eup %4247 }
 0x360   : > { %v4250_v50 = vpop.eup %4249 }
 0x361   : > { %v1534_v11 = vmul.f32 %v4250_v50, %v4742_v36 }
 0x362   : > { %1499 = vrot.lane.b32.xlu1 %v4246_v18, %s4438_s14  ;;  %v5058_v20 = vpop.eup %4251 }
 0x363   : > { %1515 = vrot.lane.b32.xlu0 %v4246_v18, %s4440_s15 }
 0x364   : > { %v5063_v21 = vpop.eup %4253 }
 0x366   : > { %1501 = vrot.lane.b32.xlu1 %v5053_v19, %s4438_s14 }
 0x367   : > { %1497 = vrot.lane.b32.xlu0 %v4250_v50, %s4438_s14 }
 0x36a   : > { %1503 = vrot.lane.b32.xlu1 %v5058_v20, %s4438_s14 }
 0x36b   : > { %1513 = vrot.lane.b32.xlu0 %v4250_v50, %s4440_s15 }
 0x36e   : > { %1505 = vrot.lane.b32.xlu1 %v5063_v21, %s4438_s14 }
 0x36f   : > { %1517 = vrot.lane.b32.xlu0 %v5053_v19, %s4440_s15 }
 0x372   : > { %1519 = vrot.lane.b32.xlu1 %v5058_v20, %s4440_s15 }
 0x373   : > { %1521 = vrot.lane.b32.xlu0 %v5063_v21, %s4440_s15 }
 0x3c8   : > { %v1492_v22 = vpop.permute.xlu1 %1491 }
 0x3c9   : > { %v1523_v23 = vmul.f32 %v1492_v22, %v4745_v40  ;;  %v1494_v24 = vpop.permute.xlu0 %1493 }
 0x3ca   : > { %v1524_v25 = vmul.f32 %v1494_v24, %v4745_v40 }
 0x3cb   : > { %v1539_v39 = vadd.f32 %v1531_v27, %v1523_v23 }
 0x3cc   : > { %v1508_v38 = vpop.permute.xlu1 %1507  ;;  %v1540_v0 = vadd.f32 %v1532_v35, %v1524_v25 }
 0x3cd   : > { %v1547_v41 = vmul.f32 %v1508_v38, %v4750_v47  ;;  %v1510_v42 = vpop.permute.xlu0 %1509 }
 0x3ce   : > { %v1548_v45 = vmul.f32 %v1510_v42, %v4750_v47 }
 0x3cf   : > { %v1555_v34 = vadd.f32 %v1547_v41, %v1539_v39  ;;  %v1536_v41 = vmul.f32 %v5053_v19, %v4742_v36  ;;  %v1538_v19 = vmul.f32 %v5063_v21, %v4742_v36 }
 0x3d0   : > { %v1556_v46 = vadd.f32 %v1548_v45, %v1540_v0  ;;  %v1496_v1 = vpop.permute.xlu1 %1495 }
 0x3d1   : > { %v1563_v49 = vrot.slane %v1555_v34, 4  ;;  %v1525_v55 = vmul.f32 %v1496_v1, %v4745_v40  ;;  %v1512_v28 = vpop.permute.xlu0 %1511 }
 0x3d2   : > { %v1569_v56 = vrot.slane %v1556_v46, 4  ;;  %v1549_v48 = vmul.f32 %v1512_v28, %v4750_v47 }
 0x3d3   : > { %v1564_v37 = vadd.f32 %v1563_v49, %v1555_v34  ;;  %v1541_v58 = vadd.f32 %v1533_v3, %v1525_v55 }
 0x3d4   : > { %v1570_v59 = vadd.f32 %v1569_v56, %v1556_v46  ;;  %v1500_v60 = vpop.permute.xlu1 %1499  ;;  %v1537_v56 = vmul.f32 %v5058_v20, %v4742_v36 }
 0x3d5   : > { %v1565_v61 = vrot.slane %v1564_v37, 2  ;;  %v1557_v30 = vadd.f32 %v1549_v48, %v1541_v58  ;;  %v1527_v63 = vmul.f32 %v1500_v60, %v4745_v40  ;;  %v1516_v4 = vpop.permute.xlu0 %1515 }
 0x3d6   : > { %v1571_v29 = vrot.slane %v1570_v59, 2  ;;  %v1551_v44 = vmul.f32 %v1516_v4, %v4750_v47 }
 0x3d7   : > { %v1566_v5 = vadd.f32 %v1565_v61, %v1564_v37  ;;  %v1575_v6 = vrot.slane %v1557_v30, 4  ;;  %v1543_v7 = vadd.f32 %v1535_v2, %v1527_v63 }
 0x3d8   : > { %v1572_v33 = vadd.f32 %v1571_v29, %v1570_v59  ;;  %v1502_v8 = vpop.permute.xlu1 %1501 }
 0x3d9   : > { %v1567_v9 = vrot.slane %v1566_v5, 1  ;;  %v1576_v10 = vadd.f32 %v1575_v6, %v1557_v30  ;;  %v1559_v54 = vadd.f32 %v1551_v44, %v1543_v7  ;;  %v1498_v31 = vpop.permute.xlu0 %1497  ;;  %v1528_v27 = vmul.f32 %v1502_v8, %v4745_v40 }
 0x3da   : > { %v1573_v12 = vrot.slane %v1572_v33, 1  ;;  %v1526_v53 = vmul.f32 %v1498_v31, %v4745_v40 }
 0x3db   : > { %v1577_v13 = vrot.slane %v1576_v10, 2  ;;  %v1587_v14 = vrot.slane %v1559_v54, 4  ;;  %v1568_v16 = vadd.f32 %v1567_v9, %v1566_v5  ;;  %v1544_v1 = vadd.f32 %v1536_v41, %v1528_v27 }
 0x3dc   : > { %v1574_v17 = vadd.f32 %v1573_v12, %v1572_v33  ;;  %v1504_v18 = vpop.permute.xlu1 %1503  ;;  %v1542_v35 = vadd.f32 %v1534_v11, %v1526_v53 }
 0x3dd   : > { %v1578_v22 = vadd.f32 %v1577_v13, %v1576_v10  ;;  %v1588_v23 = vadd.f32 %v1587_v14, %v1559_v54  ;;  %v1514_v24 = vpop.permute.xlu0 %1513  ;;  %v1529_v50 = vmul.f32 %v1504_v18, %v4745_v40 }
 0x3de   : > { %v1619_v25 = vsel %vm676_vm2, %v1574_v17, %v1568_v16  ;;  %v1550_v38 = vmul.f32 %v1514_v24, %v4750_v47 }
 0x3df   : > { %v1579_v39 = vrot.slane %v1578_v22, 1  ;;  %v1589_v34 = vrot.slane %v1588_v23, 2  ;;  %v1545_v60 = vadd.f32 %v1537_v56, %v1529_v50 }
 0x3e0   : > { %v1558_v42 = vadd.f32 %v1550_v38, %v1542_v35  ;;  %v1506_v0 = vpop.permute.xlu1 %1505 }
 0x3e1   : > { %v1580_v45 = vadd.f32 %v1579_v39, %v1578_v22  ;;  %v1518_v46 = vpop.permute.xlu0 %1517  ;;  %v1530_v55 = vmul.f32 %v1506_v0, %v4745_v40  ;;  %v1590_v59 = vadd.f32 %v1589_v34, %v1588_v23 }
 0x3e2   : > { %v1581_v49 = vrot.slane %v1558_v42, 4  ;;  %v1552_v3 = vmul.f32 %v1518_v46, %v4750_v47 }
 0x3e3   : > { %v1620_v28 = vsel %vm678_vm3, %v1580_v45, %v1619_v25  ;;  %v1546_v2 = vadd.f32 %v1538_v19, %v1530_v55  ;;  %v1591_v7 = vrot.slane %v1590_v59, 1 }
 0x3e4   : > { %v1582_v48 = vadd.f32 %v1581_v49, %v1558_v42  ;;  %v1560_v37 = vadd.f32 %v1552_v3, %v1544_v1  ;;  %v1520_v58 = vpop.permute.xlu1 %1519 }
 0x3e5   : > { %v1553_v61 = vmul.f32 %v1520_v58, %v4750_v47  ;;  %v1522_v30 = vpop.permute.xlu0 %1521  ;;  %v1592_v53 = vadd.f32 %v1591_v7, %v1590_v59 }
 0x3e6   : > { %v1583_v63 = vrot.slane %v1582_v48, 2  ;;  %v1593_v4 = vrot.slane %v1560_v37, 4  ;;  %v1554_v29 = vmul.f32 %v1522_v30, %v4750_v47 }
 0x3e7   : > { %v1561_v44 = vadd.f32 %v1553_v61, %v1545_v60 }
 0x3e8   : > { %v1584_v5 = vadd.f32 %v1583_v63, %v1582_v48  ;;  %v1594_v6 = vadd.f32 %v1593_v4, %v1560_v37  ;;  %v1562_v20 = vadd.f32 %v1554_v29, %v1546_v2 }
 0x3e9   : > { %v1599_v33 = vrot.slane %v1561_v44, 4 }
 0x3ea   : > { %v1585_v8 = vrot.slane %v1584_v5, 1  ;;  %v1595_v21 = vrot.slane %v1594_v6, 2  ;;  %v1605_v9 = vrot.slane %v1562_v20, 4 }
 0x3eb   : > { %v1600_v10 = vadd.f32 %v1599_v33, %v1561_v44 }
 0x3ec   : > { %v1586_v54 = vadd.f32 %v1585_v8, %v1584_v5  ;;  %v1596_v31 = vadd.f32 %v1595_v21, %v1594_v6  ;;  %v1606_v12 = vadd.f32 %v1605_v9, %v1562_v20 }
 0x3ed   : > { %v1601_v13 = vrot.slane %v1600_v10, 2 }
 0x3ee   : > { %v1621_v14 = vsel %vm680_vm4, %v1586_v54, %v1620_v28  ;;  %v1597_v16 = vrot.slane %v1596_v31, 1  ;;  %v1607_v17 = vrot.slane %v1606_v12, 2 }
 0x3ef   : > { %v1622_v11 = vsel %vm682_vm5, %v1592_v53, %v1621_v14  ;;  %v1602_v18 = vadd.f32 %v1601_v13, %v1600_v10 }
 0x3f0   : > { %v1598_v22 = vadd.f32 %v1597_v16, %v1596_v31  ;;  %v1608_v23 = vadd.f32 %v1607_v17, %v1606_v12 }
 0x3f1   : > { %v1603_v24 = vrot.slane %v1602_v18, 1 }
 0x3f2   : > { %v1623_v25 = vsel %vm684_vm6, %v1598_v22, %v1622_v11  ;;  %v1609_v27 = vrot.slane %v1608_v23, 1 }
 0x3f3   : > { %v1604_v35 = vadd.f32 %v1603_v24, %v1602_v18 }
 0x3f4   : > { %v1610_v38 = vadd.f32 %v1609_v27, %v1608_v23 }
 0x3f5   : > { %v1624_v39 = vsel %vm686_vm7, %v1604_v35, %v1623_v25 }
 0x3f6   : > { %v1625_v41 = vsel %vm688_vm8, %v1610_v38, %v1624_v39 }
 0x3f7   : > { %v1627_v42 = vadd.f32 %v1625_v41, %v4950_v43 }
 0x3f9   : > { %v5109_v0 = vadd.f32 %v1627_v42, %v4786_v52 }
 0x3fb   : > { %3971 = vst [vmem:[%s4791_s21 + $0x10] sm:$0xff] %v5109_v0  ;;  %1681 = vrot.lane.b32.xlu0 %v5109_v0, %s4440_s15  ;;  %1629 = vrot.lane.b32.xlu1 %v5109_v0, %s4438_s14  ;;  %v1741_v45 = vrot.slane %v5109_v0, %v4606_v15  ;;  %v1734_v34 = vcombine.high %v5109_v0, %v5109_v0 }
 0x3fd   : > { %v1749_v55 = vcombine.high %v1741_v45, %v1741_v45  ;;  %v1757_v3 = vrot.slane %v1741_v45, %v4606_v15  ;;  %v1748_v28 = vrot.slane %v1734_v34, %v4606_v15 }
 0x3ff   : > { %v1771_v58 = vrot.slane %v1749_v55, %v4606_v15  ;;  %v1779_v59 = vcombine.high %v1757_v3, %v1757_v3  ;;  %v1750_v60 = vcombine.high %v1748_v28, %v1748_v28  ;;  %v1764_v63 = vrot.slane %v1748_v28, %v4606_v15 }
 0x400   : > { %v1834_v29 = vrot.slane %v1757_v3, %v4616_v26 }
 0x401   : > { %v1838_v6 = vrot.slane %v1771_v58, %v4616_v26  ;;  %v1842_v20 = vrot.slane %v1779_v59, %v4616_v26  ;;  %v5139_v33 = vrot.slane %v1750_v60, %v4606_v15  ;;  %v1850_v10 = vrot.slane %v1764_v63, %v4616_v26 }
 0x402   : > { %v1871_v14 = vmul.f32 %v1834_v29, %v4639_v51  ;;  %v1780_v34 = vcombine.high %v1764_v63, %v1764_v63 }
 0x403   : > { %v1872_v16 = vmul.f32 %v1838_v6, %v4639_v51  ;;  %v1873_v17 = vmul.f32 %v1842_v20, %v4639_v51 }
 0x404   : > { %v1858_v20 = vrot.slane %v1780_v34, %v4616_v26 }
 0x46d   : > { %v1682_v50 = vpop.permute.xlu0 %1681  ;;  %v1630_v46 = vpop.permute.xlu1 %1629 }
 0x46e   : > { %v1691_v43 = vrot.slane %v1682_v50, %v4606_v15  ;;  %v1639_v1 = vrot.slane %v1630_v46, %v4606_v15  ;;  %v1632_v49 = vcombine.high %v1630_v46, %v1630_v46  ;;  %v1684_v61 = vcombine.high %v1682_v50, %v1682_v50 }
 0x46f   : > { %v1781_v50 = vcombine.high %v1771_v58, %v1771_v58 }
 0x470   : > { %v1699_v56 = vcombine.high %v1691_v43, %v1691_v43  ;;  %v1647_v48 = vcombine.high %v1639_v1, %v1639_v1  ;;  %v1646_v19 = vrot.slane %v1632_v49, %v4606_v15  ;;  %v1655_v37 = vrot.slane %v1639_v1, %v4606_v15 }
 0x471   : > { %v1707_v30 = vrot.slane %v1691_v43, %v4606_v15  ;;  %v1698_v8 = vrot.slane %v1684_v61, %v4606_v15  ;;  %v1846_v63 = vrot.slane %v1781_v50, %v4616_v26 }
 0x472   : > { %v5131_v2 = vrot.slane %v1699_v56, %v4606_v15  ;;  %v1669_v4 = vrot.slane %v1647_v48, %v4606_v15  ;;  %v1648_v44 = vcombine.high %v1646_v19, %v1646_v19  ;;  %v1677_v5 = vcombine.high %v1655_v37, %v1655_v37 }
 0x473   : > { %v1662_v7 = vrot.slane %v1646_v19, %v4606_v15  ;;  %v1729_v21 = vcombine.high %v1707_v30, %v1707_v30  ;;  %v1786_v9 = vrot.slane %v1655_v37, %v4616_v26  ;;  %v1890_v54 = vrot.slane %v1707_v30, %v4616_v26 }
 0x474   : > { %v1894_v31 = vrot.slane %v5131_v2, %v4616_v26  ;;  %v1790_v12 = vrot.slane %v1669_v4, %v4616_v26  ;;  %v1794_v53 = vrot.slane %v1677_v5, %v4616_v26  ;;  %v1676_v13 = vrot.slane %v1648_v44, %v4606_v15 }
 0x475   : > { %v1802_v11 = vrot.slane %v1662_v7, %v4616_v26  ;;  %v1823_v18 = vmul.f32 %v1786_v9, %v4647_v57  ;;  %v1700_v24 = vcombine.high %v1698_v8, %v1698_v8  ;;  %v1714_v25 = vrot.slane %v1698_v8, %v4606_v15 }
 0x476   : > { %v1824_v22 = vmul.f32 %v1790_v12, %v4647_v57  ;;  %v1825_v23 = vmul.f32 %v1794_v53, %v4647_v57  ;;  %v1898_v27 = vrot.slane %v1729_v21, %v4616_v26  ;;  %v1679_v35 = vcombine.high %v1669_v4, %v1669_v4 }
 0x477   : > { %v1927_v38 = vmul.f32 %v1890_v54, %v4653_v62  ;;  %v1928_v39 = vmul.f32 %v1894_v31, %v4653_v62  ;;  %v1879_v41 = vadd.f32 %v1871_v14, %v1823_v18  ;;  %v1678_v45 = vcombine.high %v1662_v7, %v1662_v7 }
 0x478   : > { %v1880_v42 = vadd.f32 %v1872_v16, %v1824_v22  ;;  %v1806_v46 = vrot.slane %v1676_v13, %v4616_v26  ;;  %v1827_v43 = vmul.f32 %v1802_v11, %v4647_v57  ;;  %v1881_v1 = vadd.f32 %v1873_v17, %v1825_v23 }
 0x479   : > { %v1935_v49 = vadd.f32 %v1927_v38, %v1879_v41  ;;  %v1728_v3 = vrot.slane %v1700_v24, %v4606_v15  ;;  %v1798_v28 = vrot.slane %v1679_v35, %v4616_v26  ;;  %v1854_v56 = vrot.slane %v5139_v33, %v4616_v26 }
 0x47a   : > { %v1936_v55 = vadd.f32 %v1928_v39, %v1880_v42  ;;  %v1875_v48 = vmul.f32 %v1850_v10, %v4639_v51  ;;  %v1906_v19 = vrot.slane %v1714_v25, %v4616_v26  ;;  %v1929_v37 = vmul.f32 %v1898_v27, %v4653_v62 }
 0x47b   : > { %v1943_v58 = vadd.f32 %v1935_v49, %v4678_v32  ;;  %v1731_v60 = vcombine.high %v5131_v2, %v5131_v2  ;;  %v1680_v61 = vcombine.high %v1676_v13, %v1676_v13  ;;  %v1810_v30 = vrot.slane %v1678_v45, %v4616_v26 }
 0x47c   : > { %v1944_v59 = vadd.f32 %v1936_v55, %v4678_v32  ;;  %v1828_v4 = vmul.f32 %v1806_v46, %v4647_v57  ;;  %v1883_v29 = vadd.f32 %v1875_v48, %v1827_v43  ;;  %v1937_v44 = vadd.f32 %v1929_v37, %v1881_v1 }
 0x47d   : > { %4255 = vtanh.f32 %v1943_v58  ;;  %v1782_v5 = vcombine.high %v5139_v33, %v5139_v33  ;;  %v1826_v6 = vmul.f32 %v1798_v28, %v4647_v57  ;;  %v1730_v7 = vcombine.high %v1714_v25, %v1714_v25 }
 0x47e   : > { %4257 = vtanh.f32 %v1944_v59  ;;  %v1910_v2 = vrot.slane %v1728_v3, %v4616_v26  ;;  %v1931_v8 = vmul.f32 %v1906_v19, %v4653_v62  ;;  %v1876_v21 = vmul.f32 %v1854_v56, %v4639_v51 }
 0x47f   : > { %v1902_v9 = vrot.slane %v1731_v60, %v4616_v26  ;;  %v1814_v10 = vrot.slane %v1680_v61, %v4616_v26  ;;  %v1874_v54 = vmul.f32 %v1846_v63, %v4639_v51  ;;  %v1829_v33 = vmul.f32 %v1810_v30, %v4647_v57 }
 0x480   : > { %v1884_v31 = vadd.f32 %v1876_v21, %v1828_v4  ;;  %v1939_v12 = vadd.f32 %v1931_v8, %v1883_v29  ;;  %v1945_v53 = vadd.f32 %v1937_v44, %v4678_v32  ;;  %v1862_v13 = vrot.slane %v1782_v5, %v4616_v26 }
 0x481   : > { %v1882_v14 = vadd.f32 %v1874_v54, %v1826_v6  ;;  %v1732_v16 = vcombine.high %v1728_v3, %v1728_v3  ;;  %v1914_v17 = vrot.slane %v1730_v7, %v4616_v26  ;;  %v1932_v11 = vmul.f32 %v1910_v2, %v4653_v62 }
 0x482   : > { %v1877_v18 = vmul.f32 %v1858_v20, %v4639_v51  ;;  %v1930_v22 = vmul.f32 %v1902_v9, %v4653_v62  ;;  %v1830_v23 = vmul.f32 %v1814_v10, %v4647_v57  ;;  %v1947_v27 = vadd.f32 %v1939_v12, %v4678_v32 }
 0x483   : > { %v1940_v25 = vadd.f32 %v1932_v11, %v1884_v31  ;;  %4259 = vtanh.f32 %v1945_v53  ;;  %v1918_v39 = vrot.slane %v1732_v16, %v4616_v26  ;;  %v1933_v41 = vmul.f32 %v1914_v17, %v4653_v62 }
 0x484   : > { %v1885_v24 = vadd.f32 %v1877_v18, %v1829_v33  ;;  %v1938_v35 = vadd.f32 %v1930_v22, %v1882_v14  ;;  %v1878_v42 = vmul.f32 %v1862_v13, %v4639_v51  ;;  %4261 = vtanh.f32 %v1947_v27 }
 0x485   : > { %v1948_v46 = vadd.f32 %v1940_v25, %v4678_v32  ;;  %v1934_v1 = vmul.f32 %v1918_v39, %v4653_v62 }
 0x486   : > { %v1886_v34 = vadd.f32 %v1878_v42, %v1830_v23  ;;  %v1941_v50 = vadd.f32 %v1933_v41, %v1885_v24  ;;  %v1946_v43 = vadd.f32 %v1938_v35, %v4678_v32 }
 0x487   : > { %v4256_v38 = vpop.eup %4255  ;;  %4263 = vtanh.f32 %v1948_v46 }
 0x488   : > { %v4258_v45 = vpop.eup %4257  ;;  %1959 = vrot.lane.b32.xlu1 %v4256_v38, %s4438_s14  ;;  %v1942_v49 = vadd.f32 %v1934_v1, %v1886_v34  ;;  %v1949_v55 = vadd.f32 %v1941_v50, %v4678_v32  ;;  %4265 = vtanh.f32 %v1946_v43  ;;  %v1999_v63 = vmul.f32 %v4256_v38, %v4742_v36 }
 0x489   : > { %1961 = vrot.lane.b32.xlu0 %v4258_v45, %s4438_s14  ;;  %v2000_v4 = vmul.f32 %v4258_v45, %v4742_v36 }
 0x48a   : > { %v1950_v28 = vadd.f32 %v1942_v49, %v4678_v32  ;;  %4267 = vtanh.f32 %v1949_v55 }
 0x48c   : > { %1975 = vrot.lane.b32.xlu1 %v4256_v38, %s4440_s15  ;;  %4269 = vtanh.f32 %v1950_v28 }
 0x48d   : > { %1977 = vrot.lane.b32.xlu0 %v4258_v45, %s4440_s15  ;;  %v4260_v3 = vpop.eup %4259 }
 0x48e   : > { %v4262_v56 = vpop.eup %4261  ;;  %v2001_v54 = vmul.f32 %v4260_v3, %v4742_v36 }
 0x48f   : > { %v2003_v22 = vmul.f32 %v4262_v56, %v4742_v36 }
 0x490   : > { %1963 = vrot.lane.b32.xlu1 %v4260_v3, %s4438_s14 }
 0x491   : > { %1979 = vrot.lane.b32.xlu0 %v4260_v3, %s4440_s15  ;;  %v5212_v48 = vpop.eup %4263 }
 0x492   : > { %v4266_v19 = vpop.eup %4265 }
 0x493   : > { %v2002_v28 = vmul.f32 %v4266_v19, %v4742_v36 }
 0x494   : > { %1967 = vrot.lane.b32.xlu1 %v4262_v56, %s4438_s14  ;;  %v5217_v37 = vpop.eup %4267 }
 0x495   : > { %1983 = vrot.lane.b32.xlu0 %v4262_v56, %s4440_s15 }
 0x496   : > { %v5222_v58 = vpop.eup %4269 }
 0x498   : > { %1969 = vrot.lane.b32.xlu1 %v5212_v48, %s4438_s14 }
 0x499   : > { %1965 = vrot.lane.b32.xlu0 %v4266_v19, %s4438_s14 }
 0x49c   : > { %1971 = vrot.lane.b32.xlu1 %v5217_v37, %s4438_s14 }
 0x49d   : > { %1981 = vrot.lane.b32.xlu0 %v4266_v19, %s4440_s15 }
 0x4a0   : > { %1973 = vrot.lane.b32.xlu1 %v5222_v58, %s4438_s14 }
 0x4a1   : > { %1985 = vrot.lane.b32.xlu0 %v5212_v48, %s4440_s15 }
 0x4a4   : > { %1987 = vrot.lane.b32.xlu1 %v5217_v37, %s4440_s15 }
 0x4a5   : > { %1989 = vrot.lane.b32.xlu0 %v5222_v58, %s4440_s15 }
 0x4fa   : > { %v1960_v59 = vpop.permute.xlu1 %1959 }
 0x4fb   : > { %v1991_v60 = vmul.f32 %v1960_v59, %v4745_v40  ;;  %v1962_v61 = vpop.permute.xlu0 %1961 }
 0x4fc   : > { %v1992_v30 = vmul.f32 %v1962_v61, %v4745_v40 }
 0x4fd   : > { %v2007_v44 = vadd.f32 %v1999_v63, %v1991_v60 }
 0x4fe   : > { %v1976_v29 = vpop.permute.xlu1 %1975  ;;  %v2008_v20 = vadd.f32 %v2000_v4, %v1992_v30 }
 0x4ff   : > { %v2015_v5 = vmul.f32 %v1976_v29, %v4750_v47  ;;  %v1978_v6 = vpop.permute.xlu0 %1977 }
 0x500   : > { %v2016_v7 = vmul.f32 %v1978_v6, %v4750_v47 }
 0x501   : > { %v2023_v2 = vadd.f32 %v2015_v5, %v2007_v44  ;;  %v2004_v5 = vmul.f32 %v5212_v48, %v4742_v36  ;;  %v2006_v48 = vmul.f32 %v5222_v58, %v4742_v36 }
 0x502   : > { %v2024_v8 = vadd.f32 %v2016_v7, %v2008_v20  ;;  %v1964_v21 = vpop.permute.xlu1 %1963 }
 0x503   : > { %v2031_v9 = vrot.slane %v2023_v2, 4  ;;  %v1993_v10 = vmul.f32 %v1964_v21, %v4745_v40  ;;  %v1980_v33 = vpop.permute.xlu0 %1979 }
 0x504   : > { %v2037_v31 = vrot.slane %v2024_v8, 4  ;;  %v2017_v12 = vmul.f32 %v1980_v33, %v4750_v47 }
 0x505   : > { %v2032_v53 = vadd.f32 %v2031_v9, %v2023_v2  ;;  %v2009_v13 = vadd.f32 %v2001_v54, %v1993_v10 }
 0x506   : > { %v2038_v14 = vadd.f32 %v2037_v31, %v2024_v8  ;;  %v1968_v16 = vpop.permute.xlu1 %1967  ;;  %v2005_v31 = vmul.f32 %v5217_v37, %v4742_v36 }
 0x507   : > { %v2033_v17 = vrot.slane %v2032_v53, 2  ;;  %v2025_v11 = vadd.f32 %v2017_v12, %v2009_v13  ;;  %v1995_v18 = vmul.f32 %v1968_v16, %v4745_v40  ;;  %v1984_v23 = vpop.permute.xlu0 %1983 }
 0x508   : > { %v2039_v24 = vrot.slane %v2038_v14, 2  ;;  %v2019_v25 = vmul.f32 %v1984_v23, %v4750_v47 }
 0x509   : > { %v2034_v27 = vadd.f32 %v2033_v17, %v2032_v53  ;;  %v2043_v35 = vrot.slane %v2025_v11, 4  ;;  %v2011_v38 = vadd.f32 %v2003_v22, %v1995_v18 }
 0x50a   : > { %v2040_v39 = vadd.f32 %v2039_v24, %v2038_v14  ;;  %v1970_v41 = vpop.permute.xlu1 %1969 }
 0x50b   : > { %v2035_v42 = vrot.slane %v2034_v27, 1  ;;  %v2044_v45 = vadd.f32 %v2043_v35, %v2025_v11  ;;  %v2027_v34 = vadd.f32 %v2019_v25, %v2011_v38  ;;  %v1966_v50 = vpop.permute.xlu0 %1965  ;;  %v1996_v63 = vmul.f32 %v1970_v41, %v4745_v40 }
 0x50c   : > { %v2041_v46 = vrot.slane %v2040_v39, 1  ;;  %v1994_v43 = vmul.f32 %v1966_v50, %v4745_v40 }
 0x50d   : > { %v2045_v1 = vrot.slane %v2044_v45, 2  ;;  %v2055_v49 = vrot.slane %v2027_v34, 4  ;;  %v2036_v55 = vadd.f32 %v2035_v42, %v2034_v27  ;;  %v2012_v21 = vadd.f32 %v2004_v5, %v1996_v63 }
 0x50e   : > { %v2042_v3 = vadd.f32 %v2041_v46, %v2040_v39  ;;  %v1972_v56 = vpop.permute.xlu1 %1971  ;;  %v2010_v4 = vadd.f32 %v2002_v28, %v1994_v43 }
 0x50f   : > { %v2046_v59 = vadd.f32 %v2045_v1, %v2044_v45  ;;  %v2056_v60 = vadd.f32 %v2055_v49, %v2027_v34  ;;  %v1982_v61 = vpop.permute.xlu0 %1981  ;;  %v1997_v19 = vmul.f32 %v1972_v56, %v4745_v40 }
 0x510   : > { %v2087_v30 = vsel %vm676_vm2, %v2042_v3, %v2036_v55  ;;  %v2018_v29 = vmul.f32 %v1982_v61, %v4750_v47 }
 0x511   : > { %v2047_v44 = vrot.slane %v2046_v59, 1  ;;  %v2057_v2 = vrot.slane %v2056_v60, 2  ;;  %v2013_v16 = vadd.f32 %v2005_v31, %v1997_v19 }
 0x512   : > { %v2026_v6 = vadd.f32 %v2018_v29, %v2010_v4  ;;  %v1974_v20 = vpop.permute.xlu1 %1973 }
 0x513   : > { %v2048_v7 = vadd.f32 %v2047_v44, %v2046_v59  ;;  %v1986_v8 = vpop.permute.xlu0 %1985  ;;  %v1998_v10 = vmul.f32 %v1974_v20, %v4745_v40  ;;  %v2058_v14 = vadd.f32 %v2057_v2, %v2056_v60 }
 0x514   : > { %v2049_v9 = vrot.slane %v2026_v6, 4  ;;  %v2020_v54 = vmul.f32 %v1986_v8, %v4750_v47 }
 0x515   : > { %v2088_v33 = vsel %vm678_vm3, %v2048_v7, %v2087_v30  ;;  %v2014_v22 = vadd.f32 %v2006_v48, %v1998_v10  ;;  %v2059_v38 = vrot.slane %v2058_v14, 1 }
 0x516   : > { %v2050_v12 = vadd.f32 %v2049_v9, %v2026_v6  ;;  %v2028_v53 = vadd.f32 %v2020_v54, %v2012_v21  ;;  %v1988_v13 = vpop.permute.xlu1 %1987 }
 0x517   : > { %v2021_v17 = vmul.f32 %v1988_v13, %v4750_v47  ;;  %v1990_v11 = vpop.permute.xlu0 %1989  ;;  %v2060_v43 = vadd.f32 %v2059_v38, %v2058_v14 }
 0x518   : > { %v2051_v18 = vrot.slane %v2050_v12, 2  ;;  %v2061_v23 = vrot.slane %v2028_v53, 4  ;;  %v2022_v24 = vmul.f32 %v1990_v11, %v4750_v47 }
 0x519   : > { %v2029_v25 = vadd.f32 %v2021_v17, %v2013_v16 }
 0x51a   : > { %v2052_v27 = vadd.f32 %v2051_v18, %v2050_v12  ;;  %v2062_v35 = vadd.f32 %v2061_v23, %v2028_v53  ;;  %v2030_v37 = vadd.f32 %v2022_v24, %v2014_v22 }
 0x51b   : > { %v2067_v39 = vrot.slane %v2029_v25, 4 }
 0x51c   : > { %v2053_v41 = vrot.slane %v2052_v27, 1  ;;  %v2063_v58 = vrot.slane %v2062_v35, 2  ;;  %v2073_v42 = vrot.slane %v2030_v37, 4 }
 0x51d   : > { %v2068_v45 = vadd.f32 %v2067_v39, %v2029_v25 }
 0x51e   : > { %v2054_v34 = vadd.f32 %v2053_v41, %v2052_v27  ;;  %v2064_v50 = vadd.f32 %v2063_v58, %v2062_v35  ;;  %v2074_v46 = vadd.f32 %v2073_v42, %v2030_v37 }
 0x51f   : > { %v2069_v1 = vrot.slane %v2068_v45, 2 }
 0x520   : > { %v2089_v49 = vsel %vm680_vm4, %v2054_v34, %v2088_v33  ;;  %v2065_v55 = vrot.slane %v2064_v50, 1  ;;  %v2075_v3 = vrot.slane %v2074_v46, 2 }
 0x521   : > { %v2090_v28 = vsel %vm682_vm5, %v2060_v43, %v2089_v49  ;;  %v2070_v56 = vadd.f32 %v2069_v1, %v2068_v45 }
 0x522   : > { %v2066_v59 = vadd.f32 %v2065_v55, %v2064_v50  ;;  %v2076_v60 = vadd.f32 %v2075_v3, %v2074_v46 }
 0x523   : > { %v2071_v61 = vrot.slane %v2070_v56, 1 }
 0x524   : > { %v2091_v30 = vsel %vm684_vm6, %v2066_v59, %v2090_v28  ;;  %v2077_v63 = vrot.slane %v2076_v60, 1 }
 0x525   : > { %v2072_v4 = vadd.f32 %v2071_v61, %v2070_v56 }
 0x526   : > { %v2078_v29 = vadd.f32 %v2077_v63, %v2076_v60 }
 0x527   : > { %v2092_v44 = vsel %vm686_vm7, %v2072_v4, %v2091_v30 }
 0x528   : > { %v2093_v5 = vsel %vm688_vm8, %v2078_v29, %v2092_v44 }
 0x529   : > { %v2095_v6 = vadd.f32 %v2093_v5, %v5109_v0 }
 0x52b   : > { %v5268_v20 = vadd.f32 %v2095_v6, %v4786_v52 }
 0x52d   : > { %3972 = vst [vmem:[%s4791_s21 + $0x18] sm:$0xff] %v5268_v20  ;;  %2149 = vrot.lane.b32.xlu0 %v5268_v20, %s4440_s15  ;;  %2097 = vrot.lane.b32.xlu1 %v5268_v20, %s4438_s14  ;;  %v2209_v7 = vrot.slane %v5268_v20, %v4606_v15  ;;  %v2202_v2 = vcombine.high %v5268_v20, %v5268_v20 }
 0x52f   : > { %v2217_v10 = vcombine.high %v2209_v7, %v2209_v7  ;;  %v2225_v54 = vrot.slane %v2209_v7, %v4606_v15  ;;  %v2216_v33 = vrot.slane %v2202_v2, %v4606_v15 }
 0x531   : > { %v2239_v13 = vrot.slane %v2217_v10, %v4606_v15  ;;  %v2247_v14 = vcombine.high %v2225_v54, %v2225_v54  ;;  %v2218_v16 = vcombine.high %v2216_v33, %v2216_v33  ;;  %v2232_v18 = vrot.slane %v2216_v33, %v4606_v15 }
 0x532   : > { %v2302_v24 = vrot.slane %v2225_v54, %v4616_v26 }
 0x533   : > { %v2306_v35 = vrot.slane %v2239_v13, %v4616_v26  ;;  %v2310_v37 = vrot.slane %v2247_v14, %v4616_v26  ;;  %v5298_v39 = vrot.slane %v2218_v16, %v4606_v15  ;;  %v2318_v45 = vrot.slane %v2232_v18, %v4616_v26 }
 0x534   : > { %v2339_v49 = vmul.f32 %v2302_v24, %v4639_v51  ;;  %v2248_v2 = vcombine.high %v2232_v18, %v2232_v18 }
 0x535   : > { %v2340_v55 = vmul.f32 %v2306_v35, %v4639_v51  ;;  %v2341_v3 = vmul.f32 %v2310_v37, %v4639_v51 }
 0x536   : > { %v2326_v37 = vrot.slane %v2248_v2, %v4616_v26 }
 0x59f   : > { %v2150_v19 = vpop.permute.xlu0 %2149  ;;  %v2098_v8 = vpop.permute.xlu1 %2097 }
 0x5a0   : > { %v2159_v0 = vrot.slane %v2150_v19, %v4606_v15  ;;  %v2107_v21 = vrot.slane %v2098_v8, %v4606_v15  ;;  %v2100_v9 = vcombine.high %v2098_v8, %v2098_v8  ;;  %v2152_v17 = vcombine.high %v2150_v19, %v2150_v19 }
 0x5a1   : > { %v2249_v19 = vcombine.high %v2239_v13, %v2239_v13 }
 0x5a2   : > { %v2167_v31 = vcombine.high %v2159_v0, %v2159_v0  ;;  %v2115_v12 = vcombine.high %v2107_v21, %v2107_v21  ;;  %v2114_v48 = vrot.slane %v2100_v9, %v4606_v15  ;;  %v2123_v53 = vrot.slane %v2107_v21, %v4606_v15 }
 0x5a3   : > { %v2175_v11 = vrot.slane %v2159_v0, %v4606_v15  ;;  %v2166_v41 = vrot.slane %v2152_v17, %v4606_v15  ;;  %v2314_v18 = vrot.slane %v2249_v19, %v4616_v26 }
 0x5a4   : > { %v5290_v22 = vrot.slane %v2167_v31, %v4606_v15  ;;  %v2137_v23 = vrot.slane %v2115_v12, %v4606_v15  ;;  %v2116_v25 = vcombine.high %v2114_v48, %v2114_v48  ;;  %v2145_v27 = vcombine.high %v2123_v53, %v2123_v53 }
 0x5a5   : > { %v2130_v38 = vrot.slane %v2114_v48, %v4606_v15  ;;  %v2197_v58 = vcombine.high %v2175_v11, %v2175_v11  ;;  %v2254_v42 = vrot.slane %v2123_v53, %v4616_v26  ;;  %v2358_v34 = vrot.slane %v2175_v11, %v4616_v26 }
 0x5a6   : > { %v2362_v50 = vrot.slane %v5290_v22, %v4616_v26  ;;  %v2258_v46 = vrot.slane %v2137_v23, %v4616_v26  ;;  %v2262_v43 = vrot.slane %v2145_v27, %v4616_v26  ;;  %v2144_v1 = vrot.slane %v2116_v25, %v4606_v15 }
 0x5a7   : > { %v2270_v28 = vrot.slane %v2130_v38, %v4616_v26  ;;  %v2291_v56 = vmul.f32 %v2254_v42, %v4647_v57  ;;  %v2168_v61 = vcombine.high %v2166_v41, %v2166_v41  ;;  %v2182_v30 = vrot.slane %v2166_v41, %v4606_v15 }
 0x5a8   : > { %v2292_v59 = vmul.f32 %v2258_v46, %v4647_v57  ;;  %v2293_v60 = vmul.f32 %v2262_v43, %v4647_v57  ;;  %v2366_v63 = vrot.slane %v2197_v58, %v4616_v26  ;;  %v2147_v4 = vcombine.high %v2137_v23, %v2137_v23 }
 0x5a9   : > { %v2395_v29 = vmul.f32 %v2358_v34, %v4653_v62  ;;  %v2396_v44 = vmul.f32 %v2362_v50, %v4653_v62  ;;  %v2347_v5 = vadd.f32 %v2339_v49, %v2291_v56  ;;  %v2146_v7 = vcombine.high %v2130_v38, %v2130_v38 }
 0x5aa   : > { %v2348_v6 = vadd.f32 %v2340_v55, %v2292_v59  ;;  %v2274_v8 = vrot.slane %v2144_v1, %v4616_v26  ;;  %v2295_v0 = vmul.f32 %v2270_v28, %v4647_v57  ;;  %v2349_v21 = vadd.f32 %v2341_v3, %v2293_v60 }
 0x5ab   : > { %v2403_v9 = vadd.f32 %v2395_v29, %v2347_v5  ;;  %v2196_v54 = vrot.slane %v2168_v61, %v4606_v15  ;;  %v2266_v33 = vrot.slane %v2147_v4, %v4616_v26  ;;  %v2322_v31 = vrot.slane %v5298_v39, %v4616_v26 }
 0x5ac   : > { %v2404_v10 = vadd.f32 %v2396_v44, %v2348_v6  ;;  %v2343_v12 = vmul.f32 %v2318_v45, %v4639_v51  ;;  %v2374_v48 = vrot.slane %v2182_v30, %v4616_v26  ;;  %v2397_v53 = vmul.f32 %v2366_v63, %v4653_v62 }
 0x5ad   : > { %v2411_v13 = vadd.f32 %v2403_v9, %v4678_v32  ;;  %v2199_v16 = vcombine.high %v5290_v22, %v5290_v22  ;;  %v2148_v17 = vcombine.high %v2144_v1, %v2144_v1  ;;  %v2278_v11 = vrot.slane %v2146_v7, %v4616_v26 }
 0x5ae   : > { %v2412_v14 = vadd.f32 %v2404_v10, %v4678_v32  ;;  %v2296_v23 = vmul.f32 %v2274_v8, %v4647_v57  ;;  %v2351_v24 = vadd.f32 %v2343_v12, %v2295_v0  ;;  %v2405_v25 = vadd.f32 %v2397_v53, %v2349_v21 }
 0x5af   : > { %4271 = vtanh.f32 %v2411_v13  ;;  %v2250_v27 = vcombine.high %v5298_v39, %v5298_v39  ;;  %v2294_v35 = vmul.f32 %v2266_v33, %v4647_v57  ;;  %v2198_v38 = vcombine.high %v2182_v30, %v2182_v30 }
 0x5b0   : > { %4273 = vtanh.f32 %v2412_v14  ;;  %v2378_v22 = vrot.slane %v2196_v54, %v4616_v26  ;;  %v2399_v41 = vmul.f32 %v2374_v48, %v4653_v62  ;;  %v2344_v58 = vmul.f32 %v2322_v31, %v4639_v51 }
 0x5b1   : > { %v2370_v42 = vrot.slane %v2199_v16, %v4616_v26  ;;  %v2282_v45 = vrot.slane %v2148_v17, %v4616_v26  ;;  %v2342_v34 = vmul.f32 %v2314_v18, %v4639_v51  ;;  %v2297_v39 = vmul.f32 %v2278_v11, %v4647_v57 }
 0x5b2   : > { %v2352_v50 = vadd.f32 %v2344_v58, %v2296_v23  ;;  %v2407_v46 = vadd.f32 %v2399_v41, %v2351_v24  ;;  %v2413_v43 = vadd.f32 %v2405_v25, %v4678_v32  ;;  %v2330_v1 = vrot.slane %v2250_v27, %v4616_v26 }
 0x5b3   : > { %v2350_v49 = vadd.f32 %v2342_v34, %v2294_v35  ;;  %v2200_v55 = vcombine.high %v2196_v54, %v2196_v54  ;;  %v2382_v3 = vrot.slane %v2198_v38, %v4616_v26  ;;  %v2400_v28 = vmul.f32 %v2378_v22, %v4653_v62 }
 0x5b4   : > { %v2345_v56 = vmul.f32 %v2326_v37, %v4639_v51  ;;  %v2398_v59 = vmul.f32 %v2370_v42, %v4653_v62  ;;  %v2298_v60 = vmul.f32 %v2282_v45, %v4647_v57  ;;  %v2415_v63 = vadd.f32 %v2407_v46, %v4678_v32 }
 0x5b5   : > { %v2408_v30 = vadd.f32 %v2400_v28, %v2352_v50  ;;  %4275 = vtanh.f32 %v2413_v43  ;;  %v2386_v44 = vrot.slane %v2200_v55, %v4616_v26  ;;  %v2401_v5 = vmul.f32 %v2382_v3, %v4653_v62 }
 0x5b6   : > { %v2353_v61 = vadd.f32 %v2345_v56, %v2297_v39  ;;  %v2406_v4 = vadd.f32 %v2398_v59, %v2350_v49  ;;  %v2346_v6 = vmul.f32 %v2330_v1, %v4639_v51  ;;  %4277 = vtanh.f32 %v2415_v63 }
 0x5b7   : > { %v2416_v8 = vadd.f32 %v2408_v30, %v4678_v32  ;;  %v2402_v21 = vmul.f32 %v2386_v44, %v4653_v62 }
 0x5b8   : > { %v2354_v2 = vadd.f32 %v2346_v6, %v2298_v60  ;;  %v2409_v19 = vadd.f32 %v2401_v5, %v2353_v61  ;;  %v2414_v0 = vadd.f32 %v2406_v4, %v4678_v32 }
 0x5b9   : > { %v4272_v29 = vpop.eup %4271  ;;  %4279 = vtanh.f32 %v2416_v8 }
 0x5ba   : > { %v4274_v7 = vpop.eup %4273  ;;  %2427 = vrot.lane.b32.xlu1 %v4272_v29, %s4438_s14  ;;  %v2410_v9 = vadd.f32 %v2402_v21, %v2354_v2  ;;  %v2417_v10 = vadd.f32 %v2409_v19, %v4678_v32  ;;  %4281 = vtanh.f32 %v2414_v0  ;;  %v2467_v18 = vmul.f32 %v4272_v29, %v4742_v36 }
 0x5bb   : > { %2429 = vrot.lane.b32.xlu0 %v4274_v7, %s4438_s14  ;;  %v2468_v23 = vmul.f32 %v4274_v7, %v4742_v36 }
 0x5bc   : > { %v2418_v33 = vadd.f32 %v2410_v9, %v4678_v32  ;;  %4283 = vtanh.f32 %v2417_v10 }
 0x5be   : > { %2443 = vrot.lane.b32.xlu1 %v4272_v29, %s4440_s15  ;;  %4285 = vtanh.f32 %v2418_v33 }
 0x5bf   : > { %2445 = vrot.lane.b32.xlu0 %v4274_v7, %s4440_s15  ;;  %v4276_v54 = vpop.eup %4275 }
 0x5c0   : > { %v4278_v31 = vpop.eup %4277  ;;  %v2469_v34 = vmul.f32 %v4276_v54, %v4742_v36 }
 0x5c1   : > { %v2471_v59 = vmul.f32 %v4278_v31, %v4742_v36 }
 0x5c2   : > { %2431 = vrot.lane.b32.xlu1 %v4276_v54, %s4438_s14 }
 0x5c3   : > { %2447 = vrot.lane.b32.xlu0 %v4276_v54, %s4440_s15  ;;  %v5371_v12 = vpop.eup %4279 }
 0x5c4   : > { %v4282_v48 = vpop.eup %4281 }
 0x5c5   : > { %v2470_v33 = vmul.f32 %v4282_v48, %v4742_v36 }
 0x5c6   : > { %2435 = vrot.lane.b32.xlu1 %v4278_v31, %s4438_s14  ;;  %v5376_v53 = vpop.eup %4283 }
 0x5c7   : > { %2451 = vrot.lane.b32.xlu0 %v4278_v31, %s4440_s15 }
 0x5c8   : > { %v5381_v13 = vpop.eup %4285 }
 0x5ca   : > { %2437 = vrot.lane.b32.xlu1 %v5371_v12, %s4438_s14 }
 0x5cb   : > { %2433 = vrot.lane.b32.xlu0 %v4282_v48, %s4438_s14 }
 0x5ce   : > { %2439 = vrot.lane.b32.xlu1 %v5376_v53, %s4438_s14 }
 0x5cf   : > { %2449 = vrot.lane.b32.xlu0 %v4282_v48, %s4440_s15 }
 0x5d2   : > { %2441 = vrot.lane.b32.xlu1 %v5381_v13, %s4438_s14 }
 0x5d3   : > { %2453 = vrot.lane.b32.xlu0 %v5371_v12, %s4440_s15 }
 0x5d6   : > { %2455 = vrot.lane.b32.xlu1 %v5376_v53, %s4440_s15 }
 0x5d7   : > { %2457 = vrot.lane.b32.xlu0 %v5381_v13, %s4440_s15 }
 0x62c   : > { %v2428_v14 = vpop.permute.xlu1 %2427 }
 0x62d   : > { %v2459_v16 = vmul.f32 %v2428_v14, %v4745_v40  ;;  %v2430_v17 = vpop.permute.xlu0 %2429 }
 0x62e   : > { %v2460_v11 = vmul.f32 %v2430_v17, %v4745_v40 }
 0x62f   : > { %v2475_v25 = vadd.f32 %v2467_v18, %v2459_v16 }
 0x630   : > { %v2444_v24 = vpop.permute.xlu1 %2443  ;;  %v2476_v37 = vadd.f32 %v2468_v23, %v2460_v11 }
 0x631   : > { %v2483_v27 = vmul.f32 %v2444_v24, %v4750_v47  ;;  %v2446_v35 = vpop.permute.xlu0 %2445 }
 0x632   : > { %v2484_v38 = vmul.f32 %v2446_v35, %v4750_v47 }
 0x633   : > { %v2491_v22 = vadd.f32 %v2483_v27, %v2475_v25  ;;  %v2472_v27 = vmul.f32 %v5371_v12, %v4742_v36  ;;  %v2474_v12 = vmul.f32 %v5381_v13, %v4742_v36 }
 0x634   : > { %v2492_v41 = vadd.f32 %v2484_v38, %v2476_v37  ;;  %v2432_v58 = vpop.permute.xlu1 %2431 }
 0x635   : > { %v2499_v42 = vrot.slane %v2491_v22, 4  ;;  %v2461_v45 = vmul.f32 %v2432_v58, %v4745_v40  ;;  %v2448_v39 = vpop.permute.xlu0 %2447 }
 0x636   : > { %v2505_v50 = vrot.slane %v2492_v41, 4  ;;  %v2485_v46 = vmul.f32 %v2448_v39, %v4750_v47 }
 0x637   : > { %v2500_v43 = vadd.f32 %v2499_v42, %v2491_v22  ;;  %v2477_v1 = vadd.f32 %v2469_v34, %v2461_v45 }
 0x638   : > { %v2506_v49 = vadd.f32 %v2505_v50, %v2492_v41  ;;  %v2436_v55 = vpop.permute.xlu1 %2435  ;;  %v2473_v50 = vmul.f32 %v5376_v53, %v4742_v36 }
 0x639   : > { %v2501_v3 = vrot.slane %v2500_v43, 2  ;;  %v2493_v28 = vadd.f32 %v2485_v46, %v2477_v1  ;;  %v2463_v56 = vmul.f32 %v2436_v55, %v4745_v40  ;;  %v2452_v60 = vpop.permute.xlu0 %2451 }
 0x63a   : > { %v2507_v61 = vrot.slane %v2506_v49, 2  ;;  %v2487_v30 = vmul.f32 %v2452_v60, %v4750_v47 }
 0x63b   : > { %v2502_v63 = vadd.f32 %v2501_v3, %v2500_v43  ;;  %v2511_v4 = vrot.slane %v2493_v28, 4  ;;  %v2479_v29 = vadd.f32 %v2471_v59, %v2463_v56 }
 0x63c   : > { %v2508_v44 = vadd.f32 %v2507_v61, %v2506_v49  ;;  %v2438_v5 = vpop.permute.xlu1 %2437 }
 0x63d   : > { %v2503_v6 = vrot.slane %v2502_v63, 1  ;;  %v2512_v7 = vadd.f32 %v2511_v4, %v2493_v28  ;;  %v2495_v2 = vadd.f32 %v2487_v30, %v2479_v29  ;;  %v2434_v19 = vpop.permute.xlu0 %2433  ;;  %v2464_v18 = vmul.f32 %v2438_v5, %v4745_v40 }
 0x63e   : > { %v2509_v8 = vrot.slane %v2508_v44, 1  ;;  %v2462_v0 = vmul.f32 %v2434_v19, %v4745_v40 }
 0x63f   : > { %v2513_v21 = vrot.slane %v2512_v7, 2  ;;  %v2523_v9 = vrot.slane %v2495_v2, 4  ;;  %v2504_v10 = vadd.f32 %v2503_v6, %v2502_v63  ;;  %v2480_v58 = vadd.f32 %v2472_v27, %v2464_v18 }
 0x640   : > { %v2510_v54 = vadd.f32 %v2509_v8, %v2508_v44  ;;  %v2440_v31 = vpop.permute.xlu1 %2439  ;;  %v2478_v23 = vadd.f32 %v2470_v33, %v2462_v0 }
 0x641   : > { %v2514_v14 = vadd.f32 %v2513_v21, %v2512_v7  ;;  %v2524_v16 = vadd.f32 %v2523_v9, %v2495_v2  ;;  %v2450_v17 = vpop.permute.xlu0 %2449  ;;  %v2465_v48 = vmul.f32 %v2440_v31, %v4745_v40 }
 0x642   : > { %v2555_v11 = vsel %vm676_vm2, %v2510_v54, %v2504_v10  ;;  %v2486_v24 = vmul.f32 %v2450_v17, %v4750_v47 }
 0x643   : > { %v2515_v25 = vrot.slane %v2514_v14, 1  ;;  %v2525_v22 = vrot.slane %v2524_v16, 2  ;;  %v2481_v55 = vadd.f32 %v2473_v50, %v2465_v48 }
 0x644   : > { %v2494_v35 = vadd.f32 %v2486_v24, %v2478_v23  ;;  %v2442_v37 = vpop.permute.xlu1 %2441 }
 0x645   : > { %v2516_v38 = vadd.f32 %v2515_v25, %v2514_v14  ;;  %v2454_v41 = vpop.permute.xlu0 %2453  ;;  %v2466_v45 = vmul.f32 %v2442_v37, %v4745_v40  ;;  %v2526_v49 = vadd.f32 %v2525_v22, %v2524_v16 }
 0x646   : > { %v2517_v42 = vrot.slane %v2494_v35, 4  ;;  %v2488_v34 = vmul.f32 %v2454_v41, %v4750_v47 }
 0x647   : > { %v2556_v39 = vsel %vm678_vm3, %v2516_v38, %v2555_v11  ;;  %v2482_v59 = vadd.f32 %v2474_v12, %v2466_v45  ;;  %v2527_v29 = vrot.slane %v2526_v49, 1 }
 0x648   : > { %v2518_v46 = vadd.f32 %v2517_v42, %v2494_v35  ;;  %v2496_v43 = vadd.f32 %v2488_v34, %v2480_v58  ;;  %v2456_v1 = vpop.permute.xlu1 %2455 }
 0x649   : > { %v2489_v3 = vmul.f32 %v2456_v1, %v4750_v47  ;;  %v2458_v28 = vpop.permute.xlu0 %2457  ;;  %v2528_v0 = vadd.f32 %v2527_v29, %v2526_v49 }
 0x64a   : > { %v2519_v56 = vrot.slane %v2518_v46, 2  ;;  %v2529_v60 = vrot.slane %v2496_v43, 4  ;;  %v2490_v61 = vmul.f32 %v2458_v28, %v4750_v47 }
 0x64b   : > { %v2497_v30 = vadd.f32 %v2489_v3, %v2481_v55 }
 0x64c   : > { %v2520_v63 = vadd.f32 %v2519_v56, %v2518_v46  ;;  %v2530_v4 = vadd.f32 %v2529_v60, %v2496_v43  ;;  %v2498_v53 = vadd.f32 %v2490_v61, %v2482_v59 }
 0x64d   : > { %v2535_v44 = vrot.slane %v2497_v30, 4 }
 0x64e   : > { %v2521_v5 = vrot.slane %v2520_v63, 1  ;;  %v2531_v13 = vrot.slane %v2530_v4, 2  ;;  %v2541_v6 = vrot.slane %v2498_v53, 4 }
 0x64f   : > { %v2536_v7 = vadd.f32 %v2535_v44, %v2497_v30 }
 0x650   : > { %v2522_v2 = vadd.f32 %v2521_v5, %v2520_v63  ;;  %v2532_v19 = vadd.f32 %v2531_v13, %v2530_v4  ;;  %v2542_v8 = vadd.f32 %v2541_v6, %v2498_v53 }
 0x651   : > { %v2537_v21 = vrot.slane %v2536_v7, 2 }
 0x652   : > { %v2557_v9 = vsel %vm680_vm4, %v2522_v2, %v2556_v39  ;;  %v2533_v10 = vrot.slane %v2532_v19, 1  ;;  %v2543_v54 = vrot.slane %v2542_v8, 2 }
 0x653   : > { %v2558_v33 = vsel %vm682_vm5, %v2528_v0, %v2557_v9  ;;  %v2538_v31 = vadd.f32 %v2537_v21, %v2536_v7 }
 0x654   : > { %v2534_v14 = vadd.f32 %v2533_v10, %v2532_v19  ;;  %v2544_v16 = vadd.f32 %v2543_v54, %v2542_v8 }
 0x655   : > { %v2539_v17 = vrot.slane %v2538_v31, 1 }
 0x656   : > { %v2559_v11 = vsel %vm684_vm6, %v2534_v14, %v2558_v33  ;;  %v2545_v18 = vrot.slane %v2544_v16, 1 }
 0x657   : > { %v2540_v23 = vadd.f32 %v2539_v17, %v2538_v31 }
 0x658   : > { %v2546_v24 = vadd.f32 %v2545_v18, %v2544_v16 }
 0x659   : > { %v2560_v25 = vsel %vm686_vm7, %v2540_v23, %v2559_v11 }
 0x65a   : > { %v2561_v27 = vsel %vm688_vm8, %v2546_v24, %v2560_v25 }
 0x65b   : > { %v2563_v35 = vadd.f32 %v2561_v27, %v5268_v20 }
 0x65d   : > { %v5427_v37 = vadd.f32 %v2563_v35, %v4786_v52 }
 0x65f   : > { %3973 = vst [vmem:[%s4791_s21 + $0x20] sm:$0xff] %v5427_v37  ;;  %2617 = vrot.lane.b32.xlu0 %v5427_v37, %s4440_s15  ;;  %2565 = vrot.lane.b32.xlu1 %v5427_v37, %s4438_s14  ;;  %v2677_v38 = vrot.slane %v5427_v37, %v4606_v15  ;;  %v2670_v22 = vcombine.high %v5427_v37, %v5427_v37 }
 0x661   : > { %v2685_v45 = vcombine.high %v2677_v38, %v2677_v38  ;;  %v2693_v34 = vrot.slane %v2677_v38, %v4606_v15  ;;  %v2684_v39 = vrot.slane %v2670_v22, %v4606_v15 }
 0x663   : > { %v2707_v1 = vrot.slane %v2685_v45, %v4606_v15  ;;  %v2715_v49 = vcombine.high %v2693_v34, %v2693_v34  ;;  %v2686_v55 = vcombine.high %v2684_v39, %v2684_v39  ;;  %v2700_v56 = vrot.slane %v2684_v39, %v4606_v15 }
 0x664   : > { %v2770_v61 = vrot.slane %v2693_v34, %v4616_v26 }
 0x665   : > { %v2774_v4 = vrot.slane %v2707_v1, %v4616_v26  ;;  %v2778_v53 = vrot.slane %v2715_v49, %v4616_v26  ;;  %v5457_v44 = vrot.slane %v2686_v55, %v4606_v15  ;;  %v2786_v7 = vrot.slane %v2700_v56, %v4616_v26 }
 0x666   : > { %v2807_v9 = vmul.f32 %v2770_v61, %v4639_v51  ;;  %v2716_v22 = vcombine.high %v2700_v56, %v2700_v56 }
 0x667   : > { %v2808_v10 = vmul.f32 %v2774_v4, %v4639_v51  ;;  %v2809_v54 = vmul.f32 %v2778_v53, %v4639_v51 }
 0x668   : > { %v2794_v53 = vrot.slane %v2716_v22, %v4616_v26 }
 0x6d1   : > { %v2618_v48 = vpop.permute.xlu0 %2617  ;;  %v2566_v41 = vpop.permute.xlu1 %2565 }
 0x6d2   : > { %v2627_v20 = vrot.slane %v2618_v48, %v4606_v15  ;;  %v2575_v58 = vrot.slane %v2566_v41, %v4606_v15  ;;  %v2568_v42 = vcombine.high %v2566_v41, %v2566_v41  ;;  %v2620_v3 = vcombine.high %v2618_v48, %v2618_v48 }
 0x6d3   : > { %v2717_v48 = vcombine.high %v2707_v1, %v2707_v1 }
 0x6d4   : > { %v2635_v50 = vcombine.high %v2627_v20, %v2627_v20  ;;  %v2583_v46 = vcombine.high %v2575_v58, %v2575_v58  ;;  %v2582_v12 = vrot.slane %v2568_v42, %v4606_v15  ;;  %v2591_v43 = vrot.slane %v2575_v58, %v4606_v15 }
 0x6d5   : > { %v2643_v28 = vrot.slane %v2627_v20, %v4606_v15  ;;  %v2634_v5 = vrot.slane %v2620_v3, %v4606_v15  ;;  %v2782_v56 = vrot.slane %v2717_v48, %v4616_v26 }
 0x6d6   : > { %v5449_v59 = vrot.slane %v2635_v50, %v4606_v15  ;;  %v2605_v60 = vrot.slane %v2583_v46, %v4606_v15  ;;  %v2584_v30 = vcombine.high %v2582_v12, %v2582_v12  ;;  %v2613_v63 = vcombine.high %v2591_v43, %v2591_v43 }
 0x6d7   : > { %v2598_v29 = vrot.slane %v2582_v12, %v4606_v15  ;;  %v2665_v13 = vcombine.high %v2643_v28, %v2643_v28  ;;  %v2722_v6 = vrot.slane %v2591_v43, %v4616_v26  ;;  %v2826_v2 = vrot.slane %v2643_v28, %v4616_v26 }
 0x6d8   : > { %v2830_v19 = vrot.slane %v5449_v59, %v4616_v26  ;;  %v2726_v8 = vrot.slane %v2605_v60, %v4616_v26  ;;  %v2730_v0 = vrot.slane %v2613_v63, %v4616_v26  ;;  %v2612_v21 = vrot.slane %v2584_v30, %v4606_v15 }
 0x6d9   : > { %v2738_v33 = vrot.slane %v2598_v29, %v4616_v26  ;;  %v2759_v31 = vmul.f32 %v2722_v6, %v4647_v57  ;;  %v2636_v17 = vcombine.high %v2634_v5, %v2634_v5  ;;  %v2650_v11 = vrot.slane %v2634_v5, %v4606_v15 }
 0x6da   : > { %v2760_v14 = vmul.f32 %v2726_v8, %v4647_v57  ;;  %v2761_v16 = vmul.f32 %v2730_v0, %v4647_v57  ;;  %v2834_v18 = vrot.slane %v2665_v13, %v4616_v26  ;;  %v2615_v23 = vcombine.high %v2605_v60, %v2605_v60 }
 0x6db   : > { %v2863_v24 = vmul.f32 %v2826_v2, %v4653_v62  ;;  %v2864_v25 = vmul.f32 %v2830_v19, %v4653_v62  ;;  %v2815_v27 = vadd.f32 %v2807_v9, %v2759_v31  ;;  %v2614_v38 = vcombine.high %v2598_v29, %v2598_v29 }
 0x6dc   : > { %v2816_v35 = vadd.f32 %v2808_v10, %v2760_v14  ;;  %v2742_v41 = vrot.slane %v2612_v21, %v4616_v26  ;;  %v2763_v20 = vmul.f32 %v2738_v33, %v4647_v57  ;;  %v2817_v58 = vadd.f32 %v2809_v54, %v2761_v16 }
 0x6dd   : > { %v2871_v42 = vadd.f32 %v2863_v24, %v2815_v27  ;;  %v2664_v34 = vrot.slane %v2636_v17, %v4606_v15  ;;  %v2734_v39 = vrot.slane %v2615_v23, %v4616_v26  ;;  %v2790_v50 = vrot.slane %v5457_v44, %v4616_v26 }
 0x6de   : > { %v2872_v45 = vadd.f32 %v2864_v25, %v2816_v35  ;;  %v2811_v46 = vmul.f32 %v2786_v7, %v4639_v51  ;;  %v2842_v12 = vrot.slane %v2650_v11, %v4616_v26  ;;  %v2865_v43 = vmul.f32 %v2834_v18, %v4653_v62 }
 0x6df   : > { %v2879_v1 = vadd.f32 %v2871_v42, %v4678_v32  ;;  %v2667_v55 = vcombine.high %v5449_v59, %v5449_v59  ;;  %v2616_v3 = vcombine.high %v2612_v21, %v2612_v21  ;;  %v2746_v28 = vrot.slane %v2614_v38, %v4616_v26 }
 0x6e0   : > { %v2880_v49 = vadd.f32 %v2872_v45, %v4678_v32  ;;  %v2764_v60 = vmul.f32 %v2742_v41, %v4647_v57  ;;  %v2819_v61 = vadd.f32 %v2811_v46, %v2763_v20  ;;  %v2873_v30 = vadd.f32 %v2865_v43, %v2817_v58 }
 0x6e1   : > { %4287 = vtanh.f32 %v2879_v1  ;;  %v2718_v63 = vcombine.high %v5457_v44, %v5457_v44  ;;  %v2762_v4 = vmul.f32 %v2734_v39, %v4647_v57  ;;  %v2666_v29 = vcombine.high %v2650_v11, %v2650_v11 }
 0x6e2   : > { %4289 = vtanh.f32 %v2880_v49  ;;  %v2846_v59 = vrot.slane %v2664_v34, %v4616_v26  ;;  %v2867_v5 = vmul.f32 %v2842_v12, %v4653_v62  ;;  %v2812_v13 = vmul.f32 %v2790_v50, %v4639_v51 }
 0x6e3   : > { %v2838_v6 = vrot.slane %v2667_v55, %v4616_v26  ;;  %v2750_v7 = vrot.slane %v2616_v3, %v4616_v26  ;;  %v2810_v2 = vmul.f32 %v2782_v56, %v4639_v51  ;;  %v2765_v44 = vmul.f32 %v2746_v28, %v4647_v57 }
 0x6e4   : > { %v2820_v19 = vadd.f32 %v2812_v13, %v2764_v60  ;;  %v2875_v8 = vadd.f32 %v2867_v5, %v2819_v61  ;;  %v2881_v0 = vadd.f32 %v2873_v30, %v4678_v32  ;;  %v2798_v21 = vrot.slane %v2718_v63, %v4616_v26 }
 0x6e5   : > { %v2818_v9 = vadd.f32 %v2810_v2, %v2762_v4  ;;  %v2668_v10 = vcombine.high %v2664_v34, %v2664_v34  ;;  %v2850_v54 = vrot.slane %v2666_v29, %v4616_v26  ;;  %v2868_v33 = vmul.f32 %v2846_v59, %v4653_v62 }
 0x6e6   : > { %v2813_v31 = vmul.f32 %v2794_v53, %v4639_v51  ;;  %v2866_v14 = vmul.f32 %v2838_v6, %v4653_v62  ;;  %v2766_v16 = vmul.f32 %v2750_v7, %v4647_v57  ;;  %v2883_v18 = vadd.f32 %v2875_v8, %v4678_v32 }
 0x6e7   : > { %v2876_v11 = vadd.f32 %v2868_v33, %v2820_v19  ;;  %4291 = vtanh.f32 %v2881_v0  ;;  %v2854_v25 = vrot.slane %v2668_v10, %v4616_v26  ;;  %v2869_v27 = vmul.f32 %v2850_v54, %v4653_v62 }
 0x6e8   : > { %v2821_v17 = vadd.f32 %v2813_v31, %v2765_v44  ;;  %v2874_v23 = vadd.f32 %v2866_v14, %v2818_v9  ;;  %v2814_v35 = vmul.f32 %v2798_v21, %v4639_v51  ;;  %4293 = vtanh.f32 %v2883_v18 }
 0x6e9   : > { %v2884_v41 = vadd.f32 %v2876_v11, %v4678_v32  ;;  %v2870_v58 = vmul.f32 %v2854_v25, %v4653_v62 }
 0x6ea   : > { %v2822_v22 = vadd.f32 %v2814_v35, %v2766_v16  ;;  %v2877_v48 = vadd.f32 %v2869_v27, %v2821_v17  ;;  %v2882_v20 = vadd.f32 %v2874_v23, %v4678_v32 }
 0x6eb   : > { %v4288_v24 = vpop.eup %4287  ;;  %4295 = vtanh.f32 %v2884_v41 }
 0x6ec   : > { %v4290_v38 = vpop.eup %4289  ;;  %2895 = vrot.lane.b32.xlu1 %v4288_v24, %s4438_s14  ;;  %v2878_v42 = vadd.f32 %v2870_v58, %v2822_v22  ;;  %v2885_v45 = vadd.f32 %v2877_v48, %v4678_v32  ;;  %4297 = vtanh.f32 %v2882_v20  ;;  %v2935_v56 = vmul.f32 %v4288_v24, %v4742_v36 }
 0x6ed   : > { %2897 = vrot.lane.b32.xlu0 %v4290_v38, %s4438_s14  ;;  %v2936_v60 = vmul.f32 %v4290_v38, %v4742_v36 }
 0x6ee   : > { %v2886_v39 = vadd.f32 %v2878_v42, %v4678_v32  ;;  %4299 = vtanh.f32 %v2885_v45 }
 0x6f0   : > { %2911 = vrot.lane.b32.xlu1 %v4288_v24, %s4440_s15  ;;  %4301 = vtanh.f32 %v2886_v39 }
 0x6f1   : > { %2913 = vrot.lane.b32.xlu0 %v4290_v38, %s4440_s15  ;;  %v4292_v34 = vpop.eup %4291 }
 0x6f2   : > { %v4294_v50 = vpop.eup %4293  ;;  %v2937_v2 = vmul.f32 %v4292_v34, %v4742_v36 }
 0x6f3   : > { %v2939_v14 = vmul.f32 %v4294_v50, %v4742_v36 }
 0x6f4   : > { %2899 = vrot.lane.b32.xlu1 %v4292_v34, %s4438_s14 }
 0x6f5   : > { %2915 = vrot.lane.b32.xlu0 %v4292_v34, %s4440_s15  ;;  %v5530_v46 = vpop.eup %4295 }
 0x6f6   : > { %v4298_v12 = vpop.eup %4297 }
 0x6f7   : > { %v2938_v39 = vmul.f32 %v4298_v12, %v4742_v36 }
 0x6f8   : > { %2903 = vrot.lane.b32.xlu1 %v4294_v50, %s4438_s14  ;;  %v5535_v43 = vpop.eup %4299 }
 0x6f9   : > { %2919 = vrot.lane.b32.xlu0 %v4294_v50, %s4440_s15 }
 0x6fa   : > { %v5540_v1 = vpop.eup %4301 }
 0x6fc   : > { %2905 = vrot.lane.b32.xlu1 %v5530_v46, %s4438_s14 }
 0x6fd   : > { %2901 = vrot.lane.b32.xlu0 %v4298_v12, %s4438_s14 }
 0x700   : > { %2907 = vrot.lane.b32.xlu1 %v5535_v43, %s4438_s14 }
 0x701   : > { %2917 = vrot.lane.b32.xlu0 %v4298_v12, %s4440_s15 }
 0x704   : > { %2909 = vrot.lane.b32.xlu1 %v5540_v1, %s4438_s14 }
 0x705   : > { %2921 = vrot.lane.b32.xlu0 %v5530_v46, %s4440_s15 }
 0x708   : > { %2923 = vrot.lane.b32.xlu1 %v5535_v43, %s4440_s15 }
 0x709   : > { %2925 = vrot.lane.b32.xlu0 %v5540_v1, %s4440_s15 }
 0x75e   : > { %v2896_v49 = vpop.permute.xlu1 %2895 }
 0x75f   : > { %v2927_v55 = vmul.f32 %v2896_v49, %v4745_v40  ;;  %v2898_v3 = vpop.permute.xlu0 %2897 }
 0x760   : > { %v2928_v28 = vmul.f32 %v2898_v3, %v4745_v40 }
 0x761   : > { %v2943_v30 = vadd.f32 %v2935_v56, %v2927_v55 }
 0x762   : > { %v2912_v61 = vpop.permute.xlu1 %2911  ;;  %v2944_v53 = vadd.f32 %v2936_v60, %v2928_v28 }
 0x763   : > { %v2951_v63 = vmul.f32 %v2912_v61, %v4750_v47  ;;  %v2914_v4 = vpop.permute.xlu0 %2913 }
 0x764   : > { %v2952_v29 = vmul.f32 %v2914_v4, %v4750_v47 }
 0x765   : > { %v2959_v59 = vadd.f32 %v2951_v63, %v2943_v30  ;;  %v2940_v63 = vmul.f32 %v5530_v46, %v4742_v36  ;;  %v2942_v46 = vmul.f32 %v5540_v1, %v4742_v36 }
 0x766   : > { %v2960_v5 = vadd.f32 %v2952_v29, %v2944_v53  ;;  %v2900_v13 = vpop.permute.xlu1 %2899 }
 0x767   : > { %v2967_v6 = vrot.slane %v2959_v59, 4  ;;  %v2929_v7 = vmul.f32 %v2900_v13, %v4745_v40  ;;  %v2916_v44 = vpop.permute.xlu0 %2915 }
 0x768   : > { %v2973_v19 = vrot.slane %v2960_v5, 4  ;;  %v2953_v8 = vmul.f32 %v2916_v44, %v4750_v47 }
 0x769   : > { %v2968_v0 = vadd.f32 %v2967_v6, %v2959_v59  ;;  %v2945_v21 = vadd.f32 %v2937_v2, %v2929_v7 }
 0x76a   : > { %v2974_v9 = vadd.f32 %v2973_v19, %v2960_v5  ;;  %v2904_v10 = vpop.permute.xlu1 %2903  ;;  %v2941_v19 = vmul.f32 %v5535_v43, %v4742_v36 }
 0x76b   : > { %v2969_v54 = vrot.slane %v2968_v0, 2  ;;  %v2961_v33 = vadd.f32 %v2953_v8, %v2945_v21  ;;  %v2931_v31 = vmul.f32 %v2904_v10, %v4745_v40  ;;  %v2920_v16 = vpop.permute.xlu0 %2919 }
 0x76c   : > { %v2975_v17 = vrot.slane %v2974_v9, 2  ;;  %v2955_v11 = vmul.f32 %v2920_v16, %v4750_v47 }
 0x76d   : > { %v2970_v18 = vadd.f32 %v2969_v54, %v2968_v0  ;;  %v2979_v23 = vrot.slane %v2961_v33, 4  ;;  %v2947_v24 = vadd.f32 %v2939_v14, %v2931_v31 }
 0x76e   : > { %v2976_v25 = vadd.f32 %v2975_v17, %v2974_v9  ;;  %v2906_v27 = vpop.permute.xlu1 %2905 }
 0x76f   : > { %v2971_v35 = vrot.slane %v2970_v18, 1  ;;  %v2980_v38 = vadd.f32 %v2979_v23, %v2961_v33  ;;  %v2963_v22 = vadd.f32 %v2955_v11, %v2947_v24  ;;  %v2902_v48 = vpop.permute.xlu0 %2901  ;;  %v2932_v56 = vmul.f32 %v2906_v27, %v4745_v40 }
 0x770   : > { %v2977_v41 = vrot.slane %v2976_v25, 1  ;;  %v2930_v20 = vmul.f32 %v2902_v48, %v4745_v40 }
 0x771   : > { %v2981_v58 = vrot.slane %v2980_v38, 2  ;;  %v2991_v42 = vrot.slane %v2963_v22, 4  ;;  %v2972_v45 = vadd.f32 %v2971_v35, %v2970_v18  ;;  %v2948_v13 = vadd.f32 %v2940_v63, %v2932_v56 }
 0x772   : > { %v2978_v34 = vadd.f32 %v2977_v41, %v2976_v25  ;;  %v2908_v50 = vpop.permute.xlu1 %2907  ;;  %v2946_v60 = vadd.f32 %v2938_v39, %v2930_v20 }
 0x773   : > { %v2982_v49 = vadd.f32 %v2981_v58, %v2980_v38  ;;  %v2992_v55 = vadd.f32 %v2991_v42, %v2963_v22  ;;  %v2918_v3 = vpop.permute.xlu0 %2917  ;;  %v2933_v12 = vmul.f32 %v2908_v50, %v4745_v40 }
 0x774   : > { %v3023_v28 = vsel %vm676_vm2, %v2978_v34, %v2972_v45  ;;  %v2954_v61 = vmul.f32 %v2918_v3, %v4750_v47 }
 0x775   : > { %v2983_v30 = vrot.slane %v2982_v49, 1  ;;  %v2993_v59 = vrot.slane %v2992_v55, 2  ;;  %v2949_v10 = vadd.f32 %v2941_v19, %v2933_v12 }
 0x776   : > { %v2962_v4 = vadd.f32 %v2954_v61, %v2946_v60  ;;  %v2910_v53 = vpop.permute.xlu1 %2909 }
 0x777   : > { %v2984_v29 = vadd.f32 %v2983_v30, %v2982_v49  ;;  %v2922_v5 = vpop.permute.xlu0 %2921  ;;  %v2934_v7 = vmul.f32 %v2910_v53, %v4745_v40  ;;  %v2994_v9 = vadd.f32 %v2993_v59, %v2992_v55 }
 0x778   : > { %v2985_v6 = vrot.slane %v2962_v4, 4  ;;  %v2956_v2 = vmul.f32 %v2922_v5, %v4750_v47 }
 0x779   : > { %v3024_v44 = vsel %vm678_vm3, %v2984_v29, %v3023_v28  ;;  %v2950_v14 = vadd.f32 %v2942_v46, %v2934_v7  ;;  %v2995_v24 = vrot.slane %v2994_v9, 1 }
 0x77a   : > { %v2986_v8 = vadd.f32 %v2985_v6, %v2962_v4  ;;  %v2964_v0 = vadd.f32 %v2956_v2, %v2948_v13  ;;  %v2924_v21 = vpop.permute.xlu1 %2923 }
 0x77b   : > { %v2957_v54 = vmul.f32 %v2924_v21, %v4750_v47  ;;  %v2926_v33 = vpop.permute.xlu0 %2925  ;;  %v2996_v20 = vadd.f32 %v2995_v24, %v2994_v9 }
 0x77c   : > { %v2987_v31 = vrot.slane %v2986_v8, 2  ;;  %v2997_v16 = vrot.slane %v2964_v0, 4  ;;  %v2958_v17 = vmul.f32 %v2926_v33, %v4750_v47 }
 0x77d   : > { %v2965_v11 = vadd.f32 %v2957_v54, %v2949_v10 }
 0x77e   : > { %v2988_v18 = vadd.f32 %v2987_v31, %v2986_v8  ;;  %v2998_v23 = vadd.f32 %v2997_v16, %v2964_v0  ;;  %v2966_v43 = vadd.f32 %v2958_v17, %v2950_v14 }
 0x77f   : > { %v3003_v25 = vrot.slane %v2965_v11, 4 }
 0x780   : > { %v2989_v27 = vrot.slane %v2988_v18, 1  ;;  %v2999_v1 = vrot.slane %v2998_v23, 2  ;;  %v3009_v35 = vrot.slane %v2966_v43, 4 }
 0x781   : > { %v3004_v38 = vadd.f32 %v3003_v25, %v2965_v11 }
 0x782   : > { %v2990_v22 = vadd.f32 %v2989_v27, %v2988_v18  ;;  %v3000_v48 = vadd.f32 %v2999_v1, %v2998_v23  ;;  %v3010_v41 = vadd.f32 %v3009_v35, %v2966_v43 }
 0x783   : > { %v3005_v58 = vrot.slane %v3004_v38, 2 }
 0x784   : > { %v3025_v42 = vsel %vm680_vm4, %v2990_v22, %v3024_v44  ;;  %v3001_v45 = vrot.slane %v3000_v48, 1  ;;  %v3011_v34 = vrot.slane %v3010_v41, 2 }
 0x785   : > { %v3026_v39 = vsel %vm682_vm5, %v2996_v20, %v3025_v42  ;;  %v3006_v50 = vadd.f32 %v3005_v58, %v3004_v38 }
 0x786   : > { %v3002_v49 = vadd.f32 %v3001_v45, %v3000_v48  ;;  %v3012_v55 = vadd.f32 %v3011_v34, %v3010_v41 }
 0x787   : > { %v3007_v3 = vrot.slane %v3006_v50, 1 }
 0x788   : > { %v3027_v28 = vsel %vm684_vm6, %v3002_v49, %v3026_v39  ;;  %v3013_v56 = vrot.slane %v3012_v55, 1 }
 0x789   : > { %v3008_v60 = vadd.f32 %v3007_v3, %v3006_v50 }
 0x78a   : > { %v3014_v61 = vadd.f32 %v3013_v56, %v3012_v55 }
 0x78b   : > { %v3028_v30 = vsel %vm686_vm7, %v3008_v60, %v3027_v28 }
 0x78c   : > { %v3029_v63 = vsel %vm688_vm8, %v3014_v61, %v3028_v30 }
 0x78d   : > { %v3031_v4 = vadd.f32 %v3029_v63, %v5427_v37 }
 0x78f   : > { %v5586_v53 = vadd.f32 %v3031_v4, %v4786_v52 }
 0x791   : > { %3974 = vst [vmem:[%s4791_s21 + $0x28] sm:$0xff] %v5586_v53  ;;  %3085 = vrot.lane.b32.xlu0 %v5586_v53, %s4440_s15  ;;  %3033 = vrot.lane.b32.xlu1 %v5586_v53, %s4438_s14  ;;  %v3145_v29 = vrot.slane %v5586_v53, %v4606_v15  ;;  %v3138_v59 = vcombine.high %v5586_v53, %v5586_v53 }
 0x793   : > { %v3153_v7 = vcombine.high %v3145_v29, %v3145_v29  ;;  %v3161_v2 = vrot.slane %v3145_v29, %v4606_v15  ;;  %v3152_v44 = vrot.slane %v3138_v59, %v4606_v15 }
 0x795   : > { %v3175_v21 = vrot.slane %v3153_v7, %v4606_v15  ;;  %v3183_v9 = vcombine.high %v3161_v2, %v3161_v2  ;;  %v3154_v10 = vcombine.high %v3152_v44, %v3152_v44  ;;  %v3168_v31 = vrot.slane %v3152_v44, %v4606_v15 }
 0x796   : > { %v3238_v17 = vrot.slane %v3161_v2, %v4616_v26 }
 0x797   : > { %v3242_v23 = vrot.slane %v3175_v21, %v4616_v26  ;;  %v3246_v43 = vrot.slane %v3183_v9, %v4616_v26  ;;  %v5616_v25 = vrot.slane %v3154_v10, %v4606_v15  ;;  %v3254_v38 = vrot.slane %v3168_v31, %v4616_v26 }
 0x798   : > { %v3275_v42 = vmul.f32 %v3238_v17, %v4639_v51  ;;  %v3184_v59 = vcombine.high %v3168_v31, %v3168_v31 }
 0x799   : > { %v3276_v45 = vmul.f32 %v3242_v23, %v4639_v51  ;;  %v3277_v34 = vmul.f32 %v3246_v43, %v4639_v51 }
 0x79a   : > { %v3262_v43 = vrot.slane %v3184_v59, %v4616_v26 }
 0x803   : > { %v3086_v12 = vpop.permute.xlu0 %3085  ;;  %v3034_v5 = vpop.permute.xlu1 %3033 }
 0x804   : > { %v3095_v37 = vrot.slane %v3086_v12, %v4606_v15  ;;  %v3043_v13 = vrot.slane %v3034_v5, %v4606_v15  ;;  %v3036_v6 = vcombine.high %v3034_v5, %v3034_v5  ;;  %v3088_v54 = vcombine.high %v3086_v12, %v3086_v12 }
 0x805   : > { %v3185_v12 = vcombine.high %v3175_v21, %v3175_v21 }
 0x806   : > { %v3103_v19 = vcombine.high %v3095_v37, %v3095_v37  ;;  %v3051_v8 = vcombine.high %v3043_v13, %v3043_v13  ;;  %v3050_v46 = vrot.slane %v3036_v6, %v4606_v15  ;;  %v3059_v0 = vrot.slane %v3043_v13, %v4606_v15 }
 0x807   : > { %v3111_v33 = vrot.slane %v3095_v37, %v4606_v15  ;;  %v3102_v27 = vrot.slane %v3088_v54, %v4606_v15  ;;  %v3250_v31 = vrot.slane %v3185_v12, %v4616_v26 }
 0x808   : > { %v5608_v14 = vrot.slane %v3103_v19, %v4606_v15  ;;  %v3073_v16 = vrot.slane %v3051_v8, %v4606_v15  ;;  %v3052_v11 = vcombine.high %v3050_v46, %v3050_v46  ;;  %v3081_v18 = vcombine.high %v3059_v0, %v3059_v0 }
 0x809   : > { %v3066_v24 = vrot.slane %v3050_v46, %v4606_v15  ;;  %v3133_v1 = vcombine.high %v3111_v33, %v3111_v33  ;;  %v3190_v35 = vrot.slane %v3059_v0, %v4616_v26  ;;  %v3294_v22 = vrot.slane %v3111_v33, %v4616_v26 }
 0x80a   : > { %v3298_v48 = vrot.slane %v5608_v14, %v4616_v26  ;;  %v3194_v41 = vrot.slane %v3073_v16, %v4616_v26  ;;  %v3198_v20 = vrot.slane %v3081_v18, %v4616_v26  ;;  %v3080_v58 = vrot.slane %v3052_v11, %v4606_v15 }
 0x80b   : > { %v3206_v39 = vrot.slane %v3066_v24, %v4616_v26  ;;  %v3227_v50 = vmul.f32 %v3190_v35, %v4647_v57  ;;  %v3104_v3 = vcombine.high %v3102_v27, %v3102_v27  ;;  %v3118_v28 = vrot.slane %v3102_v27, %v4606_v15 }
 0x80c   : > { %v3228_v49 = vmul.f32 %v3194_v41, %v4647_v57  ;;  %v3229_v55 = vmul.f32 %v3198_v20, %v4647_v57  ;;  %v3302_v56 = vrot.slane %v3133_v1, %v4616_v26  ;;  %v3083_v60 = vcombine.high %v3073_v16, %v3073_v16 }
 0x80d   : > { %v3331_v61 = vmul.f32 %v3294_v22, %v4653_v62  ;;  %v3332_v30 = vmul.f32 %v3298_v48, %v4653_v62  ;;  %v3283_v63 = vadd.f32 %v3275_v42, %v3227_v50  ;;  %v3082_v29 = vcombine.high %v3066_v24, %v3066_v24 }
 0x80e   : > { %v3284_v4 = vadd.f32 %v3276_v45, %v3228_v49  ;;  %v3210_v5 = vrot.slane %v3080_v58, %v4616_v26  ;;  %v3231_v37 = vmul.f32 %v3206_v39, %v4647_v57  ;;  %v3285_v13 = vadd.f32 %v3277_v34, %v3229_v55 }
 0x80f   : > { %v3339_v6 = vadd.f32 %v3331_v61, %v3283_v63  ;;  %v3132_v2 = vrot.slane %v3104_v3, %v4606_v15  ;;  %v3202_v44 = vrot.slane %v3083_v60, %v4616_v26  ;;  %v3258_v19 = vrot.slane %v5616_v25, %v4616_v26 }
 0x810   : > { %v3340_v7 = vadd.f32 %v3332_v30, %v3284_v4  ;;  %v3279_v8 = vmul.f32 %v3254_v38, %v4639_v51  ;;  %v3310_v46 = vrot.slane %v3118_v28, %v4616_v26  ;;  %v3333_v0 = vmul.f32 %v3302_v56, %v4653_v62 }
 0x811   : > { %v3347_v21 = vadd.f32 %v3339_v6, %v4678_v32  ;;  %v3135_v10 = vcombine.high %v5608_v14, %v5608_v14  ;;  %v3084_v54 = vcombine.high %v3080_v58, %v3080_v58  ;;  %v3214_v33 = vrot.slane %v3082_v29, %v4616_v26 }
 0x812   : > { %v3348_v9 = vadd.f32 %v3340_v7, %v4678_v32  ;;  %v3232_v16 = vmul.f32 %v3210_v5, %v4647_v57  ;;  %v3287_v17 = vadd.f32 %v3279_v8, %v3231_v37  ;;  %v3341_v11 = vadd.f32 %v3333_v0, %v3285_v13 }
 0x813   : > { %4303 = vtanh.f32 %v3347_v21  ;;  %v3186_v18 = vcombine.high %v5616_v25, %v5616_v25  ;;  %v3230_v23 = vmul.f32 %v3202_v44, %v4647_v57  ;;  %v3134_v24 = vcombine.high %v3118_v28, %v3118_v28 }
 0x814   : > { %4305 = vtanh.f32 %v3348_v9  ;;  %v3314_v14 = vrot.slane %v3132_v2, %v4616_v26  ;;  %v3335_v27 = vmul.f32 %v3310_v46, %v4653_v62  ;;  %v3280_v1 = vmul.f32 %v3258_v19, %v4639_v51 }
 0x815   : > { %v3306_v35 = vrot.slane %v3135_v10, %v4616_v26  ;;  %v3218_v38 = vrot.slane %v3084_v54, %v4616_v26  ;;  %v3278_v22 = vmul.f32 %v3250_v31, %v4639_v51  ;;  %v3233_v25 = vmul.f32 %v3214_v33, %v4647_v57 }
 0x816   : > { %v3288_v48 = vadd.f32 %v3280_v1, %v3232_v16  ;;  %v3343_v41 = vadd.f32 %v3335_v27, %v3287_v17  ;;  %v3349_v20 = vadd.f32 %v3341_v11, %v4678_v32  ;;  %v3266_v58 = vrot.slane %v3186_v18, %v4616_v26 }
 0x817   : > { %v3286_v42 = vadd.f32 %v3278_v22, %v3230_v23  ;;  %v3136_v45 = vcombine.high %v3132_v2, %v3132_v2  ;;  %v3318_v34 = vrot.slane %v3134_v24, %v4616_v26  ;;  %v3336_v39 = vmul.f32 %v3314_v14, %v4653_v62 }
 0x818   : > { %v3281_v50 = vmul.f32 %v3262_v43, %v4639_v51  ;;  %v3334_v49 = vmul.f32 %v3306_v35, %v4653_v62  ;;  %v3234_v55 = vmul.f32 %v3218_v38, %v4647_v57  ;;  %v3351_v56 = vadd.f32 %v3343_v41, %v4678_v32 }
 0x819   : > { %v3344_v28 = vadd.f32 %v3336_v39, %v3288_v48  ;;  %4307 = vtanh.f32 %v3349_v20  ;;  %v3322_v30 = vrot.slane %v3136_v45, %v4616_v26  ;;  %v3337_v63 = vmul.f32 %v3318_v34, %v4653_v62 }
 0x81a   : > { %v3289_v3 = vadd.f32 %v3281_v50, %v3233_v25  ;;  %v3342_v60 = vadd.f32 %v3334_v49, %v3286_v42  ;;  %v3282_v4 = vmul.f32 %v3266_v58, %v4639_v51  ;;  %4309 = vtanh.f32 %v3351_v56 }
 0x81b   : > { %v3352_v5 = vadd.f32 %v3344_v28, %v4678_v32  ;;  %v3338_v13 = vmul.f32 %v3322_v30, %v4653_v62 }
 0x81c   : > { %v3290_v59 = vadd.f32 %v3282_v4, %v3234_v55  ;;  %v3345_v12 = vadd.f32 %v3337_v63, %v3289_v3  ;;  %v3350_v37 = vadd.f32 %v3342_v60, %v4678_v32 }
 0x81d   : > { %v4304_v61 = vpop.eup %4303  ;;  %4311 = vtanh.f32 %v3352_v5 }
 0x81e   : > { %v4306_v29 = vpop.eup %4305  ;;  %3363 = vrot.lane.b32.xlu1 %v4304_v61, %s4438_s14  ;;  %v3346_v6 = vadd.f32 %v3338_v13, %v3290_v59  ;;  %v3353_v7 = vadd.f32 %v3345_v12, %v4678_v32  ;;  %4313 = vtanh.f32 %v3350_v37  ;;  %v3403_v31 = vmul.f32 %v4304_v61, %v4742_v36 }
 0x81f   : > { %3365 = vrot.lane.b32.xlu0 %v4306_v29, %s4438_s14  ;;  %v3404_v16 = vmul.f32 %v4306_v29, %v4742_v36 }
 0x820   : > { %v3354_v44 = vadd.f32 %v3346_v6, %v4678_v32  ;;  %4315 = vtanh.f32 %v3353_v7 }
 0x822   : > { %3379 = vrot.lane.b32.xlu1 %v4304_v61, %s4440_s15  ;;  %4317 = vtanh.f32 %v3354_v44 }
 0x823   : > { %3381 = vrot.lane.b32.xlu0 %v4306_v29, %s4440_s15  ;;  %v4308_v2 = vpop.eup %4307 }
 0x824   : > { %v4310_v19 = vpop.eup %4309  ;;  %v3405_v22 = vmul.f32 %v4308_v2, %v4742_v36 }
 0x825   : > { %v3407_v49 = vmul.f32 %v4310_v19, %v4742_v36 }
 0x826   : > { %3367 = vrot.lane.b32.xlu1 %v4308_v2, %s4438_s14 }
 0x827   : > { %3383 = vrot.lane.b32.xlu0 %v4308_v2, %s4440_s15  ;;  %v5689_v8 = vpop.eup %4311 }
 0x828   : > { %v4314_v46 = vpop.eup %4313 }
 0x829   : > { %v3406_v44 = vmul.f32 %v4314_v46, %v4742_v36 }
 0x82a   : > { %3371 = vrot.lane.b32.xlu1 %v4310_v19, %s4438_s14  ;;  %v5694_v0 = vpop.eup %4315 }
 0x82b   : > { %3387 = vrot.lane.b32.xlu0 %v4310_v19, %s4440_s15 }
 0x82c   : > { %v5699_v21 = vpop.eup %4317 }
 0x82e   : > { %3373 = vrot.lane.b32.xlu1 %v5689_v8, %s4438_s14 }
 0x82f   : > { %3369 = vrot.lane.b32.xlu0 %v4314_v46, %s4438_s14 }
 0x832   : > { %3375 = vrot.lane.b32.xlu1 %v5694_v0, %s4438_s14 }
 0x833   : > { %3385 = vrot.lane.b32.xlu0 %v4314_v46, %s4440_s15 }
 0x836   : > { %3377 = vrot.lane.b32.xlu1 %v5699_v21, %s4438_s14 }
 0x837   : > { %3389 = vrot.lane.b32.xlu0 %v5689_v8, %s4440_s15 }
 0x83a   : > { %3391 = vrot.lane.b32.xlu1 %v5694_v0, %s4440_s15 }
 0x83b   : > { %3393 = vrot.lane.b32.xlu0 %v5699_v21, %s4440_s15 }
 0x890   : > { %v3364_v9 = vpop.permute.xlu1 %3363 }
 0x891   : > { %v3395_v10 = vmul.f32 %v3364_v9, %v4745_v40  ;;  %v3366_v54 = vpop.permute.xlu0 %3365 }
 0x892   : > { %v3396_v33 = vmul.f32 %v3366_v54, %v4745_v40 }
 0x893   : > { %v3411_v11 = vadd.f32 %v3403_v31, %v3395_v10 }
 0x894   : > { %v3380_v17 = vpop.permute.xlu1 %3379  ;;  %v3412_v43 = vadd.f32 %v3404_v16, %v3396_v33 }
 0x895   : > { %v3419_v18 = vmul.f32 %v3380_v17, %v4750_v47  ;;  %v3382_v23 = vpop.permute.xlu0 %3381 }
 0x896   : > { %v3420_v24 = vmul.f32 %v3382_v23, %v4750_v47 }
 0x897   : > { %v3427_v14 = vadd.f32 %v3419_v18, %v3411_v11  ;;  %v3408_v18 = vmul.f32 %v5689_v8, %v4742_v36  ;;  %v3410_v8 = vmul.f32 %v5699_v21, %v4742_v36 }
 0x898   : > { %v3428_v27 = vadd.f32 %v3420_v24, %v3412_v43  ;;  %v3368_v1 = vpop.permute.xlu1 %3367 }
 0x899   : > { %v3435_v35 = vrot.slane %v3427_v14, 4  ;;  %v3397_v38 = vmul.f32 %v3368_v1, %v4745_v40  ;;  %v3384_v25 = vpop.permute.xlu0 %3383 }
 0x89a   : > { %v3441_v48 = vrot.slane %v3428_v27, 4  ;;  %v3421_v41 = vmul.f32 %v3384_v25, %v4750_v47 }
 0x89b   : > { %v3436_v20 = vadd.f32 %v3435_v35, %v3427_v14  ;;  %v3413_v58 = vadd.f32 %v3405_v22, %v3397_v38 }
 0x89c   : > { %v3442_v42 = vadd.f32 %v3441_v48, %v3428_v27  ;;  %v3372_v45 = vpop.permute.xlu1 %3371  ;;  %v3409_v48 = vmul.f32 %v5694_v0, %v4742_v36 }
 0x89d   : > { %v3437_v34 = vrot.slane %v3436_v20, 2  ;;  %v3429_v39 = vadd.f32 %v3421_v41, %v3413_v58  ;;  %v3399_v50 = vmul.f32 %v3372_v45, %v4745_v40  ;;  %v3388_v55 = vpop.permute.xlu0 %3387 }
 0x89e   : > { %v3443_v3 = vrot.slane %v3442_v42, 2  ;;  %v3423_v28 = vmul.f32 %v3388_v55, %v4750_v47 }
 0x89f   : > { %v3438_v56 = vadd.f32 %v3437_v34, %v3436_v20  ;;  %v3447_v60 = vrot.slane %v3429_v39, 4  ;;  %v3415_v61 = vadd.f32 %v3407_v49, %v3399_v50 }
 0x8a0   : > { %v3444_v30 = vadd.f32 %v3443_v3, %v3442_v42  ;;  %v3374_v63 = vpop.permute.xlu1 %3373 }
 0x8a1   : > { %v3439_v4 = vrot.slane %v3438_v56, 1  ;;  %v3448_v29 = vadd.f32 %v3447_v60, %v3429_v39  ;;  %v3431_v59 = vadd.f32 %v3423_v28, %v3415_v61  ;;  %v3370_v12 = vpop.permute.xlu0 %3369  ;;  %v3400_v31 = vmul.f32 %v3374_v63, %v4745_v40 }
 0x8a2   : > { %v3445_v5 = vrot.slane %v3444_v30, 1  ;;  %v3398_v37 = vmul.f32 %v3370_v12, %v4745_v40 }
 0x8a3   : > { %v3449_v13 = vrot.slane %v3448_v29, 2  ;;  %v3459_v6 = vrot.slane %v3431_v59, 4  ;;  %v3440_v7 = vadd.f32 %v3439_v4, %v3438_v56  ;;  %v3416_v1 = vadd.f32 %v3408_v18, %v3400_v31 }
 0x8a4   : > { %v3446_v2 = vadd.f32 %v3445_v5, %v3444_v30  ;;  %v3376_v19 = vpop.permute.xlu1 %3375  ;;  %v3414_v16 = vadd.f32 %v3406_v44, %v3398_v37 }
 0x8a5   : > { %v3450_v9 = vadd.f32 %v3449_v13, %v3448_v29  ;;  %v3460_v10 = vadd.f32 %v3459_v6, %v3431_v59  ;;  %v3386_v54 = vpop.permute.xlu0 %3385  ;;  %v3401_v46 = vmul.f32 %v3376_v19, %v4745_v40 }
 0x8a6   : > { %v3491_v33 = vsel %vm676_vm2, %v3446_v2, %v3440_v7  ;;  %v3422_v17 = vmul.f32 %v3386_v54, %v4750_v47 }
 0x8a7   : > { %v3451_v11 = vrot.slane %v3450_v9, 1  ;;  %v3461_v14 = vrot.slane %v3460_v10, 2  ;;  %v3417_v45 = vadd.f32 %v3409_v48, %v3401_v46 }
 0x8a8   : > { %v3430_v23 = vadd.f32 %v3422_v17, %v3414_v16  ;;  %v3378_v43 = vpop.permute.xlu1 %3377 }
 0x8a9   : > { %v3452_v24 = vadd.f32 %v3451_v11, %v3450_v9  ;;  %v3390_v27 = vpop.permute.xlu0 %3389  ;;  %v3402_v38 = vmul.f32 %v3378_v43, %v4745_v40  ;;  %v3462_v42 = vadd.f32 %v3461_v14, %v3460_v10 }
 0x8aa   : > { %v3453_v35 = vrot.slane %v3430_v23, 4  ;;  %v3424_v22 = vmul.f32 %v3390_v27, %v4750_v47 }
 0x8ab   : > { %v3492_v25 = vsel %vm678_vm3, %v3452_v24, %v3491_v33  ;;  %v3418_v49 = vadd.f32 %v3410_v8, %v3402_v38  ;;  %v3463_v61 = vrot.slane %v3462_v42, 1 }
 0x8ac   : > { %v3454_v41 = vadd.f32 %v3453_v35, %v3430_v23  ;;  %v3432_v20 = vadd.f32 %v3424_v22, %v3416_v1  ;;  %v3392_v58 = vpop.permute.xlu1 %3391 }
 0x8ad   : > { %v3425_v34 = vmul.f32 %v3392_v58, %v4750_v47  ;;  %v3394_v39 = vpop.permute.xlu0 %3393  ;;  %v3464_v37 = vadd.f32 %v3463_v61, %v3462_v42 }
 0x8ae   : > { %v3455_v50 = vrot.slane %v3454_v41, 2  ;;  %v3465_v55 = vrot.slane %v3432_v20, 4  ;;  %v3426_v3 = vmul.f32 %v3394_v39, %v4750_v47 }
 0x8af   : > { %v3433_v28 = vadd.f32 %v3425_v34, %v3417_v45 }
 0x8b0   : > { %v3456_v56 = vadd.f32 %v3455_v50, %v3454_v41  ;;  %v3466_v60 = vadd.f32 %v3465_v55, %v3432_v20  ;;  %v3434_v0 = vadd.f32 %v3426_v3, %v3418_v49 }
 0x8b1   : > { %v3471_v30 = vrot.slane %v3433_v28, 4 }
 0x8b2   : > { %v3457_v63 = vrot.slane %v3456_v56, 1  ;;  %v3467_v21 = vrot.slane %v3466_v60, 2  ;;  %v3477_v4 = vrot.slane %v3434_v0, 4 }
 0x8b3   : > { %v3472_v29 = vadd.f32 %v3471_v30, %v3433_v28 }
 0x8b4   : > { %v3458_v59 = vadd.f32 %v3457_v63, %v3456_v56  ;;  %v3468_v12 = vadd.f32 %v3467_v21, %v3466_v60  ;;  %v3478_v5 = vadd.f32 %v3477_v4, %v3434_v0 }
 0x8b5   : > { %v3473_v13 = vrot.slane %v3472_v29, 2 }
 0x8b6   : > { %v3493_v6 = vsel %vm680_vm4, %v3458_v59, %v3492_v25  ;;  %v3469_v7 = vrot.slane %v3468_v12, 1  ;;  %v3479_v2 = vrot.slane %v3478_v5, 2 }
 0x8b7   : > { %v3494_v44 = vsel %vm682_vm5, %v3464_v37, %v3493_v6  ;;  %v3474_v19 = vadd.f32 %v3473_v13, %v3472_v29 }
 0x8b8   : > { %v3470_v9 = vadd.f32 %v3469_v7, %v3468_v12  ;;  %v3480_v10 = vadd.f32 %v3479_v2, %v3478_v5 }
 0x8b9   : > { %v3475_v54 = vrot.slane %v3474_v19, 1 }
 0x8ba   : > { %v3495_v33 = vsel %vm684_vm6, %v3470_v9, %v3494_v44  ;;  %v3481_v31 = vrot.slane %v3480_v10, 1 }
 0x8bb   : > { %v3476_v16 = vadd.f32 %v3475_v54, %v3474_v19 }
 0x8bc   : > { %v3482_v17 = vadd.f32 %v3481_v31, %v3480_v10 }
 0x8bd   : > { %v3496_v11 = vsel %vm686_vm7, %v3476_v16, %v3495_v33 }
 0x8be   : > { %v3497_v18 = vsel %vm688_vm8, %v3482_v17, %v3496_v11 }
 0x8bf   : > { %v3499_v23 = vadd.f32 %v3497_v18, %v5586_v53 }
 0x8c1   : > { %v5745_v43 = vadd.f32 %v3499_v23, %v4786_v52 }
 0x8c3   : > { %3975 = vst [vmem:[%s4791_s21 + $0x30] sm:$0xff] %v5745_v43  ;;  %3553 = vrot.lane.b32.xlu0 %v5745_v43, %s4440_s15  ;;  %3501 = vrot.lane.b32.xlu1 %v5745_v43, %s4438_s14  ;;  %v3613_v24 = vrot.slane %v5745_v43, %v4606_v15  ;;  %v3606_v14 = vcombine.high %v5745_v43, %v5745_v43 }
 0x8c5   : > { %v3621_v38 = vcombine.high %v3613_v24, %v3613_v24  ;;  %v3629_v22 = vrot.slane %v3613_v24, %v4606_v15  ;;  %v3620_v25 = vrot.slane %v3606_v14, %v4606_v15 }
 0x8c7   : > { %v3643_v58 = vrot.slane %v3621_v38, %v4606_v15  ;;  %v3651_v42 = vcombine.high %v3629_v22, %v3629_v22  ;;  %v3622_v45 = vcombine.high %v3620_v25, %v3620_v25  ;;  %v3636_v50 = vrot.slane %v3620_v25, %v4606_v15 }
 0x8c8   : > { %v3706_v3 = vrot.slane %v3629_v22, %v4616_v26 }
 0x8c9   : > { %v3710_v60 = vrot.slane %v3643_v58, %v4616_v26  ;;  %v3714_v0 = vrot.slane %v3651_v42, %v4616_v26  ;;  %v5775_v30 = vrot.slane %v3622_v45, %v4606_v15  ;;  %v3722_v29 = vrot.slane %v3636_v50, %v4616_v26 }
 0x8ca   : > { %v3743_v6 = vmul.f32 %v3706_v3, %v4639_v51  ;;  %v3652_v14 = vcombine.high %v3636_v50, %v3636_v50 }
 0x8cb   : > { %v3744_v7 = vmul.f32 %v3710_v60, %v4639_v51  ;;  %v3745_v2 = vmul.f32 %v3714_v0, %v4639_v51 }
 0x8cc   : > { %v3730_v60 = vrot.slane %v3652_v14, %v4616_v26 }
 0x935   : > { %v3554_v46 = vpop.permute.xlu0 %3553  ;;  %v3502_v27 = vpop.permute.xlu1 %3501 }
 0x936   : > { %v3563_v53 = vrot.slane %v3554_v46, %v4606_v15  ;;  %v3511_v1 = vrot.slane %v3502_v27, %v4606_v15  ;;  %v3504_v35 = vcombine.high %v3502_v27, %v3502_v27  ;;  %v3556_v34 = vcombine.high %v3554_v46, %v3554_v46 }
 0x937   : > { %v3653_v46 = vcombine.high %v3643_v58, %v3643_v58 }
 0x938   : > { %v3571_v48 = vcombine.high %v3563_v53, %v3563_v53  ;;  %v3519_v41 = vcombine.high %v3511_v1, %v3511_v1  ;;  %v3518_v8 = vrot.slane %v3504_v35, %v4606_v15  ;;  %v3527_v20 = vrot.slane %v3511_v1, %v4606_v15 }
 0x939   : > { %v3579_v39 = vrot.slane %v3563_v53, %v4606_v15  ;;  %v3570_v63 = vrot.slane %v3556_v34, %v4606_v15 }
 0x93a   : > { %v5767_v49 = vrot.slane %v3571_v48, %v4606_v15  ;;  %v3541_v55 = vrot.slane %v3519_v41, %v4606_v15  ;;  %v3520_v28 = vcombine.high %v3518_v8, %v3518_v8  ;;  %v3549_v56 = vcombine.high %v3527_v20, %v3527_v20 }
 0x93b   : > { %v3534_v61 = vrot.slane %v3518_v8, %v4606_v15  ;;  %v3601_v21 = vcombine.high %v3579_v39, %v3579_v39  ;;  %v3658_v4 = vrot.slane %v3527_v20, %v4616_v26  ;;  %v3762_v59 = vrot.slane %v3579_v39, %v4616_v26 }
 0x93c   : > { %v3766_v12 = vrot.slane %v5767_v49, %v4616_v26  ;;  %v3662_v5 = vrot.slane %v3541_v55, %v4616_v26  ;;  %v3666_v37 = vrot.slane %v3549_v56, %v4616_v26  ;;  %v3548_v13 = vrot.slane %v3520_v28, %v4606_v15 }
 0x93d   : > { %v3674_v44 = vrot.slane %v3534_v61, %v4616_v26  ;;  %v3695_v19 = vmul.f32 %v3658_v4, %v4647_v57  ;;  %v3572_v54 = vcombine.high %v3570_v63, %v3570_v63  ;;  %v3586_v33 = vrot.slane %v3570_v63, %v4606_v15 }
 0x93e   : > { %v3696_v9 = vmul.f32 %v3662_v5, %v4647_v57  ;;  %v3697_v10 = vmul.f32 %v3666_v37, %v4647_v57  ;;  %v3770_v31 = vrot.slane %v3601_v21, %v4616_v26  ;;  %v3551_v16 = vcombine.high %v3541_v55, %v3541_v55 }
 0x93f   : > { %v3799_v17 = vmul.f32 %v3762_v59, %v4653_v62  ;;  %v3800_v11 = vmul.f32 %v3766_v12, %v4653_v62  ;;  %v3751_v18 = vadd.f32 %v3743_v6, %v3695_v19  ;;  %v3550_v24 = vcombine.high %v3534_v61, %v3534_v61 }
 0x940   : > { %v3752_v23 = vadd.f32 %v3744_v7, %v3696_v9  ;;  %v3678_v27 = vrot.slane %v3548_v13, %v4616_v26  ;;  %v3699_v53 = vmul.f32 %v3674_v44, %v4647_v57  ;;  %v3753_v1 = vadd.f32 %v3745_v2, %v3697_v10 }
 0x941   : > { %v3807_v35 = vadd.f32 %v3799_v17, %v3751_v18  ;;  %v3600_v22 = vrot.slane %v3572_v54, %v4606_v15  ;;  %v3670_v25 = vrot.slane %v3551_v16, %v4616_v26  ;;  %v3726_v48 = vrot.slane %v5775_v30, %v4616_v26 }
 0x942   : > { %v3808_v38 = vadd.f32 %v3800_v11, %v3752_v23  ;;  %v3747_v41 = vmul.f32 %v3722_v29, %v4639_v51  ;;  %v3778_v8 = vrot.slane %v3586_v33, %v4616_v26  ;;  %v3801_v20 = vmul.f32 %v3770_v31, %v4653_v62 }
 0x943   : > { %v3815_v58 = vadd.f32 %v3807_v35, %v4678_v32  ;;  %v3603_v45 = vcombine.high %v5767_v49, %v5767_v49  ;;  %v3552_v34 = vcombine.high %v3548_v13, %v3548_v13  ;;  %v3682_v15 = vrot.slane %v3550_v24, %v4616_v26 }
 0x944   : > { %v3816_v42 = vadd.f32 %v3808_v38, %v4678_v32  ;;  %v3718_v39 = vrot.slane %v3653_v46, %v4616_v26  ;;  %v3700_v50 = vmul.f32 %v3678_v27, %v4647_v57  ;;  %v3755_v55 = vadd.f32 %v3747_v41, %v3699_v53 }
 0x945   : > { %v3809_v3 = vadd.f32 %v3801_v20, %v3753_v1  ;;  %4319 = vtanh.f32 %v3815_v58  ;;  %v3654_v28 = vcombine.high %v5775_v30, %v5775_v30  ;;  %v3698_v56 = vmul.f32 %v3670_v25, %v4647_v57 }
 0x946   : > { %4321 = vtanh.f32 %v3816_v42  ;;  %v3602_v0 = vcombine.high %v3586_v33, %v3586_v33  ;;  %v3782_v49 = vrot.slane %v3600_v22, %v4616_v26  ;;  %v3803_v61 = vmul.f32 %v3778_v8, %v4653_v62 }
 0x947   : > { %v3748_v63 = vmul.f32 %v3726_v48, %v4639_v51  ;;  %v3774_v21 = vrot.slane %v3603_v45, %v4616_v26  ;;  %v3686_v4 = vrot.slane %v3552_v34, %v4616_v26  ;;  %v3746_v29 = vmul.f32 %v3718_v39, %v4639_v51 }
 0x948   : > { %v3701_v30 = vmul.f32 %v3682_v15, %v4647_v57  ;;  %v3811_v12 = vadd.f32 %v3803_v61, %v3755_v55  ;;  %v3817_v5 = vadd.f32 %v3809_v3, %v4678_v32  ;;  %v3734_v37 = vrot.slane %v3654_v28, %v4616_v26 }
 0x949   : > { %v3756_v59 = vadd.f32 %v3748_v63, %v3700_v50  ;;  %v3754_v13 = vadd.f32 %v3746_v29, %v3698_v56  ;;  %v3604_v6 = vcombine.high %v3600_v22, %v3600_v22  ;;  %v3786_v7 = vrot.slane %v3602_v0, %v4616_v26 }
 0x94a   : > { %v3804_v2 = vmul.f32 %v3782_v49, %v4653_v62  ;;  %v3749_v44 = vmul.f32 %v3730_v60, %v4639_v51  ;;  %v3802_v19 = vmul.f32 %v3774_v21, %v4653_v62  ;;  %v3702_v9 = vmul.f32 %v3686_v4, %v4647_v57 }
 0x94b   : > { %v3819_v33 = vadd.f32 %v3811_v12, %v4678_v32  ;;  %4323 = vtanh.f32 %v3817_v5  ;;  %v3790_v17 = vrot.slane %v3604_v6, %v4616_v26  ;;  %v3805_v11 = vmul.f32 %v3786_v7, %v4653_v62 }
 0x94c   : > { %v3757_v10 = vadd.f32 %v3749_v44, %v3701_v30  ;;  %v3812_v54 = vadd.f32 %v3804_v2, %v3756_v59  ;;  %v3810_v31 = vadd.f32 %v3802_v19, %v3754_v13  ;;  %v3750_v18 = vmul.f32 %v3734_v37, %v4639_v51 }
 0x94d   : > { %4325 = vtanh.f32 %v3819_v33  ;;  %v3806_v27 = vmul.f32 %v3790_v17, %v4653_v62 }
 0x94e   : > { %v3758_v24 = vadd.f32 %v3750_v18, %v3702_v9  ;;  %v3813_v14 = vadd.f32 %v3805_v11, %v3757_v10  ;;  %v3820_v57 = vadd.f32 %v3812_v54, %v4678_v32  ;;  %v3818_v46 = vadd.f32 %v3810_v31, %v4678_v32 }
 0x94f   : > { %v4320_v16 = vpop.eup %4319 }
 0x950   : > { %v4322_v23 = vpop.eup %4321  ;;  %3831 = vrot.lane.b32.xlu1 %v4320_v16, %s4438_s14  ;;  %v3814_v26 = vadd.f32 %v3806_v27, %v3758_v24  ;;  %v3821_v53 = vadd.f32 %v3813_v14, %v4678_v32  ;;  %4327 = vtanh.f32 %v3820_v57  ;;  %v3871_v20 = vmul.f32 %v4320_v16, %v4742_v36 }
 0x951   : > { %3833 = vrot.lane.b32.xlu0 %v4322_v23, %s4438_s14  ;;  %4329 = vtanh.f32 %v3818_v46  ;;  %v3872_v58 = vmul.f32 %v4322_v23, %v4742_v36 }
 0x952   : > { %v3822_v1 = vadd.f32 %v3814_v26, %v4678_v32  ;;  %4331 = vtanh.f32 %v3821_v53 }
 0x954   : > { %3847 = vrot.lane.b32.xlu1 %v4320_v16, %s4440_s15  ;;  %4333 = vtanh.f32 %v3822_v1 }
 0x955   : > { %3849 = vrot.lane.b32.xlu0 %v4322_v23, %s4440_s15  ;;  %v4324_v51 = vpop.eup %4323 }
 0x956   : > { %v3873_v0 = vmul.f32 %v4324_v51, %v4742_v36 }
 0x957   : > { %v4326_v35 = vpop.eup %4325 }
 0x958   : > { %3835 = vrot.lane.b32.xlu1 %v4324_v51, %s4438_s14  ;;  %v3875_v37 = vmul.f32 %v4326_v35, %v4742_v36 }
 0x959   : > { %3851 = vrot.lane.b32.xlu0 %v4324_v51, %s4440_s15 }
 0x95a   : > { %v5848_v62 = vpop.eup %4327 }
 0x95b   : > { %v4330_v38 = vpop.eup %4329 }
 0x95c   : > { %3839 = vrot.lane.b32.xlu1 %v4326_v35, %s4438_s14  ;;  %v5853_v22 = vpop.eup %4331  ;;  %v3874_v57 = vmul.f32 %v4330_v38, %v4742_v36 }
 0x95d   : > { %3855 = vrot.lane.b32.xlu0 %v4326_v35, %s4440_s15 }
 0x95e   : > { %v5858_v32 = vpop.eup %4333 }
 0x960   : > { %3841 = vrot.lane.b32.xlu1 %v5848_v62, %s4438_s14 }
 0x961   : > { %3837 = vrot.lane.b32.xlu0 %v4330_v38, %s4438_s14 }
 0x964   : > { %3843 = vrot.lane.b32.xlu1 %v5853_v22, %s4438_s14 }
 0x965   : > { %3853 = vrot.lane.b32.xlu0 %v4330_v38, %s4440_s15 }
 0x968   : > { %3845 = vrot.lane.b32.xlu1 %v5858_v32, %s4438_s14 }
 0x969   : > { %3857 = vrot.lane.b32.xlu0 %v5848_v62, %s4440_s15 }
 0x96c   : > { %3859 = vrot.lane.b32.xlu1 %v5853_v22, %s4440_s15 }
 0x96d   : > { %3861 = vrot.lane.b32.xlu0 %v5858_v32, %s4440_s15 }
 0x9c2   : > { %v3832_v25 = vpop.permute.xlu1 %3831 }
 0x9c3   : > { %v3863_v48 = vmul.f32 %v3832_v25, %v4745_v40  ;;  %v3834_v41 = vpop.permute.xlu0 %3833 }
 0x9c4   : > { %v3864_v8 = vmul.f32 %v3834_v41, %v4745_v40  ;;  %v3876_v41 = vmul.f32 %v5848_v62, %v4742_v36  ;;  %v3878_v62 = vmul.f32 %v5858_v32, %v4742_v36 }
 0x9c5   : > { %v3879_v45 = vadd.f32 %v3871_v20, %v3863_v48 }
 0x9c6   : > { %v3848_v42 = vpop.permute.xlu1 %3847  ;;  %v3880_v39 = vadd.f32 %v3872_v58, %v3864_v8 }
 0x9c7   : > { %v3887_v34 = vmul.f32 %v3848_v42, %v4750_v47  ;;  %v3850_v15 = vpop.permute.xlu0 %3849 }
 0x9c8   : > { %v3888_v50 = vmul.f32 %v3850_v15, %v4750_v47 }
 0x9c9   : > { %v3895_v55 = vadd.f32 %v3887_v34, %v3879_v45 }
 0x9ca   : > { %v3896_v3 = vadd.f32 %v3888_v50, %v3880_v39  ;;  %v3836_v28 = vpop.permute.xlu1 %3835 }
 0x9cb   : > { %v3903_v56 = vrot.slane %v3895_v55, 4  ;;  %v3865_v60 = vmul.f32 %v3836_v28, %v4745_v40  ;;  %v3852_v49 = vpop.permute.xlu0 %3851 }
 0x9cc   : > { %v3909_v61 = vrot.slane %v3896_v3, 4  ;;  %v3889_v63 = vmul.f32 %v3852_v49, %v4750_v47 }
 0x9cd   : > { %v3904_v21 = vadd.f32 %v3903_v56, %v3895_v55  ;;  %v3881_v4 = vadd.f32 %v3873_v0, %v3865_v60 }
 0x9ce   : > { %v3910_v29 = vadd.f32 %v3909_v61, %v3896_v3  ;;  %v3840_v30 = vpop.permute.xlu1 %3839  ;;  %v3877_v3 = vmul.f32 %v5853_v22, %v4742_v36 }
 0x9cf   : > { %v3905_v59 = vrot.slane %v3904_v21, 2  ;;  %v3897_v12 = vadd.f32 %v3889_v63, %v3881_v4  ;;  %v3867_v5 = vmul.f32 %v3840_v30, %v4745_v40  ;;  %v3856_v13 = vpop.permute.xlu0 %3855 }
 0x9d0   : > { %v3911_v6 = vrot.slane %v3910_v29, 2  ;;  %v3891_v7 = vmul.f32 %v3856_v13, %v4750_v47 }
 0x9d1   : > { %v3906_v2 = vadd.f32 %v3905_v59, %v3904_v21  ;;  %v3915_v44 = vrot.slane %v3897_v12, 4  ;;  %v3883_v19 = vadd.f32 %v3875_v37, %v3867_v5 }
 0x9d2   : > { %v3912_v9 = vadd.f32 %v3911_v6, %v3910_v29  ;;  %v3842_v10 = vpop.permute.xlu1 %3841 }
 0x9d3   : > { %v3907_v54 = vrot.slane %v3906_v2, 1  ;;  %v3916_v33 = vadd.f32 %v3915_v44, %v3897_v12  ;;  %v3899_v31 = vadd.f32 %v3891_v7, %v3883_v19  ;;  %v3838_v16 = vpop.permute.xlu0 %3837  ;;  %v3868_v1 = vmul.f32 %v3842_v10, %v4745_v40 }
 0x9d4   : > { %v3913_v17 = vrot.slane %v3912_v9, 1  ;;  %v3866_v11 = vmul.f32 %v3838_v16, %v4745_v40 }
 0x9d5   : > { %v3917_v18 = vrot.slane %v3916_v33, 2  ;;  %v3927_v23 = vrot.slane %v3899_v31, 4  ;;  %v3908_v24 = vadd.f32 %v3907_v54, %v3906_v2  ;;  %v3884_v34 = vadd.f32 %v3876_v41, %v3868_v1  ;;  %v4031_v1 = vld [vmem:[%s4791_s21 + $0x10] sm:$0xff] (%p4544_p11) }
 0x9d6   : > { %v3914_v14 = vadd.f32 %v3913_v17, %v3912_v9  ;;  %v3844_v46 = vpop.permute.xlu1 %3843  ;;  %v3882_v35 = vadd.f32 %v3874_v57, %v3866_v11  ;;  %4032 = vst [vmem:[%s3985_s24 + $0x20] sm:$0xff] (%p4544_p11), %v4031_v1 }
 0x9d7   : > { %v3918_v27 = vadd.f32 %v3917_v18, %v3916_v33  ;;  %v3928_v26 = vadd.f32 %v3927_v23, %v3899_v31  ;;  %v3854_v53 = vpop.permute.xlu0 %3853  ;;  %v3869_v38 = vmul.f32 %v3844_v46, %v4745_v40 }
 0x9d8   : > { %v3959_v51 = vsel %vm676_vm2, %v3914_v14, %v3908_v24  ;;  %v3890_v25 = vmul.f32 %v3854_v53, %v4750_v47  ;;  %v4027_v53 = vld [vmem:[%s4791_s21] sm:$0xff] (%p4544_p11) }
 0x9d9   : > { %v3919_v48 = vrot.slane %v3918_v27, 1  ;;  %v3929_v42 = vrot.slane %v3928_v26, 2  ;;  %v3885_v49 = vadd.f32 %v3877_v3, %v3869_v38  ;;  %4028 = vst [vmem:[%s3985_s24] sm:$0xff] (%p4544_p11), %v4027_v53 }
 0x9da   : > { %v3898_v8 = vadd.f32 %v3890_v25, %v3882_v35  ;;  %v3846_v20 = vpop.permute.xlu1 %3845  ;;  %v4037_v35 = vld [vmem:[%s4791_s21 + $0x28] sm:$0xff] (%p4544_p11)  ;;  %v4039_v25 = vld [vmem:[%s4791_s21 + $0x30] sm:$0xff] (%p4544_p11) }
 0x9db   : > { %v3920_v58 = vadd.f32 %v3919_v48, %v3918_v27  ;;  %v3858_v45 = vpop.permute.xlu0 %3857  ;;  %v3870_v39 = vmul.f32 %v3846_v20, %v4745_v40  ;;  %v3930_v0 = vadd.f32 %v3929_v42, %v3928_v26  ;;  %4038 = vst [vmem:[%s3985_s24 + $0x50] sm:$0xff] (%p4544_p11), %v4037_v35  ;;  %4040 = vst [vmem:[%s3985_s24 + $0x60] sm:$0xff] (%p4544_p11), %v4039_v25 }
 0x9dc   : > { %v3921_v15 = vrot.slane %v3898_v8, 4  ;;  %v3892_v50 = vmul.f32 %v3858_v45, %v4750_v47 }
 0x9dd   : > { %v3960_v55 = vsel %vm678_vm3, %v3920_v58, %v3959_v51  ;;  %v3886_v40 = vadd.f32 %v3878_v62, %v3870_v39  ;;  %v3931_v5 = vrot.slane %v3930_v0, 1  ;;  %v4029_v51 = vld [vmem:[%s4791_s21 + $0x8] sm:$0xff] (%p4544_p11) }
 0x9de   : > { %v3922_v28 = vadd.f32 %v3921_v15, %v3898_v8  ;;  %v3900_v56 = vadd.f32 %v3892_v50, %v3884_v34  ;;  %v3860_v60 = vpop.permute.xlu1 %3859  ;;  %4030 = vst [vmem:[%s3985_s24 + $0x10] sm:$0xff] (%p4544_p11), %v4029_v51 }
 0x9df   : > { %v3893_v61 = vmul.f32 %v3860_v60, %v4750_v47  ;;  %v3862_v63 = vpop.permute.xlu0 %3861  ;;  %v3932_v19 = vadd.f32 %v3931_v5, %v3930_v0 }
 0x9e0   : > { %v3923_v21 = vrot.slane %v3922_v28, 2  ;;  %v3933_v4 = vrot.slane %v3900_v56, 4  ;;  %v3894_v29 = vmul.f32 %v3862_v63, %v4750_v47 }
 0x9e1   : > { %v3901_v30 = vadd.f32 %v3893_v61, %v3885_v49 }
 0x9e2   : > { %v3924_v59 = vadd.f32 %v3923_v21, %v3922_v28  ;;  %v3934_v12 = vadd.f32 %v3933_v4, %v3900_v56  ;;  %v3902_v22 = vadd.f32 %v3894_v29, %v3886_v40 }
 0x9e3   : > { %v3939_v37 = vrot.slane %v3901_v30, 4 }
 0x9e4   : > { %v3925_v13 = vrot.slane %v3924_v59, 1  ;;  %v3935_v36 = vrot.slane %v3934_v12, 2  ;;  %v3945_v32 = vrot.slane %v3902_v22, 4 }
 0x9e5   : > { %v3940_v6 = vadd.f32 %v3939_v37, %v3901_v30 }
 0x9e6   : > { %v3926_v7 = vadd.f32 %v3925_v13, %v3924_v59  ;;  %v3936_v2 = vadd.f32 %v3935_v36, %v3934_v12  ;;  %v3946_v44 = vadd.f32 %v3945_v32, %v3902_v22 }
 0x9e7   : > { %v3941_v9 = vrot.slane %v3940_v6, 2 }
 0x9e8   : > { %v3961_v10 = vsel %vm680_vm4, %v3926_v7, %v3960_v55  ;;  %v3937_v54 = vrot.slane %v3936_v2, 1  ;;  %v3947_v47 = vrot.slane %v3946_v44, 2 }
 0x9e9   : > { %v3962_v33 = vsel %vm682_vm5, %v3932_v19, %v3961_v10  ;;  %v3942_v31 = vadd.f32 %v3941_v9, %v3940_v6 }
 0x9ea   : > { %v3938_v16 = vadd.f32 %v3937_v54, %v3936_v2  ;;  %v3948_v17 = vadd.f32 %v3947_v47, %v3946_v44 }
 0x9eb   : > { %v3943_v11 = vrot.slane %v3942_v31, 1 }
 0x9ec   : > { %v3963_v18 = vsel %vm684_vm6, %v3938_v16, %v3962_v33  ;;  %v3949_v23 = vrot.slane %v3948_v17, 1 }
 0x9ed   : > { %v3944_v24 = vadd.f32 %v3943_v11, %v3942_v31 }
 0x9ee   : > { %v3950_v14 = vadd.f32 %v3949_v23, %v3948_v17 }
 0x9ef   : > { %v3964_v57 = vsel %vm686_vm7, %v3944_v24, %v3963_v18  ;;  %3983 = sbr.rel (!%p4544_p11) target bundleno = 2558 (0x9fe), region = 40 }
 0x9f0   : > { %v3965_v46 = vsel %vm688_vm8, %v3950_v14, %v3964_v57 }
 0x9f1   : > { %v3967_v27 = vadd.f32 %v3965_v46, %v5745_v43  ;;  %v4035_v43 = vld [vmem:[%s4791_s21 + $0x20] sm:$0xff] (%p4544_p11) }
 0x9f2   : > { %4036 = vst [vmem:[%s3985_s24 + $0x40] sm:$0xff] (%p4544_p11), %v4035_v43 }
 0x9f3   : > { %v3968_v26 = vadd.f32 %v3967_v27, %v4786_v52  ;;  %v4033_v52 = vld [vmem:[%s4791_s21 + $0x18] sm:$0xff] (%p4544_p11) }
 0x9f4   : > { %4034 = vst [vmem:[%s3985_s24 + $0x30] sm:$0xff] (%p4544_p11), %v4033_v52 }
 0x9f5   : > { %3976 = vst [vmem:[%s4791_s21 + $0x38] sm:$0xff] %v3968_v26 }
 0x9fc   : > { %v4041_v48 = vld [vmem:[%s4791_s21 + $0x38] sm:$0xff] }
 0x9fd   : > { %4042 = vst [vmem:[%s3985_s24 + $0x70] sm:$0xff] %v4041_v48 }
 0x9fe PF: > { %p13_p11 = scmp.ge.s32.totalorder %s4501_s18, 4   ;;  %s5950_s9 = smov %s4423_s10 }
 0x9ff   : > { %s5951_s10 = smov %s4427_s11  ;;  %s5952_s11 = smov %s4535_s5 }
 0xa00   : > { %s5953_s12 = smov %s4501_s18  ;;  %15 = sbr.rel (!%p13_p11) target bundleno = 4 (0x4), region = 110 }
 0xa07   :  { %4058 = vsyncpa [#allocation3], 1 }
 0xa08   :  { %4060 = vsyncpa [#allocation3 + $0x1], 1 }
 0xa09   :  { %4061 = vsyncpa [#allocation5], 1 }

</bundles_post_ra>
